<compile_context>
chip_gen: v6e
topology: v6e:2x2x1
jax: 0.10.0
libtpu: 0.0.40
codegen_flags: <defaults>
</compile_context>

<pallas_src>
from functools import partial

import jax
import jax.numpy as jnp
from jax import lax
from jax.experimental import pallas as pl
from jax.experimental.pallas import tpu as pltpu

LANE = 128
BN_EPS = 1e-3
VMEM_LIMIT = 32 * 1024 * 1024   # safe for v5e / v6e / v7x


def _round_up(x, m):
    return ((x + m - 1) // m) * m


def _cpad(c):
    return _round_up(c, LANE)


def _apply_act(y, act):
    if act == "silu":
        return y * jax.nn.sigmoid(y)
    return y  # "none"


def _pick_tile(dim, candidates):
    for c in candidates:
        if dim % c == 0:
            return c
    return dim


# ----------------------------------------------------------------------------
# Pallas kernel 1: tiled matmul with fused bias / SiLU / SE-gate / residual
# ----------------------------------------------------------------------------
def _mm_kernel(*refs, act, has_gate, has_res, nk):
    x_ref, w_ref, b_ref = refs[0], refs[1], refs[2]
    i = 3
    gate_ref = None
    res_ref = None
    if has_gate:
        gate_ref = refs[i]
        i += 1
    if has_res:
        res_ref = refs[i]
        i += 1
    o_ref = refs[i]
    acc_ref = refs[i + 1]

    kidx = pl.program_id(3)

    @pl.when(kidx == 0)
    def _():
        acc_ref[...] = jnp.zeros_like(acc_ref)

    x = x_ref[0]                                        # (tm, tk) bf16
    if has_gate:
        # per-image SE gate multiplies the matmul *input* channels
        x = (x.astype(jnp.float32) * gate_ref[0]).astype(jnp.bfloat16)
    acc_ref[...] += jnp.dot(x, w_ref[...], preferred_element_type=jnp.float32)

    @pl.when(kidx == nk - 1)
    def _():
        y = acc_ref[...] + b_ref[...]                   # folded-BN bias
        y = _apply_act(y, act)
        if has_res:
            y = y + res_ref[0].astype(jnp.float32)      # fused residual add
        o_ref[0] = y.astype(o_ref.dtype)


def pallas_matmul_bias_act(x3, w, bias, act="silu", gate=None, res=None):
    """x3: (B, M, K); w: (K, N); bias: (N,); gate: (B, K) or None;
    res: (B, M, N) or None.  Returns (B, M, N) bf16."""
    B, M, K = x3.shape
    N = w.shape[1]
    tk = _pick_tile(K, (256, 128))
    tn = _pick_tile(N, (256, 128))
    if M <= 512:
        Mp = _round_up(M, 8)
        tm = Mp
    else:
        tm = 512
        Mp = _round_up(M, tm)
    if Mp != M:
        x3 = jnp.pad(x3, ((0, 0), (0, Mp - M), (0, 0)))
        if res is not None:
            res = jnp.pad(res, ((0, 0), (0, Mp - M), (0, 0)))
    nk = K // tk
    grid = (B, Mp // tm, N // tn, nk)

    in_specs = [
        pl.BlockSpec((1, tm, tk), lambda b, m, n, k: (b, m, k)),
        pl.BlockSpec((tk, tn), lambda b, m, n, k: (k, n)),
        pl.BlockSpec((1, tn), lambda b, m, n, k: (0, n)),
    ]
    args = [x3.astype(jnp.bfloat16), w.astype(jnp.bfloat16),
            bias.reshape(1, N).astype(jnp.float32)]
    if gate is not None:
        in_specs.append(pl.BlockSpec((1, 1, tk), lambda b, m, n, k: (b, 0, k)))
        args.append(gate.reshape(B, 1, K).astype(jnp.float32))
    if res is not None:
        in_specs.append(pl.BlockSpec((1, tm, tn), lambda b, m, n, k: (b, m, n)))
        args.append(res.astype(jnp.bfloat16))

    bytes_accessed = (B * Mp * K + K * N + B * Mp * N) * 2
    if res is not None:
        bytes_accessed += B * Mp * N * 2
    cost = pl.CostEstimate(
        flops=2 * B * Mp * N * K,
        transcendentals=(B * Mp * N) if act == "silu" else 0,
        bytes_accessed=bytes_accessed)

    out = pl.pallas_call(
        partial(_mm_kernel, act=act, has_gate=gate is not None,
                has_res=res is not None, nk=nk),
        grid=grid,
        in_specs=in_specs,
        out_specs=pl.BlockSpec((1, tm, tn), lambda b, m, n, k: (b, m, n)),
        out_shape=jax.ShapeDtypeStruct((B, Mp, N), jnp.bfloat16),
        scratch_shapes=[pltpu.VMEM((tm, tn), jnp.float32)],
        compiler_params=pltpu.CompilerParams(
            dimension_semantics=("parallel", "parallel", "parallel", "arbitrary"),
            vmem_limit_bytes=VMEM_LIMIT),
        cost_estimate=cost,
    )(*args)
    return out[:, :M, :] if Mp != M else out


# ----------------------------------------------------------------------------
# Pallas kernel 2: tiled bias + activation (+ residual) epilogue
# ----------------------------------------------------------------------------
def _bias_act_kernel(*refs, act, has_res):
    x_ref, b_ref = refs[0], refs[1]
    i = 2
    res_ref = None
    if has_res:
        res_ref = refs[i]
        i += 1
    o_ref = refs[i]
    y = x_ref[...].astype(jnp.float32) + b_ref[...]
    y = _apply_act(y, act)
    if has_res:
        y = y + res_ref[...].astype(jnp.float32)
    o_ref[...] = y.astype(o_ref.dtype)


def pallas_bias_act(x2d, bias, act="silu", res=None):
    M, C = x2d.shape
    tc = _pick_tile(C, (512, 256, 128))
    if M <= 512:
        Mp = _round_up(M, 8)
        tm = Mp
    else:
        tm = 512
        Mp = _round_up(M, tm)
    if Mp != M:
        x2d = jnp.pad(x2d, ((0, Mp - M), (0, 0)))
        if res is not None:
            res = jnp.pad(res, ((0, Mp - M), (0, 0)))
    in_specs = [
        pl.BlockSpec((tm, tc), lambda m, c: (m, c)),
        pl.BlockSpec((1, tc), lambda m, c: (0, c)),
    ]
    args = [x2d, bias.reshape(1, C).astype(jnp.float32)]
    if res is not None:
        in_specs.append(pl.BlockSpec((tm, tc), lambda m, c: (m, c)))
        args.append(res.astype(jnp.bfloat16))
    out = pl.pallas_call(
        partial(_bias_act_kernel, act=act, has_res=res is not None),
        grid=(Mp // tm, C // tc),
        in_specs=in_specs,
        out_specs=pl.BlockSpec((tm, tc), lambda m, c: (m, c)),
        out_shape=jax.ShapeDtypeStruct((Mp, C), jnp.bfloat16),
        compiler_params=pltpu.CompilerParams(
            dimension_semantics=("parallel", "parallel"),
            vmem_limit_bytes=VMEM_LIMIT),
    )(*args)
    return out[:M] if Mp != M else out


# ----------------------------------------------------------------------------
# Pallas kernel 3: stride-1 depthwise conv (windowed 9-tap FMA, lane-dense C)
# ----------------------------------------------------------------------------
def _dwconv_kernel(x_ref, w_ref, b_ref, o_ref, *, k, act):
    Ho, Wo = o_ref.shape[1], o_ref.shape[2]
    acc = jnp.zeros(o_ref.shape[1:], jnp.float32)
    for kh in range(k):
        for kw in range(k):
            tap = x_ref[0, kh:kh + Ho, kw:kw + Wo, :].astype(jnp.float32)
            acc = acc + tap * w_ref[kh * k + kw][None, None, :]
    y = acc + b_ref[0][None, None, :]
    o_ref[0] = _apply_act(y, act).astype(o_ref.dtype)


def pallas_dwconv_bias_act(x_nhwc, w_kkc, bias, k, act="silu"):
    # TODO(synk): no H-tiling (whole image per grid step); fine for the small
    #             spatial sizes exercised here, would need halo tiles for 224px.
    N, H, W, C = x_nhwc.shape
    pad = (k - 1) // 2
    xp = jnp.pad(x_nhwc.astype(jnp.bfloat16),
                 ((0, 0), (pad, pad), (pad, pad), (0, 0)))
    Hp, Wp = H + 2 * pad, W + 2 * pad
    tc = 128 if C % 128 == 0 else C
    out = pl.pallas_call(
        partial(_dwconv_kernel, k=k, act=act),
        grid=(N, C // tc),
        in_specs=[
            pl.BlockSpec((1, Hp, Wp, tc), lambda n, c: (n, 0, 0, c)),
            pl.BlockSpec((k * k, tc), lambda n, c: (0, c)),
            pl.BlockSpec((1, tc), lambda n, c: (0, c)),
        ],
        out_specs=pl.BlockSpec((1, H, W, tc), lambda n, c: (n, 0, 0, c)),
        out_shape=jax.ShapeDtypeStruct((N, H, W, C), jnp.bfloat16),
        compiler_params=pltpu.CompilerParams(
            dimension_semantics=("parallel", "parallel"),
            vmem_limit_bytes=VMEM_LIMIT),
    )(xp, w_kkc.astype(jnp.float32), bias.reshape(1, C).astype(jnp.float32))
    return out


# ----------------------------------------------------------------------------
# Pallas kernel 4: global average pool
# ----------------------------------------------------------------------------
def _gap_kernel(x_ref, o_ref):
    o_ref[0] = jnp.mean(x_ref[0].astype(jnp.float32), axis=0, keepdims=True)


def pallas_global_avg_pool(x_nhwc):
    N, H, W, C = x_nhwc.shape
    HW = H * W
    x3 = x_nhwc.reshape(N, HW, C)
    out = pl.pallas_call(
        _gap_kernel,
        grid=(N,),
        in_specs=[pl.BlockSpec((1, HW, C), lambda n: (n, 0, 0))],
        out_specs=pl.BlockSpec((1, 1, C), lambda n: (n, 0, 0)),
        out_shape=jax.ShapeDtypeStruct((N, 1, C), jnp.float32),
        compiler_params=pltpu.CompilerParams(
            dimension_semantics=("parallel",),
            vmem_limit_bytes=VMEM_LIMIT),
    )(x3)
    return out.reshape(N, C)


# ----------------------------------------------------------------------------
# Conv wrappers
# ----------------------------------------------------------------------------
def conv1x1_bn_act(x, p, act, gate=None, res=None):
    N, H, W, C = x.shape
    O = p["w"].shape[1]
    if gate is not None:
        x3 = x.reshape(N, H * W, C)
        r3 = res.reshape(N, H * W, O) if res is not None else None
        y = pallas_matmul_bias_act(x3, p["w"], p["b"], act=act, gate=gate, res=r3)
    else:
        x3 = x.reshape(1, N * H * W, C)
        r3 = res.reshape(1, N * H * W, O) if res is not None else None
        y = pallas_matmul_bias_act(x3, p["w"], p["b"], act=act, res=r3)
    return y.reshape(N, H, W, O)


def conv_kxk_bn_act(x, p, stride, act, res=None):
    # Standard kxk conv via XLA conv (no im2col HBM blow-up), Pallas epilogue.
    k = p["w"].shape[0]
    pad = (k - 1) // 2
    y = lax.conv_general_dilated(
        x.astype(jnp.bfloat16), p["w"].astype(jnp.bfloat16),
        window_strides=(stride, stride),
        padding=((pad, pad), (pad, pad)),
        dimension_numbers=("NHWC", "HWIO", "NHWC"),
        preferred_element_type=jnp.float32)
    N, Ho, Wo, O = y.shape
    r2 = res.reshape(N * Ho * Wo, O) if res is not None else None
    out = pallas_bias_act(y.reshape(N * Ho * Wo, O), p["b"], act=act, res=r2)
    return out.reshape(N, Ho, Wo, O)


def dwconv_bn_act(x, p, stride, act="silu"):
    if stride == 1:
        return pallas_dwconv_bias_act(x, p["w"], p["b"], p["k"], act=act)
    # TODO(synk): strided depthwise windows overlap and are not expressible
    # with non-overlapping BlockSpecs; stride>1 falls back to XLA depthwise
    # conv + Pallas epilogue (not exercised by the test config).
    k = p["k"]
    C = x.shape[-1]
    pad = (k - 1) // 2
    w = p["w"].reshape(k, k, 1, C).astype(jnp.bfloat16)
    y = lax.conv_general_dilated(
        x.astype(jnp.bfloat16), w,
        window_strides=(stride, stride),
        padding=((pad, pad), (pad, pad)),
        dimension_numbers=("NHWC", "HWIO", "NHWC"),
        feature_group_count=C,
        preferred_element_type=jnp.float32)
    N, Ho, Wo, O = y.shape
    out = pallas_bias_act(y.reshape(N * Ho * Wo, O), p["b"], act=act)
    return out.reshape(N, Ho, Wo, O)


def se_gate(x_nhwc, p):
    # Batched squeeze-excitation gate; tiny FC matmuls kept in plain JAX;
    # the gate itself is applied fused in the project matmul.
    m = pallas_global_avg_pool(x_nhwc)                    # (N, Cexp_pad) f32
    h = m @ p["w1"] + p["b1"]
    h = h * jax.nn.sigmoid(h)                             # SiLU
    s = h @ p["w2"] + p["b2"]
    return jax.nn.sigmoid(s)                              # (N, Cexp_pad)


# ----------------------------------------------------------------------------
# Parameter init (deterministic, mirrors the PyTorch __init__; BN folded)
# ----------------------------------------------------------------------------
class KeyGen:
    def __init__(self, seed=0):
        self.key = jax.random.PRNGKey(seed)

    def __call__(self):
        self.key, sub = jax.random.split(self.key)
        return sub


def bn_fold(c):
    gamma = jnp.ones((c,), jnp.float32)
    beta = jnp.zeros((c,), jnp.float32)
    mean = jnp.zeros((c,), jnp.float32)
    var = jnp.ones((c,), jnp.float32)
    scale = gamma / jnp.sqrt(var + BN_EPS)
    bias = beta - mean * scale
    return scale, bias


def init_conv_bn(kg, cin, cout, k, cin_pad, cout_pad):
    fan_out = cout * k * k                                # kaiming_normal fan_out
    std = (2.0 / fan_out) ** 0.5
    w = std * jax.random.normal(kg(), (cout, cin, k, k), jnp.float32)
    scale, bias = bn_fold(cout)
    w = w * scale[:, None, None, None]                    # fold BN scale
    w_hwio = jnp.transpose(w, (2, 3, 1, 0))               # (k,k,I,O)
    w_hwio = jnp.pad(w_hwio, ((0, 0), (0, 0),
                              (0, cin_pad - cin), (0, cout_pad - cout)))
    b = jnp.pad(bias, (0, cout_pad - cout))
    if k == 1:
        return {"w": w_hwio.reshape(cin_pad, cout_pad).astype(jnp.bfloat16),
                "b": b, "k": 1}
    return {"w": w_hwio.astype(jnp.bfloat16), "b": b, "k": k}


def init_dwconv_bn(kg, c, k, c_pad):
    fan_out = c * k * k
    std = (2.0 / fan_out) ** 0.5
    w = std * jax.random.normal(kg(), (c, 1, k, k), jnp.float32)
    scale, bias = bn_fold(c)
    w = w * scale[:, None, None, None]
    w_kkc = jnp.transpose(w[:, 0], (1, 2, 0)).reshape(k * k, c)  # tap = kh*k+kw
    w_kkc = jnp.pad(w_kkc, ((0, 0), (0, c_pad - c)))
    b = jnp.pad(bias, (0, c_pad - c))
    return {"w": w_kkc, "b": b, "k": k}


def init_se(kg, in_ch, expand_ch, se_ratio, expand_pad):
    csq = int(in_ch * se_ratio)
    std1 = (2.0 / csq) ** 0.5
    std2 = (2.0 / expand_ch) ** 0.5
    w1 = std1 * jax.random.normal(kg(), (csq, expand_ch), jnp.float32)
    w2 = std2 * jax.random.normal(kg(), (expand_ch, csq), jnp.float32)
    return {
        "w1": jnp.pad(w1.T, ((0, expand_pad - expand_ch), (0, 0))),   # (Cexp_p, csq)
        "b1": jnp.zeros((csq,), jnp.float32),
        "w2": jnp.pad(w2.T, ((0, 0), (0, expand_pad - expand_ch))),   # (csq, Cexp_p)
        "b2": jnp.zeros((expand_pad,), jnp.float32),
    }


def build_params(model_cfg, num_classes, num_features, seed=0):
    kg = KeyGen(seed)
    params = {}
    stem_filters = model_cfg[0][4]
    params["stem"] = init_conv_bn(kg, 3, stem_filters, 3,
                                  cin_pad=3, cout_pad=_cpad(stem_filters))

    blocks = []
    for cfg in model_cfg:
        repeats, k, stride0, expand, cin0, cout, op, se_ratio = cfg
        for i in range(repeats):
            cin = cin0 if i == 0 else cout
            stride = stride0 if i == 0 else 1
            cin_p, cout_p = _cpad(cin), _cpad(cout)
            blk = {"type": "mbconv" if op != 0 else "fused",
                   "stride": stride, "k": k,
                   "use_res": (stride == 1 and cin == cout)}
            if op == 0:                                   # FusedMBConv
                assert se_ratio == 0
                if expand != 1:
                    cexp = cin * expand
                    cexp_p = _cpad(cexp)
                    blk["expand"] = init_conv_bn(kg, cin, cexp, k, cin_p, cexp_p)
                    blk["project"] = init_conv_bn(kg, cexp, cout, 1, cexp_p, cout_p)
                else:
                    blk["project"] = init_conv_bn(kg, cin, cout, k, cin_p, cout_p)
            else:                                         # MBConv
                assert expand != 1
                cexp = cin * expand
                cexp_p = _cpad(cexp)
                blk["expand"] = init_conv_bn(kg, cin, cexp, 1, cin_p, cexp_p)
                blk["dw"] = init_dwconv_bn(kg, cexp, k, cexp_p)
                if se_ratio > 0:
                    blk["se"] = init_se(kg, cin, cexp, se_ratio, cexp_p)
                blk["project"] = init_conv_bn(kg, cexp, cout, 1, cexp_p, cout_p)
            blocks.append(blk)
    params["blocks"] = blocks

    f_pad = _cpad(num_features)
    params["head"] = init_conv_bn(kg, model_cfg[-1][5], num_features, 1,
                                  cin_pad=_cpad(model_cfg[-1][5]), cout_pad=f_pad)
    lin_w = 0.01 * jax.random.normal(kg(), (num_classes, num_features), jnp.float32)
    params["cls_w"] = jnp.pad(lin_w.T, ((0, f_pad - num_features), (0, 0)))
    params["cls_b"] = jnp.zeros((num_classes,), jnp.float32)
    params["num_features"] = num_features
    return params


# ----------------------------------------------------------------------------
# Forward pass
# ----------------------------------------------------------------------------
def fused_mbconv_forward(x, blk):
    res = x if blk["use_res"] else None          # DropPath: eval identity
    if "expand" in blk:
        y = conv_kxk_bn_act(x, blk["expand"], stride=blk["stride"], act="silu")
        y = conv1x1_bn_act(y, blk["project"], act="none", res=res)
    else:
        y = conv_kxk_bn_act(x, blk["project"], stride=blk["stride"], act="silu",
                            res=res)
    return y


def mbconv_forward(x, blk):
    res = x if blk["use_res"] else None          # DropPath: eval identity
    y = conv1x1_bn_act(x, blk["expand"], act="silu")
    y = dwconv_bn_act(y, blk["dw"], stride=blk["stride"], act="silu")
    gate = se_gate(y, blk["se"]) if "se" in blk else None
    y = conv1x1_bn_act(y, blk["project"], act="none", gate=gate, res=res)
    return y


def efficientnetv2_forward(params, x_nchw, is_feat=False):
    x = jnp.transpose(x_nchw, (0, 2, 3, 1)).astype(jnp.bfloat16)   # NCHW -> NHWC
    x = conv_kxk_bn_act(x, params["stem"], stride=2, act="silu")
    for blk in params["blocks"]:
        if blk["type"] == "fused":
            x = fused_mbconv_forward(x, blk)
        else:
            x = mbconv_forward(x, blk)
    x = conv1x1_bn_act(x, params["head"], act="silu")
    feas_pad = pallas_global_avg_pool(x)                  # (N, F_pad) f32
    # classifier: Dropout (eval identity) + tiny Linear in plain JAX
    logits = feas_pad @ params["cls_w"] + params["cls_b"]
    if is_feat:
        return feas_pad[:, :params["num_features"]], logits
    return logits


# ----------------------------------------------------------------------------
# Main
# ----------------------------------------------------------------------------
if __name__ == "__main__":
    # cfg rows: [repeats, kernel, stride, expand_ratio, in_c, out_c, op(0=Fused,1=MB), se_ratio]
    model_cfg = [
        [1, 3, 1, 1, 8, 8, 0, 0.0],       # FusedMBConv, no expansion (residual fused)
        [1, 3, 2, 4, 8, 16, 0, 0.0],      # FusedMBConv with expansion, stride 2
        [1, 3, 1, 4, 16, 16, 1, 0.25],    # MBConv with SE (gate + residual fused)
    ]
    num_classes = 10
    num_features = 64

    params = build_params(model_cfg, num_classes, num_features, seed=0)

    key = jax.random.PRNGKey(0)
    x = jax.random.normal(key, (2, 3, 32, 32), jnp.float32)   # NCHW like PyTorch

    fwd = jax.jit(lambda xx: efficientnetv2_forward(params, xx))
    logits = jax.block_until_ready(fwd(x))
    assert logits.shape == (2, num_classes), logits.shape
    assert bool(jnp.all(jnp.isfinite(logits)))
    print("KERNEL_OK")
</pallas_src>

<mosaic_0001>
module attributes {stable_mosaic.version = 11 : i64} {
  func.func @_bias_act_kernel(%arg0: i32, %arg1: i32, %arg2: memref<512x128xf32, #tpu.memory_space<vmem>>, %arg3: memref<1x128xf32, #tpu.memory_space<vmem>>, %arg4: memref<512x128xbf16, #tpu.memory_space<vmem>>) attributes {dimension_semantics = [#tpu.dimension_semantics<parallel>, #tpu.dimension_semantics<parallel>], iteration_bounds = array<i64: 1, 1>, scalar_prefetch = 0 : i64, scratch_operands = 0 : i64, tpu.core_type = #tpu.core_type<tc>, window_params = [{transform_indices = @transform_0, window_bounds = array<i64: 512, 128>}, {transform_indices = @transform_1, window_bounds = array<i64: 1, 128>}, {transform_indices = @transform_2, window_bounds = array<i64: 512, 128>}]} {
    %c0 = arith.constant 0 : index
    %c0_0 = arith.constant 0 : index
    %0 = vector.load %arg2[%c0, %c0_0] : memref<512x128xf32, #tpu.memory_space<vmem>>, vector<512x128xf32>
    %c0_1 = arith.constant 0 : index
    %c0_2 = arith.constant 0 : index
    %1 = vector.load %arg3[%c0_1, %c0_2] : memref<1x128xf32, #tpu.memory_space<vmem>>, vector<1x128xf32>
    %2 = vector.broadcast %1 : vector<1x128xf32> to vector<512x128xf32>
    %3 = arith.addf %0, %2 : vector<512x128xf32>
    %4 = arith.negf %3 : vector<512x128xf32>
    %5 = math.exp %4 : vector<512x128xf32>
    %cst = arith.constant 1.000000e+00 : f32
    %6 = vector.broadcast %cst : f32 to vector<512x128xf32>
    %7 = arith.addf %6, %5 : vector<512x128xf32>
    %8 = arith.divf %6, %7 : vector<512x128xf32>
    %9 = arith.mulf %3, %8 : vector<512x128xf32>
    %10 = arith.truncf %9 : vector<512x128xf32> to vector<512x128xbf16>
    %c0_3 = arith.constant 0 : index
    %c0_4 = arith.constant 0 : index
    %11 = vector.load %arg4[%c0_3, %c0_4] : memref<512x128xbf16, #tpu.memory_space<vmem>>, vector<512x128xbf16>
    tpu.vector_store %arg4[%c0_3, %c0_4], %10 {strides = array<i32>} : memref<512x128xbf16, #tpu.memory_space<vmem>>, vector<512x128xbf16>,
    return
  }
  func.func @transform_0(%arg0: i32, %arg1: i32) -> (i32, i32) {
    %c0_i32 = arith.constant 0 : i32
    return %arg0, %arg1 : i32, i32
  }
  func.func @transform_1(%arg0: i32, %arg1: i32) -> (i32, i32) {
    %c0_i32 = arith.constant 0 : i32
    %c0_i32_0 = arith.constant 0 : i32
    return %c0_i32, %arg1 : i32, i32
  }
  func.func @transform_2(%arg0: i32, %arg1: i32) -> (i32, i32) {
    %c0_i32 = arith.constant 0 : i32
    return %arg0, %arg1 : i32, i32
  }
}

module attributes {stable_mosaic.version = 11 : i64} {
  func.func @_bias_act_kernel(%arg0: i32, %arg1: i32, %arg2: memref<512x128xf32, #tpu.memory_space<vmem>>, %arg3: memref<1x128xf32, #tpu.memory_space<vmem>>, %arg4: memref<512x128xbf16, #tpu.memory_space<vmem>>, %arg5: memref<512x128xbf16, #tpu.memory_space<vmem>>) attributes {dimension_semantics = [#tpu.dimension_semantics<parallel>, #tpu.dimension_semantics<parallel>], iteration_bounds = array<i64: 1, 1>, scalar_prefetch = 0 : i64, scratch_operands = 0 : i64, tpu.core_type = #tpu.core_type<tc>, window_params = [{transform_indices = @transform_0, window_bounds = array<i64: 512, 128>}, {transform_indices = @transform_1, window_bounds = array<i64: 1, 128>}, {transform_indices = @transform_2, window_bounds = array<i64: 512, 128>}, {transform_indices = @transform_3, window_bounds = array<i64: 512, 128>}]} {
    %c0 = arith.constant 0 : index
    %c0_0 = arith.constant 0 : index
    %0 = vector.load %arg2[%c0, %c0_0] : memref<512x128xf32, #tpu.memory_space<vmem>>, vector<512x128xf32>
    %c0_1 = arith.constant 0 : index
    %c0_2 = arith.constant 0 : index
    %1 = vector.load %arg3[%c0_1, %c0_2] : memref<1x128xf32, #tpu.memory_space<vmem>>, vector<1x128xf32>
    %2 = vector.broadcast %1 : vector<1x128xf32> to vector<512x128xf32>
    %3 = arith.addf %0, %2 : vector<512x128xf32>
    %4 = arith.negf %3 : vector<512x128xf32>
    %5 = math.exp %4 : vector<512x128xf32>
    %cst = arith.constant 1.000000e+00 : f32
    %6 = vector.broadcast %cst : f32 to vector<512x128xf32>
    %7 = arith.addf %6, %5 : vector<512x128xf32>
    %8 = arith.divf %6, %7 : vector<512x128xf32>
    %9 = arith.mulf %3, %8 : vector<512x128xf32>
    %c0_3 = arith.constant 0 : index
    %c0_4 = arith.constant 0 : index
    %10 = vector.load %arg4[%c0_3, %c0_4] : memref<512x128xbf16, #tpu.memory_space<vmem>>, vector<512x128xbf16>
    %11 = arith.extf %10 : vector<512x128xbf16> to vector<512x128xf32>
    %12 = arith.addf %9, %11 : vector<512x128xf32>
    %13 = arith.truncf %12 : vector<512x128xf32> to vector<512x128xbf16>
    %c0_5 = arith.constant 0 : index
    %c0_6 = arith.constant 0 : index
    %14 = vector.load %arg5[%c0_5, %c0_6] : memref<512x128xbf16, #tpu.memory_space<vmem>>, vector<512x128xbf16>
    tpu.vector_store %arg5[%c0_5, %c0_6], %13 {strides = array<i32>} : memref<512x128xbf16, #tpu.memory_space<vmem>>, vector<512x128xbf16>,
    return
  }
  func.func @transform_0(%arg0: i32, %arg1: i32) -> (i32, i32) {
    %c0_i32 = arith.constant 0 : i32
    return %arg0, %arg1 : i32, i32
  }
  func.func @transform_1(%arg0: i32, %arg1: i32) -> (i32, i32) {
    %c0_i32 = arith.constant 0 : i32
    %c0_i32_0 = arith.constant 0 : i32
    return %c0_i32, %arg1 : i32, i32
  }
  func.func @transform_2(%arg0: i32, %arg1: i32) -> (i32, i32) {
    %c0_i32 = arith.constant 0 : i32
    return %arg0, %arg1 : i32, i32
  }
  func.func @transform_3(%arg0: i32, %arg1: i32) -> (i32, i32) {
    %c0_i32 = arith.constant 0 : i32
    return %arg0, %arg1 : i32, i32
  }
}

module attributes {stable_mosaic.version = 11 : i64} {
  func.func @_bias_act_kernel(%arg0: i32, %arg1: i32, %arg2: memref<128x128xf32, #tpu.memory_space<vmem>>, %arg3: memref<1x128xf32, #tpu.memory_space<vmem>>, %arg4: memref<128x128xbf16, #tpu.memory_space<vmem>>) attributes {dimension_semantics = [#tpu.dimension_semantics<parallel>, #tpu.dimension_semantics<parallel>], iteration_bounds = array<i64: 1, 1>, scalar_prefetch = 0 : i64, scratch_operands = 0 : i64, tpu.core_type = #tpu.core_type<tc>, window_params = [{transform_indices = @transform_0, window_bounds = array<i64: 128, 128>}, {transform_indices = @transform_1, window_bounds = array<i64: 1, 128>}, {transform_indices = @transform_2, window_bounds = array<i64: 128, 128>}]} {
    %c0 = arith.constant 0 : index
    %c0_0 = arith.constant 0 : index
    %0 = vector.load %arg2[%c0, %c0_0] : memref<128x128xf32, #tpu.memory_space<vmem>>, vector<128x128xf32>
    %c0_1 = arith.constant 0 : index
    %c0_2 = arith.constant 0 : index
    %1 = vector.load %arg3[%c0_1, %c0_2] : memref<1x128xf32, #tpu.memory_space<vmem>>, vector<1x128xf32>
    %2 = vector.broadcast %1 : vector<1x128xf32> to vector<128x128xf32>
    %3 = arith.addf %0, %2 : vector<128x128xf32>
    %4 = arith.negf %3 : vector<128x128xf32>
    %5 = math.exp %4 : vector<128x128xf32>
    %cst = arith.constant 1.000000e+00 : f32
    %6 = vector.broadcast %cst : f32 to vector<128x128xf32>
    %7 = arith.addf %6, %5 : vector<128x128xf32>
    %8 = arith.divf %6, %7 : vector<128x128xf32>
    %9 = arith.mulf %3, %8 : vector<128x128xf32>
    %10 = arith.truncf %9 : vector<128x128xf32> to vector<128x128xbf16>
    %c0_3 = arith.constant 0 : index
    %c0_4 = arith.constant 0 : index
    %11 = vector.load %arg4[%c0_3, %c0_4] : memref<128x128xbf16, #tpu.memory_space<vmem>>, vector<128x128xbf16>
    tpu.vector_store %arg4[%c0_3, %c0_4], %10 {strides = array<i32>} : memref<128x128xbf16, #tpu.memory_space<vmem>>, vector<128x128xbf16>,
    return
  }
  func.func @transform_0(%arg0: i32, %arg1: i32) -> (i32, i32) {
    %c0_i32 = arith.constant 0 : i32
    return %arg0, %arg1 : i32, i32
  }
  func.func @transform_1(%arg0: i32, %arg1: i32) -> (i32, i32) {
    %c0_i32 = arith.constant 0 : i32
    %c0_i32_0 = arith.constant 0 : i32
    return %c0_i32, %arg1 : i32, i32
  }
  func.func @transform_2(%arg0: i32, %arg1: i32) -> (i32, i32) {
    %c0_i32 = arith.constant 0 : i32
    return %arg0, %arg1 : i32, i32
  }
}

module attributes {stable_mosaic.version = 11 : i64} {
  func.func @_mm_kernel(%arg0: i32, %arg1: i32, %arg2: i32, %arg3: i32, %arg4: memref<1x128x128xbf16, #tpu.memory_space<vmem>>, %arg5: memref<128x128xbf16, #tpu.memory_space<vmem>>, %arg6: memref<1x128xf32, #tpu.memory_space<vmem>>, %arg7: memref<1x128x128xbf16, #tpu.memory_space<vmem>>, %arg8: memref<128x128xf32, #tpu.memory_space<vmem>>) attributes {dimension_semantics = [#tpu.dimension_semantics<parallel>, #tpu.dimension_semantics<parallel>, #tpu.dimension_semantics<parallel>, #tpu.dimension_semantics<arbitrary>], iteration_bounds = array<i64: 1, 1, 1, 1>, scalar_prefetch = 0 : i64, scratch_operands = 1 : i64, tpu.core_type = #tpu.core_type<tc>, window_params = [{transform_indices = @transform_0, window_bounds = array<i64: 1, 128, 128>}, {transform_indices = @transform_1, window_bounds = array<i64: 128, 128>}, {transform_indices = @transform_2, window_bounds = array<i64: 1, 128>}, {transform_indices = @transform_3, window_bounds = array<i64: 1, 128, 128>}]} {
    %c0_i32 = arith.constant 0 : i32
    %0 = arith.cmpi eq, %arg3, %c0_i32 : i32
    %1 = arith.extui %0 : i1 to i32
    %c0_i32_0 = arith.constant 0 : i32
    %2 = arith.cmpi ne, %1, %c0_i32_0 : i32
    scf.if %2 {
      %cst_11 = arith.constant 0.000000e+00 : f32
      %13 = vector.broadcast %cst_11 : f32 to vector<128x128xf32>
      %c0_12 = arith.constant 0 : index
      %c0_13 = arith.constant 0 : index
      %14 = vector.load %arg8[%c0_12, %c0_13] : memref<128x128xf32, #tpu.memory_space<vmem>>, vector<128x128xf32>
      tpu.vector_store %arg8[%c0_12, %c0_13], %13 {strides = array<i32>} : memref<128x128xf32, #tpu.memory_space<vmem>>, vector<128x128xf32>,
    } else {
    }
    %c0 = arith.constant 0 : index
    %c0_1 = arith.constant 0 : index
    %c0_2 = arith.constant 0 : index
    %3 = vector.load %arg4[%c0, %c0_1, %c0_2] : memref<1x128x128xbf16, #tpu.memory_space<vmem>>, vector<1x128x128xbf16>
    %4 = vector.shape_cast %3 : vector<1x128x128xbf16> to vector<128x128xbf16>
    %c0_3 = arith.constant 0 : index
    %c0_4 = arith.constant 0 : index
    %5 = vector.load %arg8[%c0_3, %c0_4] : memref<128x128xf32, #tpu.memory_space<vmem>>, vector<128x128xf32>
    %c0_5 = arith.constant 0 : index
    %c0_6 = arith.constant 0 : index
    %6 = vector.load %arg5[%c0_5, %c0_6] : memref<128x128xbf16, #tpu.memory_space<vmem>>, vector<128x128xbf16>
    %cst = arith.constant dense<0.000000e+00> : vector<128x128xf32>
    %7 = tpu.matmul %4, %6, %cst {dimension_numbers = #tpu.dot_dimension_numbers<[1], [0], [0], [1], [0, 0, 1, 1], [], []>} : vector<128x128xbf16>, vector<128x128xbf16>, vector<128x128xf32> -> vector<128x128xf32>
    %8 = arith.addf %5, %7 : vector<128x128xf32>
    %c0_7 = arith.constant 0 : index
    %c0_8 = arith.constant 0 : index
    %9 = vector.load %arg8[%c0_7, %c0_8] : memref<128x128xf32, #tpu.memory_space<vmem>>, vector<128x128xf32>
    tpu.vector_store %arg8[%c0_7, %c0_8], %8 {strides = array<i32>} : memref<128x128xf32, #tpu.memory_space<vmem>>, vector<128x128xf32>,
    %c0_i32_9 = arith.constant 0 : i32
    %10 = arith.cmpi eq, %arg3, %c0_i32_9 : i32
    %11 = arith.extui %10 : i1 to i32
    %c0_i32_10 = arith.constant 0 : i32
    %12 = arith.cmpi ne, %11, %c0_i32_10 : i32
    scf.if %12 {
      %c0_11 = arith.constant 0 : index
      %c0_12 = arith.constant 0 : index
      %13 = vector.load %arg8[%c0_11, %c0_12] : memref<128x128xf32, #tpu.memory_space<vmem>>, vector<128x128xf32>
      %c0_13 = arith.constant 0 : index
      %c0_14 = arith.constant 0 : index
      %14 = vector.load %arg6[%c0_13, %c0_14] : memref<1x128xf32, #tpu.memory_space<vmem>>, vector<1x128xf32>
      %15 = vector.broadcast %14 : vector<1x128xf32> to vector<128x128xf32>
      %16 = arith.addf %13, %15 : vector<128x128xf32>
      %17 = arith.truncf %16 : vector<128x128xf32> to vector<128x128xbf16>
      %c0_15 = arith.constant 0 : index
      %c0_16 = arith.constant 0 : index
      %c0_17 = arith.constant 0 : index
      %18 = vector.load %arg7[%c0_15, %c0_16, %c0_17] : memref<1x128x128xbf16, #tpu.memory_space<vmem>>, vector<1x128x128xbf16>
      %19 = vector.shape_cast %18 : vector<1x128x128xbf16> to vector<128x128xbf16>
      %20 = vector.shape_cast %17 : vector<128x128xbf16> to vector<1x128x128xbf16>
      tpu.vector_store %arg7[%c0_15, %c0_16, %c0_17], %20 {strides = array<i32>} : memref<1x128x128xbf16, #tpu.memory_space<vmem>>, vector<1x128x128xbf16>,
    } else {
    }
    return
  }
  func.func @transform_0(%arg0: i32, %arg1: i32, %arg2: i32, %arg3: i32) -> (i32, i32, i32) {
    %c0_i32 = arith.constant 0 : i32
    return %arg0, %arg1, %arg3 : i32, i32, i32
  }
  func.func @transform_1(%arg0: i32, %arg1: i32, %arg2: i32, %arg3: i32) -> (i32, i32) {
    %c0_i32 = arith.constant 0 : i32
    return %arg3, %arg2 : i32, i32
  }
  func.func @transform_2(%arg0: i32, %arg1: i32, %arg2: i32, %arg3: i32) -> (i32, i32) {
    %c0_i32 = arith.constant 0 : i32
    %c0_i32_0 = arith.constant 0 : i32
    return %c0_i32, %arg2 : i32, i32
  }
  func.func @transform_3(%arg0: i32, %arg1: i32, %arg2: i32, %arg3: i32) -> (i32, i32, i32) {
    %c0_i32 = arith.constant 0 : i32
    return %arg0, %arg1, %arg2 : i32, i32, i32
  }
}

module attributes {stable_mosaic.version = 11 : i64} {
  func.func @_mm_kernel(%arg0: i32, %arg1: i32, %arg2: i32, %arg3: i32, %arg4: memref<1x128x128xbf16, #tpu.memory_space<vmem>>, %arg5: memref<128x128xbf16, #tpu.memory_space<vmem>>, %arg6: memref<1x128xf32, #tpu.memory_space<vmem>>, %arg7: memref<1x128x128xbf16, #tpu.memory_space<vmem>>, %arg8: memref<128x128xf32, #tpu.memory_space<vmem>>) attributes {dimension_semantics = [#tpu.dimension_semantics<parallel>, #tpu.dimension_semantics<parallel>, #tpu.dimension_semantics<parallel>, #tpu.dimension_semantics<arbitrary>], iteration_bounds = array<i64: 1, 1, 1, 1>, scalar_prefetch = 0 : i64, scratch_operands = 1 : i64, tpu.core_type = #tpu.core_type<tc>, window_params = [{transform_indices = @transform_0, window_bounds = array<i64: 1, 128, 128>}, {transform_indices = @transform_1, window_bounds = array<i64: 128, 128>}, {transform_indices = @transform_2, window_bounds = array<i64: 1, 128>}, {transform_indices = @transform_3, window_bounds = array<i64: 1, 128, 128>}]} {
    %c0_i32 = arith.constant 0 : i32
    %0 = arith.cmpi eq, %arg3, %c0_i32 : i32
    %1 = arith.extui %0 : i1 to i32
    %c0_i32_0 = arith.constant 0 : i32
    %2 = arith.cmpi ne, %1, %c0_i32_0 : i32
    scf.if %2 {
      %cst_11 = arith.constant 0.000000e+00 : f32
      %13 = vector.broadcast %cst_11 : f32 to vector<128x128xf32>
      %c0_12 = arith.constant 0 : index
      %c0_13 = arith.constant 0 : index
      %14 = vector.load %arg8[%c0_12, %c0_13] : memref<128x128xf32, #tpu.memory_space<vmem>>, vector<128x128xf32>
      tpu.vector_store %arg8[%c0_12, %c0_13], %13 {strides = array<i32>} : memref<128x128xf32, #tpu.memory_space<vmem>>, vector<128x128xf32>,
    } else {
    }
    %c0 = arith.constant 0 : index
    %c0_1 = arith.constant 0 : index
    %c0_2 = arith.constant 0 : index
    %3 = vector.load %arg4[%c0, %c0_1, %c0_2] : memref<1x128x128xbf16, #tpu.memory_space<vmem>>, vector<1x128x128xbf16>
    %4 = vector.shape_cast %3 : vector<1x128x128xbf16> to vector<128x128xbf16>
    %c0_3 = arith.constant 0 : index
    %c0_4 = arith.constant 0 : index
    %5 = vector.load %arg8[%c0_3, %c0_4] : memref<128x128xf32, #tpu.memory_space<vmem>>, vector<128x128xf32>
    %c0_5 = arith.constant 0 : index
    %c0_6 = arith.constant 0 : index
    %6 = vector.load %arg5[%c0_5, %c0_6] : memref<128x128xbf16, #tpu.memory_space<vmem>>, vector<128x128xbf16>
    %cst = arith.constant dense<0.000000e+00> : vector<128x128xf32>
    %7 = tpu.matmul %4, %6, %cst {dimension_numbers = #tpu.dot_dimension_numbers<[1], [0], [0], [1], [0, 0, 1, 1], [], []>} : vector<128x128xbf16>, vector<128x128xbf16>, vector<128x128xf32> -> vector<128x128xf32>
    %8 = arith.addf %5, %7 : vector<128x128xf32>
    %c0_7 = arith.constant 0 : index
    %c0_8 = arith.constant 0 : index
    %9 = vector.load %arg8[%c0_7, %c0_8] : memref<128x128xf32, #tpu.memory_space<vmem>>, vector<128x128xf32>
    tpu.vector_store %arg8[%c0_7, %c0_8], %8 {strides = array<i32>} : memref<128x128xf32, #tpu.memory_space<vmem>>, vector<128x128xf32>,
    %c0_i32_9 = arith.constant 0 : i32
    %10 = arith.cmpi eq, %arg3, %c0_i32_9 : i32
    %11 = arith.extui %10 : i1 to i32
    %c0_i32_10 = arith.constant 0 : i32
    %12 = arith.cmpi ne, %11, %c0_i32_10 : i32
    scf.if %12 {
      %c0_11 = arith.constant 0 : index
      %c0_12 = arith.constant 0 : index
      %13 = vector.load %arg8[%c0_11, %c0_12] : memref<128x128xf32, #tpu.memory_space<vmem>>, vector<128x128xf32>
      %c0_13 = arith.constant 0 : index
      %c0_14 = arith.constant 0 : index
      %14 = vector.load %arg6[%c0_13, %c0_14] : memref<1x128xf32, #tpu.memory_space<vmem>>, vector<1x128xf32>
      %15 = vector.broadcast %14 : vector<1x128xf32> to vector<128x128xf32>
      %16 = arith.addf %13, %15 : vector<128x128xf32>
      %17 = arith.negf %16 : vector<128x128xf32>
      %18 = math.exp %17 : vector<128x128xf32>
      %cst_15 = arith.constant 1.000000e+00 : f32
      %19 = vector.broadcast %cst_15 : f32 to vector<128x128xf32>
      %20 = arith.addf %19, %18 : vector<128x128xf32>
      %21 = arith.divf %19, %20 : vector<128x128xf32>
      %22 = arith.mulf %16, %21 : vector<128x128xf32>
      %23 = arith.truncf %22 : vector<128x128xf32> to vector<128x128xbf16>
      %c0_16 = arith.constant 0 : index
      %c0_17 = arith.constant 0 : index
      %c0_18 = arith.constant 0 : index
      %24 = vector.load %arg7[%c0_16, %c0_17, %c0_18] : memref<1x128x128xbf16, #tpu.memory_space<vmem>>, vector<1x128x128xbf16>
      %25 = vector.shape_cast %24 : vector<1x128x128xbf16> to vector<128x128xbf16>
      %26 = vector.shape_cast %23 : vector<128x128xbf16> to vector<1x128x128xbf16>
      tpu.vector_store %arg7[%c0_16, %c0_17, %c0_18], %26 {strides = array<i32>} : memref<1x128x128xbf16, #tpu.memory_space<vmem>>, vector<1x128x128xbf16>,
    } else {
    }
    return
  }
  func.func @transform_0(%arg0: i32, %arg1: i32, %arg2: i32, %arg3: i32) -> (i32, i32, i32) {
    %c0_i32 = arith.constant 0 : i32
    return %arg0, %arg1, %arg3 : i32, i32, i32
  }
  func.func @transform_1(%arg0: i32, %arg1: i32, %arg2: i32, %arg3: i32) -> (i32, i32) {
    %c0_i32 = arith.constant 0 : i32
    return %arg3, %arg2 : i32, i32
  }
  func.func @transform_2(%arg0: i32, %arg1: i32, %arg2: i32, %arg3: i32) -> (i32, i32) {
    %c0_i32 = arith.constant 0 : i32
    %c0_i32_0 = arith.constant 0 : i32
    return %c0_i32, %arg2 : i32, i32
  }
  func.func @transform_3(%arg0: i32, %arg1: i32, %arg2: i32, %arg3: i32) -> (i32, i32, i32) {
    %c0_i32 = arith.constant 0 : i32
    return %arg0, %arg1, %arg2 : i32, i32, i32
  }
}

module attributes {stable_mosaic.version = 11 : i64} {
  func.func @_dwconv_kernel(%arg0: i32, %arg1: i32, %arg2: memref<1x10x10x128xbf16, #tpu.memory_space<vmem>>, %arg3: memref<9x128xf32, #tpu.memory_space<vmem>>, %arg4: memref<1x128xf32, #tpu.memory_space<vmem>>, %arg5: memref<1x8x8x128xbf16, #tpu.memory_space<vmem>>) attributes {dimension_semantics = [#tpu.dimension_semantics<parallel>, #tpu.dimension_semantics<parallel>], iteration_bounds = array<i64: 2, 1>, scalar_prefetch = 0 : i64, scratch_operands = 0 : i64, tpu.core_type = #tpu.core_type<tc>, window_params = [{transform_indices = @transform_0, window_bounds = array<i64: 1, 10, 10, 128>}, {transform_indices = @transform_1, window_bounds = array<i64: 9, 128>}, {transform_indices = @transform_2, window_bounds = array<i64: 1, 128>}, {transform_indices = @transform_3, window_bounds = array<i64: 1, 8, 8, 128>}]} {
    %cst = arith.constant 0.000000e+00 : f32
    %0 = vector.broadcast %cst : f32 to vector<8x8x128xf32>
    %c0 = arith.constant 0 : index
    %c0_0 = arith.constant 0 : index
    %c0_1 = arith.constant 0 : index
    %c0_2 = arith.constant 0 : index
    %1 = vector.load %arg2[%c0, %c0_0, %c0_1, %c0_2] : memref<1x10x10x128xbf16, #tpu.memory_space<vmem>>, vector<1x8x8x128xbf16>
    %2 = vector.shape_cast %1 : vector<1x8x8x128xbf16> to vector<8x8x128xbf16>
    %3 = arith.extf %2 : vector<8x8x128xbf16> to vector<8x8x128xf32>
    %c0_3 = arith.constant 0 : index
    %c0_4 = arith.constant 0 : index
    %4 = vector.load %arg3[%c0_3, %c0_4] : memref<9x128xf32, #tpu.memory_space<vmem>>, vector<1x128xf32>
    %5 = vector.shape_cast %4 : vector<1x128xf32> to vector<128xf32>
    %6 = vector.shape_cast %5 : vector<128xf32> to vector<1x1x128xf32>
    %7 = vector.broadcast %6 : vector<1x1x128xf32> to vector<8x8x128xf32>
    %8 = arith.mulf %3, %7 : vector<8x8x128xf32>
    %9 = arith.addf %0, %8 : vector<8x8x128xf32>
    %c0_5 = arith.constant 0 : index
    %c0_6 = arith.constant 0 : index
    %c1 = arith.constant 1 : index
    %c0_7 = arith.constant 0 : index
    %10 = vector.load %arg2[%c0_5, %c0_6, %c1, %c0_7] : memref<1x10x10x128xbf16, #tpu.memory_space<vmem>>, vector<1x8x8x128xbf16>
    %11 = vector.shape_cast %10 : vector<1x8x8x128xbf16> to vector<8x8x128xbf16>
    %12 = arith.extf %11 : vector<8x8x128xbf16> to vector<8x8x128xf32>
    %c1_8 = arith.constant 1 : index
    %c0_9 = arith.constant 0 : index
    %13 = vector.load %arg3[%c1_8, %c0_9] : memref<9x128xf32, #tpu.memory_space<vmem>>, vector<1x128xf32>
    %14 = vector.shape_cast %13 : vector<1x128xf32> to vector<128xf32>
    %15 = vector.shape_cast %14 : vector<128xf32> to vector<1x1x128xf32>
    %16 = vector.broadcast %15 : vector<1x1x128xf32> to vector<8x8x128xf32>
    %17 = arith.mulf %12, %16 : vector<8x8x128xf32>
    %18 = arith.addf %9, %17 : vector<8x8x128xf32>
    %c0_10 = arith.constant 0 : index
    %c0_11 = arith.constant 0 : index
    %c2 = arith.constant 2 : index
    %c0_12 = arith.constant 0 : index
    %19 = vector.load %arg2[%c0_10, %c0_11, %c2, %c0_12] : memref<1x10x10x128xbf16, #tpu.memory_space<vmem>>, vector<1x8x8x128xbf16>
    %20 = vector.shape_cast %19 : vector<1x8x8x128xbf16> to vector<8x8x128xbf16>
    %21 = arith.extf %20 : vector<8x8x128xbf16> to vector<8x8x128xf32>
    %c2_13 = arith.constant 2 : index
    %c0_14 = arith.constant 0 : index
    %22 = vector.load %arg3[%c2_13, %c0_14] : memref<9x128xf32, #tpu.memory_space<vmem>>, vector<1x128xf32>
    %23 = vector.shape_cast %22 : vector<1x128xf32> to vector<128xf32>
    %24 = vector.shape_cast %23 : vector<128xf32> to vector<1x1x128xf32>
    %25 = vector.broadcast %24 : vector<1x1x128xf32> to vector<8x8x128xf32>
    %26 = arith.mulf %21, %25 : vector<8x8x128xf32>
    %27 = arith.addf %18, %26 : vector<8x8x128xf32>
    %c0_15 = arith.constant 0 : index
    %c1_16 = arith.constant 1 : index
    %c0_17 = arith.constant 0 : index
    %c0_18 = arith.constant 0 : index
    %28 = vector.load %arg2[%c0_15, %c1_16, %c0_17, %c0_18] : memref<1x10x10x128xbf16, #tpu.memory_space<vmem>>, vector<1x8x8x128xbf16>
    %29 = vector.shape_cast %28 : vector<1x8x8x128xbf16> to vector<8x8x128xbf16>
    %30 = arith.extf %29 : vector<8x8x128xbf16> to vector<8x8x128xf32>
    %c3 = arith.constant 3 : index
    %c0_19 = arith.constant 0 : index
    %31 = vector.load %arg3[%c3, %c0_19] : memref<9x128xf32, #tpu.memory_space<vmem>>, vector<1x128xf32>
    %32 = vector.shape_cast %31 : vector<1x128xf32> to vector<128xf32>
    %33 = vector.shape_cast %32 : vector<128xf32> to vector<1x1x128xf32>
    %34 = vector.broadcast %33 : vector<1x1x128xf32> to vector<8x8x128xf32>
    %35 = arith.mulf %30, %34 : vector<8x8x128xf32>
    %36 = arith.addf %27, %35 : vector<8x8x128xf32>
    %c0_20 = arith.constant 0 : index
    %c1_21 = arith.constant 1 : index
    %c1_22 = arith.constant 1 : index
    %c0_23 = arith.constant 0 : index
    %37 = vector.load %arg2[%c0_20, %c1_21, %c1_22, %c0_23] : memref<1x10x10x128xbf16, #tpu.memory_space<vmem>>, vector<1x8x8x128xbf16>
    %38 = vector.shape_cast %37 : vector<1x8x8x128xbf16> to vector<8x8x128xbf16>
    %39 = arith.extf %38 : vector<8x8x128xbf16> to vector<8x8x128xf32>
    %c4 = arith.constant 4 : index
    %c0_24 = arith.constant 0 : index
    %40 = vector.load %arg3[%c4, %c0_24] : memref<9x128xf32, #tpu.memory_space<vmem>>, vector<1x128xf32>
    %41 = vector.shape_cast %40 : vector<1x128xf32> to vector<128xf32>
    %42 = vector.shape_cast %41 : vector<128xf32> to vector<1x1x128xf32>
    %43 = vector.broadcast %42 : vector<1x1x128xf32> to vector<8x8x128xf32>
    %44 = arith.mulf %39, %43 : vector<8x8x128xf32>
    %45 = arith.addf %36, %44 : vector<8x8x128xf32>
    %c0_25 = arith.constant 0 : index
    %c1_26 = arith.constant 1 : index
    %c2_27 = arith.constant 2 : index
    %c0_28 = arith.constant 0 : index
    %46 = vector.load %arg2[%c0_25, %c1_26, %c2_27, %c0_28] : memref<1x10x10x128xbf16, #tpu.memory_space<vmem>>, vector<1x8x8x128xbf16>
    %47 = vector.shape_cast %46 : vector<1x8x8x128xbf16> to vector<8x8x128xbf16>
    %48 = arith.extf %47 : vector<8x8x128xbf16> to vector<8x8x128xf32>
    %c5 = arith.constant 5 : index
    %c0_29 = arith.constant 0 : index
    %49 = vector.load %arg3[%c5, %c0_29] : memref<9x128xf32, #tpu.memory_space<vmem>>, vector<1x128xf32>
    %50 = vector.shape_cast %49 : vector<1x128xf32> to vector<128xf32>
    %51 = vector.shape_cast %50 : vector<128xf32> to vector<1x1x128xf32>
    %52 = vector.broadcast %51 : vector<1x1x128xf32> to vector<8x8x128xf32>
    %53 = arith.mulf %48, %52 : vector<8x8x128xf32>
    %54 = arith.addf %45, %53 : vector<8x8x128xf32>
    %c0_30 = arith.constant 0 : index
    %c2_31 = arith.constant 2 : index
    %c0_32 = arith.constant 0 : index
    %c0_33 = arith.constant 0 : index
    %55 = vector.load %arg2[%c0_30, %c2_31, %c0_32, %c0_33] : memref<1x10x10x128xbf16, #tpu.memory_space<vmem>>, vector<1x8x8x128xbf16>
    %56 = vector.shape_cast %55 : vector<1x8x8x128xbf16> to vector<8x8x128xbf16>
    %57 = arith.extf %56 : vector<8x8x128xbf16> to vector<8x8x128xf32>
    %c6 = arith.constant 6 : index
    %c0_34 = arith.constant 0 : index
    %58 = vector.load %arg3[%c6, %c0_34] : memref<9x128xf32, #tpu.memory_space<vmem>>, vector<1x128xf32>
    %59 = vector.shape_cast %58 : vector<1x128xf32> to vector<128xf32>
    %60 = vector.shape_cast %59 : vector<128xf32> to vector<1x1x128xf32>
    %61 = vector.broadcast %60 : vector<1x1x128xf32> to vector<8x8x128xf32>
    %62 = arith.mulf %57, %61 : vector<8x8x128xf32>
    %63 = arith.addf %54, %62 : vector<8x8x128xf32>
    %c0_35 = arith.constant 0 : index
    %c2_36 = arith.constant 2 : index
    %c1_37 = arith.constant 1 : index
    %c0_38 = arith.constant 0 : index
    %64 = vector.load %arg2[%c0_35, %c2_36, %c1_37, %c0_38] : memref<1x10x10x128xbf16, #tpu.memory_space<vmem>>, vector<1x8x8x128xbf16>
    %65 = vector.shape_cast %64 : vector<1x8x8x128xbf16> to vector<8x8x128xbf16>
    %66 = arith.extf %65 : vector<8x8x128xbf16> to vector<8x8x128xf32>
    %c7 = arith.constant 7 : index
    %c0_39 = arith.constant 0 : index
    %67 = vector.load %arg3[%c7, %c0_39] : memref<9x128xf32, #tpu.memory_space<vmem>>, vector<1x128xf32>
    %68 = vector.shape_cast %67 : vector<1x128xf32> to vector<128xf32>
    %69 = vector.shape_cast %68 : vector<128xf32> to vector<1x1x128xf32>
    %70 = vector.broadcast %69 : vector<1x1x128xf32> to vector<8x8x128xf32>
    %71 = arith.mulf %66, %70 : vector<8x8x128xf32>
    %72 = arith.addf %63, %71 : vector<8x8x128xf32>
    %c0_40 = arith.constant 0 : index
    %c2_41 = arith.constant 2 : index
    %c2_42 = arith.constant 2 : index
    %c0_43 = arith.constant 0 : index
    %73 = vector.load %arg2[%c0_40, %c2_41, %c2_42, %c0_43] : memref<1x10x10x128xbf16, #tpu.memory_space<vmem>>, vector<1x8x8x128xbf16>
    %74 = vector.shape_cast %73 : vector<1x8x8x128xbf16> to vector<8x8x128xbf16>
    %75 = arith.extf %74 : vector<8x8x128xbf16> to vector<8x8x128xf32>
    %c8 = arith.constant 8 : index
    %c0_44 = arith.constant 0 : index
    %76 = vector.load %arg3[%c8, %c0_44] : memref<9x128xf32, #tpu.memory_space<vmem>>, vector<1x128xf32>
    %77 = vector.shape_cast %76 : vector<1x128xf32> to vector<128xf32>
    %78 = vector.shape_cast %77 : vector<128xf32> to vector<1x1x128xf32>
    %79 = vector.broadcast %78 : vector<1x1x128xf32> to vector<8x8x128xf32>
    %80 = arith.mulf %75, %79 : vector<8x8x128xf32>
    %81 = arith.addf %72, %80 : vector<8x8x128xf32>
    %c0_45 = arith.constant 0 : index
    %c0_46 = arith.constant 0 : index
    %82 = vector.load %arg4[%c0_45, %c0_46] : memref<1x128xf32, #tpu.memory_space<vmem>>, vector<1x128xf32>
    %83 = vector.shape_cast %82 : vector<1x128xf32> to vector<128xf32>
    %84 = vector.shape_cast %83 : vector<128xf32> to vector<1x1x128xf32>
    %85 = vector.broadcast %84 : vector<1x1x128xf32> to vector<8x8x128xf32>
    %86 = arith.addf %81, %85 : vector<8x8x128xf32>
    %87 = arith.negf %86 : vector<8x8x128xf32>
    %88 = math.exp %87 : vector<8x8x128xf32>
    %cst_47 = arith.constant 1.000000e+00 : f32
    %89 = vector.broadcast %cst_47 : f32 to vector<8x8x128xf32>
    %90 = arith.addf %89, %88 : vector<8x8x128xf32>
    %91 = arith.divf %89, %90 : vector<8x8x128xf32>
    %92 = arith.mulf %86, %91 : vector<8x8x128xf32>
    %93 = arith.truncf %92 : vector<8x8x128xf32> to vector<8x8x128xbf16>
    %c0_48 = arith.constant 0 : index
    %c0_49 = arith.constant 0 : index
    %c0_50 = arith.constant 0 : index
    %c0_51 = arith.constant 0 : index
    %94 = vector.load %arg5[%c0_48, %c0_49, %c0_50, %c0_51] : memref<1x8x8x128xbf16, #tpu.memory_space<vmem>>, vector<1x8x8x128xbf16>
    %95 = vector.shape_cast %94 : vector<1x8x8x128xbf16> to vector<8x8x128xbf16>
    %96 = vector.shape_cast %93 : vector<8x8x128xbf16> to vector<1x8x8x128xbf16>
    tpu.vector_store %arg5[%c0_48, %c0_49, %c0_50, %c0_51], %96 {strides = array<i32>} : memref<1x8x8x128xbf16, #tpu.memory_space<vmem>>, vector<1x8x8x128xbf16>,
    return
  }
  func.func @transform_0(%arg0: i32, %arg1: i32) -> (i32, i32, i32, i32) {
    %c0_i32 = arith.constant 0 : i32
    %c0_i32_0 = arith.constant 0 : i32
    %c0_i32_1 = arith.constant 0 : i32
    return %arg0, %c0_i32, %c0_i32_0, %arg1 : i32, i32, i32, i32
  }
  func.func @transform_1(%arg0: i32, %arg1: i32) -> (i32, i32) {
    %c0_i32 = arith.constant 0 : i32
    %c0_i32_0 = arith.constant 0 : i32
    return %c0_i32, %arg1 : i32, i32
  }
  func.func @transform_2(%arg0: i32, %arg1: i32) -> (i32, i32) {
    %c0_i32 = arith.constant 0 : i32
    %c0_i32_0 = arith.constant 0 : i32
    return %c0_i32, %arg1 : i32, i32
  }
  func.func @transform_3(%arg0: i32, %arg1: i32) -> (i32, i32, i32, i32) {
    %c0_i32 = arith.constant 0 : i32
    %c0_i32_0 = arith.constant 0 : i32
    %c0_i32_1 = arith.constant 0 : i32
    return %arg0, %c0_i32, %c0_i32_0, %arg1 : i32, i32, i32, i32
  }
}

module attributes {stable_mosaic.version = 11 : i64} {
  func.func @_gap_kernel(%arg0: i32, %arg1: memref<1x64x128xbf16, #tpu.memory_space<vmem>>, %arg2: memref<1x1x128xf32, #tpu.memory_space<vmem>>) attributes {dimension_semantics = [#tpu.dimension_semantics<parallel>], iteration_bounds = array<i64: 2>, scalar_prefetch = 0 : i64, scratch_operands = 0 : i64, tpu.core_type = #tpu.core_type<tc>, window_params = [{transform_indices = @transform_0, window_bounds = array<i64: 1, 64, 128>}, {transform_indices = @transform_1, window_bounds = array<i64: 1, 1, 128>}]} {
    %c0 = arith.constant 0 : index
    %c0_0 = arith.constant 0 : index
    %c0_1 = arith.constant 0 : index
    %0 = vector.load %arg1[%c0, %c0_0, %c0_1] : memref<1x64x128xbf16, #tpu.memory_space<vmem>>, vector<1x64x128xbf16>
    %1 = vector.shape_cast %0 : vector<1x64x128xbf16> to vector<64x128xbf16>
    %2 = arith.extf %1 : vector<64x128xbf16> to vector<64x128xf32>
    %cst = arith.constant dense<0.000000e+00> : vector<128xf32>
    %3 = vector.multi_reduction <add>, %2, %cst [0] : vector<64x128xf32> to vector<128xf32>
    %4 = vector.shape_cast %3 : vector<128xf32> to vector<1x128xf32>
    %cst_2 = arith.constant 6.400000e+01 : f32
    %5 = vector.broadcast %cst_2 : f32 to vector<1x128xf32>
    %6 = arith.divf %4, %5 : vector<1x128xf32>
    %c0_3 = arith.constant 0 : index
    %c0_4 = arith.constant 0 : index
    %c0_5 = arith.constant 0 : index
    %7 = vector.load %arg2[%c0_3, %c0_4, %c0_5] : memref<1x1x128xf32, #tpu.memory_space<vmem>>, vector<1x1x128xf32>
    %8 = vector.shape_cast %7 : vector<1x1x128xf32> to vector<1x128xf32>
    %9 = vector.shape_cast %6 : vector<1x128xf32> to vector<1x1x128xf32>
    tpu.vector_store %arg2[%c0_3, %c0_4, %c0_5], %9 {strides = array<i32>} : memref<1x1x128xf32, #tpu.memory_space<vmem>>, vector<1x1x128xf32>,
    return
  }
  func.func @transform_0(%arg0: i32) -> (i32, i32, i32) {
    %c0_i32 = arith.constant 0 : i32
    %c0_i32_0 = arith.constant 0 : i32
    %c0_i32_1 = arith.constant 0 : i32
    return %arg0, %c0_i32, %c0_i32_0 : i32, i32, i32
  }
  func.func @transform_1(%arg0: i32) -> (i32, i32, i32) {
    %c0_i32 = arith.constant 0 : i32
    %c0_i32_0 = arith.constant 0 : i32
    %c0_i32_1 = arith.constant 0 : i32
    return %arg0, %c0_i32, %c0_i32_0 : i32, i32, i32
  }
}

module attributes {stable_mosaic.version = 11 : i64} {
  func.func @_mm_kernel(%arg0: i32, %arg1: i32, %arg2: i32, %arg3: i32, %arg4: memref<1x64x128xbf16, #tpu.memory_space<vmem>>, %arg5: memref<128x128xbf16, #tpu.memory_space<vmem>>, %arg6: memref<1x128xf32, #tpu.memory_space<vmem>>, %arg7: memref<1x1x128xf32, #tpu.memory_space<vmem>>, %arg8: memref<1x64x128xbf16, #tpu.memory_space<vmem>>, %arg9: memref<1x64x128xbf16, #tpu.memory_space<vmem>>, %arg10: memref<64x128xf32, #tpu.memory_space<vmem>>) attributes {dimension_semantics = [#tpu.dimension_semantics<parallel>, #tpu.dimension_semantics<parallel>, #tpu.dimension_semantics<parallel>, #tpu.dimension_semantics<arbitrary>], iteration_bounds = array<i64: 2, 1, 1, 1>, scalar_prefetch = 0 : i64, scratch_operands = 1 : i64, tpu.core_type = #tpu.core_type<tc>, window_params = [{transform_indices = @transform_0, window_bounds = array<i64: 1, 64, 128>}, {transform_indices = @transform_1, window_bounds = array<i64: 128, 128>}, {transform_indices = @transform_2, window_bounds = array<i64: 1, 128>}, {transform_indices = @transform_3, window_bounds = array<i64: 1, 1, 128>}, {transform_indices = @transform_4, window_bounds = array<i64: 1, 64, 128>}, {transform_indices = @transform_5, window_bounds = array<i64: 1, 64, 128>}]} {
    %c0_i32 = arith.constant 0 : i32
    %0 = arith.cmpi eq, %arg3, %c0_i32 : i32
    %1 = arith.extui %0 : i1 to i32
    %c0_i32_0 = arith.constant 0 : i32
    %2 = arith.cmpi ne, %1, %c0_i32_0 : i32
    scf.if %2 {
      %cst_14 = arith.constant 0.000000e+00 : f32
      %19 = vector.broadcast %cst_14 : f32 to vector<64x128xf32>
      %c0_15 = arith.constant 0 : index
      %c0_16 = arith.constant 0 : index
      %20 = vector.load %arg10[%c0_15, %c0_16] : memref<64x128xf32, #tpu.memory_space<vmem>>, vector<64x128xf32>
      tpu.vector_store %arg10[%c0_15, %c0_16], %19 {strides = array<i32>} : memref<64x128xf32, #tpu.memory_space<vmem>>, vector<64x128xf32>,
    } else {
    }
    %c0 = arith.constant 0 : index
    %c0_1 = arith.constant 0 : index
    %c0_2 = arith.constant 0 : index
    %3 = vector.load %arg4[%c0, %c0_1, %c0_2] : memref<1x64x128xbf16, #tpu.memory_space<vmem>>, vector<1x64x128xbf16>
    %4 = vector.shape_cast %3 : vector<1x64x128xbf16> to vector<64x128xbf16>
    %5 = arith.extf %4 : vector<64x128xbf16> to vector<64x128xf32>
    %c0_3 = arith.constant 0 : index
    %c0_4 = arith.constant 0 : index
    %c0_5 = arith.constant 0 : index
    %6 = vector.load %arg7[%c0_3, %c0_4, %c0_5] : memref<1x1x128xf32, #tpu.memory_space<vmem>>, vector<1x1x128xf32>
    %7 = vector.shape_cast %6 : vector<1x1x128xf32> to vector<1x128xf32>
    %8 = vector.broadcast %7 : vector<1x128xf32> to vector<64x128xf32>
    %9 = arith.mulf %5, %8 : vector<64x128xf32>
    %10 = arith.truncf %9 : vector<64x128xf32> to vector<64x128xbf16>
    %c0_6 = arith.constant 0 : index
    %c0_7 = arith.constant 0 : index
    %11 = vector.load %arg10[%c0_6, %c0_7] : memref<64x128xf32, #tpu.memory_space<vmem>>, vector<64x128xf32>
    %c0_8 = arith.constant 0 : index
    %c0_9 = arith.constant 0 : index
    %12 = vector.load %arg5[%c0_8, %c0_9] : memref<128x128xbf16, #tpu.memory_space<vmem>>, vector<128x128xbf16>
    %cst = arith.constant dense<0.000000e+00> : vector<64x128xf32>
    %13 = tpu.matmul %10, %12, %cst {dimension_numbers = #tpu.dot_dimension_numbers<[1], [0], [0], [1], [0, 0, 1, 1], [], []>} : vector<64x128xbf16>, vector<128x128xbf16>, vector<64x128xf32> -> vector<64x128xf32>
    %14 = arith.addf %11, %13 : vector<64x128xf32>
    %c0_10 = arith.constant 0 : index
    %c0_11 = arith.constant 0 : index
    %15 = vector.load %arg10[%c0_10, %c0_11] : memref<64x128xf32, #tpu.memory_space<vmem>>, vector<64x128xf32>
    tpu.vector_store %arg10[%c0_10, %c0_11], %14 {strides = array<i32>} : memref<64x128xf32, #tpu.memory_space<vmem>>, vector<64x128xf32>,
    %c0_i32_12 = arith.constant 0 : i32
    %16 = arith.cmpi eq, %arg3, %c0_i32_12 : i32
    %17 = arith.extui %16 : i1 to i32
    %c0_i32_13 = arith.constant 0 : i32
    %18 = arith.cmpi ne, %17, %c0_i32_13 : i32
    scf.if %18 {
      %c0_14 = arith.constant 0 : index
      %c0_15 = arith.constant 0 : index
      %19 = vector.load %arg10[%c0_14, %c0_15] : memref<64x128xf32, #tpu.memory_space<vmem>>, vector<64x128xf32>
      %c0_16 = arith.constant 0 : index
      %c0_17 = arith.constant 0 : index
      %20 = vector.load %arg6[%c0_16, %c0_17] : memref<1x128xf32, #tpu.memory_space<vmem>>, vector<1x128xf32>
      %21 = vector.broadcast %20 : vector<1x128xf32> to vector<64x128xf32>
      %22 = arith.addf %19, %21 : vector<64x128xf32>
      %c0_18 = arith.constant 0 : index
      %c0_19 = arith.constant 0 : index
      %c0_20 = arith.constant 0 : index
      %23 = vector.load %arg8[%c0_18, %c0_19, %c0_20] : memref<1x64x128xbf16, #tpu.memory_space<vmem>>, vector<1x64x128xbf16>
      %24 = vector.shape_cast %23 : vector<1x64x128xbf16> to vector<64x128xbf16>
      %25 = arith.extf %24 : vector<64x128xbf16> to vector<64x128xf32>
      %26 = arith.addf %22, %25 : vector<64x128xf32>
      %27 = arith.truncf %26 : vector<64x128xf32> to vector<64x128xbf16>
      %c0_21 = arith.constant 0 : index
      %c0_22 = arith.constant 0 : index
      %c0_23 = arith.constant 0 : index
      %28 = vector.load %arg9[%c0_21, %c0_22, %c0_23] : memref<1x64x128xbf16, #tpu.memory_space<vmem>>, vector<1x64x128xbf16>
      %29 = vector.shape_cast %28 : vector<1x64x128xbf16> to vector<64x128xbf16>
      %30 = vector.shape_cast %27 : vector<64x128xbf16> to vector<1x64x128xbf16>
      tpu.vector_store %arg9[%c0_21, %c0_22, %c0_23], %30 {strides = array<i32>} : memref<1x64x128xbf16, #tpu.memory_space<vmem>>, vector<1x64x128xbf16>,
    } else {
    }
    return
  }
  func.func @transform_0(%arg0: i32, %arg1: i32, %arg2: i32, %arg3: i32) -> (i32, i32, i32) {
    %c0_i32 = arith.constant 0 : i32
    return %arg0, %arg1, %arg3 : i32, i32, i32
  }
  func.func @transform_1(%arg0: i32, %arg1: i32, %arg2: i32, %arg3: i32) -> (i32, i32) {
    %c0_i32 = arith.constant 0 : i32
    return %arg3, %arg2 : i32, i32
  }
  func.func @transform_2(%arg0: i32, %arg1: i32, %arg2: i32, %arg3: i32) -> (i32, i32) {
    %c0_i32 = arith.constant 0 : i32
    %c0_i32_0 = arith.constant 0 : i32
    return %c0_i32, %arg2 : i32, i32
  }
  func.func @transform_3(%arg0: i32, %arg1: i32, %arg2: i32, %arg3: i32) -> (i32, i32, i32) {
    %c0_i32 = arith.constant 0 : i32
    %c0_i32_0 = arith.constant 0 : i32
    return %arg0, %c0_i32, %arg3 : i32, i32, i32
  }
  func.func @transform_4(%arg0: i32, %arg1: i32, %arg2: i32, %arg3: i32) -> (i32, i32, i32) {
    %c0_i32 = arith.constant 0 : i32
    return %arg0, %arg1, %arg2 : i32, i32, i32
  }
  func.func @transform_5(%arg0: i32, %arg1: i32, %arg2: i32, %arg3: i32) -> (i32, i32, i32) {
    %c0_i32 = arith.constant 0 : i32
    return %arg0, %arg1, %arg2 : i32, i32, i32
  }
}

</mosaic_0001>

<bundles_post_ra>
// kernel: _lambda_.10
= control target key start
LH: loop header
LB: loop body
LE: loop exit
PB: predicated region body
PF: predicated region fallthrough
CT: control target
= control target key end

     0   :  { %s2216_s0 = inlined_call_operand.vmem [shape: f32[512,128], index: 0, kind: input, shape index: {}]   ;;  %s2217_s1 = inlined_call_operand.vmem [shape: f32[1,128], index: 1, kind: input, shape index: {}]   ;;  %s2218_s2 = inlined_call_operand.vmem [shape: bf16[512,128], index: 2, kind: output, shape index: {}]  }
   0x1   :  { %v11_v0 = vld [vmem:[%s2216_s0] sm:$0xff]  ;;  %v12_v1 = vld [vmem:[%s2216_s0 + $0x8] sm:$0xff]  ;;  %v13_v5 = vld [vmem:[%s2216_s0 + $0x10] sm:$0xff] }
   0x2   :  { %v1582_v2 = vld [vmem:[%s2217_s1] ss:$0 sm:$0xff]  ;;  %v14_v6 = vld [vmem:[%s2216_s0 + $0x18] sm:$0xff]  ;;  %v16_v10 = vld [vmem:[%s2216_s0 + $0x28] sm:$0xff] }
   0x3   :  { %v1585_v3 = vadd.f32 %v1582_v2, %v11_v0  ;;  %v1588_v4 = vadd.f32 %v1582_v2, %v12_v1  ;;  %v15_v7 = vld [vmem:[%s2216_s0 + $0x20] sm:$0xff]  ;;  %v1600_v8 = vadd.f32 %v1582_v2, %v13_v5  ;;  %v1603_v9 = vadd.f32 %v1582_v2, %v14_v6  ;;  %v17_v12 = vld [vmem:[%s2216_s0 + $0x30] sm:$0xff]  ;;  %v18_v13 = vld [vmem:[%s2216_s0 + $0x38] sm:$0xff] }
   0x4   :  { %v1609_v11 = vadd.f32 %v1582_v2, %v15_v7  ;;  %v1620_v16 = vadd.f32 %v1582_v2, %v16_v10  ;;  %v1623_v17 = vadd.f32 %v1582_v2, %v17_v12  ;;  %v19_v18 = vld [vmem:[%s2216_s0 + $0x40] sm:$0xff]  ;;  %v20_v19 = vld [vmem:[%s2216_s0 + $0x48] sm:$0xff]  ;;  %v1634_v22 = vadd.f32 %v1582_v2, %v18_v13  ;;  %v21_v25 = vld [vmem:[%s2216_s0 + $0x50] sm:$0xff] }
   0x5   :  { %v919_v14 = vmul.f32 -1.442695, %v1585_v3  ;;  %v920_v15 = vmul.f32 -1.442695, %v1588_v4  ;;  %v921_v20 = vmul.f32 -1.442695, %v1600_v8  ;;  %v1638_v24 = vadd.f32 %v1582_v2, %v19_v18 }
   0x6   :  { %v922_v21 = vmul.f32 -1.442695, %v1603_v9  ;;  %v923_v23 = vmul.f32 -1.442695, %v1609_v11  ;;  %v22_v26 = vld [vmem:[%s2216_s0 + $0x58] sm:$0xff]  ;;  %v1648_v28 = vadd.f32 %v1582_v2, %v20_v19  ;;  %v23_v29 = vld [vmem:[%s2216_s0 + $0x60] sm:$0xff]  ;;  %v1655_v31 = vadd.f32 %v1582_v2, %v21_v25 }
   0x7   :  { %1302 = vpow2.f32 %v919_v14  ;;  %v924_v27 = vmul.f32 -1.442695, %v1620_v16  ;;  %v925_v30 = vmul.f32 -1.442695, %v1623_v17  ;;  %v24_v32 = vld [vmem:[%s2216_s0 + $0x68] sm:$0xff]  ;;  %v1662_v34 = vadd.f32 %v1582_v2, %v22_v26  ;;  %v25_v35 = vld [vmem:[%s2216_s0 + $0x70] sm:$0xff] }
   0x8   :  { %1304 = vpow2.f32 %v920_v15  ;;  %v926_v33 = vmul.f32 -1.442695, %v1634_v22  ;;  %v927_v36 = vmul.f32 -1.442695, %v1638_v24  ;;  %v1669_v37 = vadd.f32 %v1582_v2, %v23_v29  ;;  %v26_v38 = vld [vmem:[%s2216_s0 + $0x78] sm:$0xff]  ;;  %v27_v46 = vld [vmem:[%s2216_s0 + $0x80] sm:$0xff] }
   0x9   :  { %1306 = vpow2.f32 %v921_v20  ;;  %v928_v39 = vmul.f32 -1.442695, %v1648_v28  ;;  %v1676_v40 = vadd.f32 %v1582_v2, %v24_v32  ;;  %v929_v41 = vmul.f32 -1.442695, %v1655_v31  ;;  %v28_v48 = vld [vmem:[%s2216_s0 + $0x88] sm:$0xff]  ;;  %v29_v50 = vld [vmem:[%s2216_s0 + $0x90] sm:$0xff] }
   0xa   :  { %1308 = vpow2.f32 %v922_v21  ;;  %v1680_v42 = vadd.f32 %v1582_v2, %v25_v35  ;;  %v930_v43 = vmul.f32 -1.442695, %v1662_v34  ;;  %v1684_v44 = vadd.f32 %v1582_v2, %v26_v38  ;;  %v30_v53 = vld [vmem:[%s2216_s0 + $0x98] sm:$0xff]  ;;  %v31_v57 = vld [vmem:[%s2216_s0 + $0xa0] sm:$0xff]  ;;  %v44_v1 = vld [vmem:[%s2216_s0 + $0x108] sm:$0xff] }
   0xb   :  { %1310 = vpow2.f32 %v923_v23  ;;  %v931_v45 = vmul.f32 -1.442695, %v1669_v37  ;;  %v932_v47 = vmul.f32 -1.442695, %v1676_v40  ;;  %v1700_v52 = vadd.f32 %v1582_v2, %v27_v46  ;;  %v43_v61 = vld [vmem:[%s2216_s0 + $0x100] sm:$0xff]  ;;  %v32_v10 = vld [vmem:[%s2216_s0 + $0xa8] sm:$0xff] }
   0xc   :  { %1312 = vpow2.f32 %v924_v27  ;;  %v933_v49 = vmul.f32 -1.442695, %v1680_v42  ;;  %v934_v51 = vmul.f32 -1.442695, %v1684_v44  ;;  %v1706_v54 = vadd.f32 %v1582_v2, %v28_v48  ;;  %v33_v13 = vld [vmem:[%s2216_s0 + $0xb0] sm:$0xff]  ;;  %v46_v27 = vld [vmem:[%s2216_s0 + $0x118] sm:$0xff] }
   0xd   :  { %1314 = vpow2.f32 %v925_v30  ;;  %v1709_v56 = vadd.f32 %v1582_v2, %v29_v50  ;;  %v1715_v60 = vadd.f32 %v1582_v2, %v30_v53  ;;  %v1721_v0 = vmul.f32 -1.442695, %v1700_v52  ;;  %v45_v20 = vld [vmem:[%s2216_s0 + $0x110] sm:$0xff]  ;;  %v47_v29 = vld [vmem:[%s2216_s0 + $0x120] sm:$0xff]  ;;  %v34_v35 = vld [vmem:[%s2216_s0 + $0xb8] sm:$0xff] }
   0xe   :  { %1316 = vpow2.f32 %v926_v33  ;;  %v1727_v7 = vmul.f32 -1.442695, %v1706_v54  ;;  %v1733_v12 = vadd.f32 %v1582_v2, %v31_v57  ;;  %v1742_v19 = vadd.f32 %v1582_v2, %v43_v61  ;;  %v48_v38 = vld [vmem:[%s2216_s0 + $0x128] sm:$0xff]  ;;  %v51_v61 = vld [vmem:[%s2216_s0 + $0x140] sm:$0xff] }
   0xf   :  { %1318 = vpow2.f32 %v927_v36  ;;  %v1739_v18 = vmul.f32 -1.442695, %v1709_v56  ;;  %v1748_v25 = vmul.f32 -1.442695, %v1715_v60  ;;  %v1751_v26 = vadd.f32 %v1582_v2, %v44_v1 }
  0x10   :  { %1320 = vpow2.f32 %v928_v39  ;;  %v1760_v33 = vadd.f32 %v1582_v2, %v32_v10  ;;  %v1766_v36 = vadd.f32 %v1582_v2, %v33_v13  ;;  %v1778_v46 = vadd.f32 %v1582_v2, %v45_v20  ;;  %v52_v10 = vld [vmem:[%s2216_s0 + $0x148] sm:$0xff] }
  0x11   :  { %1322 = vpow2.f32 %v929_v41  ;;  %v1784_v50 = vadd.f32 %v1582_v2, %v47_v29  ;;  %v1790_v57 = vadd.f32 %v1582_v2, %v34_v35 }
  0x12   :  { %1324 = vpow2.f32 %v930_v43  ;;  %v1772_v43 = vmul.f32 -1.442695, %v1733_v12  ;;  %v1802_v1 = vmul.f32 -1.442695, %v1760_v33 }
  0x13   :  { %1326 = vpow2.f32 %v931_v45  ;;  %v35_v45 = vld [vmem:[%s2216_s0 + $0xc0] sm:$0xff] }
  0x14   :  { %v1303_v55 = vpop.eup %1302  ;;  %1328 = vpow2.f32 %v932_v47 }
  0x15   :  { %v1305_v58 = vpop.eup %1304  ;;  %v338_v59 = vadd.f32 1.0, %v1303_v55  ;;  %1330 = vpow2.f32 %v933_v49  ;;  %v1781_v49 = vadd.f32 %v1582_v2, %v46_v27  ;;  %v37_v27 = vld [vmem:[%s2216_s0 + $0xd0] sm:$0xff] }
  0x16   :  { %v1307_v62 = vpop.eup %1306  ;;  %v339_v63 = vadd.f32 1.0, %v1305_v58  ;;  %1332 = vpow2.f32 %v934_v51  ;;  %v49_v51 = vld [vmem:[%s2216_s0 + $0x130] sm:$0xff]  ;;  %v1793_v58 = vadd.f32 %v1582_v2, %v48_v38 }
  0x17   :  { %v1309_v5 = vpop.eup %1308  ;;  %1334 = vrcp.f32 %v338_v59  ;;  %v340_v6 = vadd.f32 1.0, %v1307_v62  ;;  %v50_v59 = vld [vmem:[%s2216_s0 + $0x138] sm:$0xff]  ;;  %v1817_v20 = vadd.f32 %v1582_v2, %v49_v51 }
  0x18   :  { %v1311_v14 = vpop.eup %1310  ;;  %1336 = vrcp.f32 %v339_v63  ;;  %v341_v15 = vadd.f32 1.0, %v1309_v5  ;;  %v36_v5 = vld [vmem:[%s2216_s0 + $0xc8] sm:$0xff]  ;;  %v1823_v29 = vadd.f32 %v1582_v2, %v50_v59 }
  0x19   :  { %v1313_v21 = vpop.eup %1312  ;;  %1338 = vrcp.f32 %v340_v6  ;;  %v342_v23 = vadd.f32 1.0, %v1311_v14  ;;  %v1808_v6 = vadd.f32 %v1582_v2, %v35_v45  ;;  %v54_v45 = vld [vmem:[%s2216_s0 + $0x158] sm:$0xff]  ;;  %v56_v59 = vld [vmem:[%s2216_s0 + $0x168] sm:$0xff] }
  0x1a   :  { %v1315_v30 = vpop.eup %1314  ;;  %1340 = vrcp.f32 %v341_v15  ;;  %v343_v32 = vadd.f32 1.0, %v1313_v21  ;;  %v1814_v15 = vmul.f32 -1.442695, %v1766_v36 }
  0x1b   :  { %v1317_v39 = vpop.eup %1316  ;;  %1342 = vrcp.f32 %v342_v23  ;;  %v344_v41 = vadd.f32 1.0, %v1315_v30  ;;  %v1826_v30 = vadd.f32 %v1582_v2, %v51_v61 }
  0x1c   :  { %v1319_v47 = vpop.eup %1318  ;;  %1344 = vrcp.f32 %v343_v32  ;;  %v345_v48 = vadd.f32 1.0, %v1317_v39  ;;  %v53_v32 = vld [vmem:[%s2216_s0 + $0x150] sm:$0xff]  ;;  %v1832_v39 = vadd.f32 %v1582_v2, %v36_v5  ;;  %v1856_v5 = vadd.f32 %v1582_v2, %v37_v27 }
  0x1d   :  { %v1321_v53 = vpop.eup %1320  ;;  %1346 = vrcp.f32 %v344_v41  ;;  %v346_v55 = vadd.f32 1.0, %v1319_v47  ;;  %v1835_v41 = vadd.f32 %v1582_v2, %v52_v10  ;;  %v55_v47 = vld [vmem:[%s2216_s0 + $0x160] sm:$0xff]  ;;  %v57_v27 = vld [vmem:[%s2216_s0 + $0x170] sm:$0xff] }
  0x1e   :  { %v1323_v62 = vpop.eup %1322  ;;  %1348 = vrcp.f32 %v345_v48  ;;  %v347_v63 = vadd.f32 1.0, %v1321_v53  ;;  %v1844_v53 = vmul.f32 -1.442695, %v1790_v57  ;;  %v39_v10 = vld [vmem:[%s2216_s0 + $0xe0] sm:$0xff] }
  0x1f   :  { %v1325_v13 = vpop.eup %1324  ;;  %1350 = vrcp.f32 %v346_v55  ;;  %v348_v14 = vadd.f32 1.0, %v1323_v62  ;;  %v1847_v55 = vmul.f32 -1.442695, %v1808_v6 }
  0x20   :  { %v1327_v21 = vpop.eup %1326  ;;  %1352 = vrcp.f32 %v347_v63  ;;  %v349_v23 = vadd.f32 1.0, %v1325_v13  ;;  %v38_v63 = vld [vmem:[%s2216_s0 + $0xd8] sm:$0xff]  ;;  %v1862_v13 = vadd.f32 %v1582_v2, %v53_v32  ;;  %v1875_v32 = vmul.f32 -1.442695, %v1832_v39 }
  0x21   :  { %v1329_v35 = vpop.eup %1328  ;;  %1354 = vrcp.f32 %v348_v14  ;;  %v350_v38 = vadd.f32 1.0, %v1327_v21 }
  0x22   :  { %v1331_v48 = vpop.eup %1330  ;;  %1356 = vrcp.f32 %v349_v23  ;;  %v351_v51 = vadd.f32 1.0, %v1329_v35  ;;  %v1865_v23 = vadd.f32 %v1582_v2, %v54_v45  ;;  %v1868_v35 = vadd.f32 %v1582_v2, %v55_v47  ;;  %v58_v45 = vld [vmem:[%s2216_s0 + $0x178] sm:$0xff] }
  0x23   :  { %v1333_v61 = vpop.eup %1332  ;;  %1358 = vrcp.f32 %v350_v38  ;;  %v352_v62 = vadd.f32 1.0, %v1331_v48 }
  0x24   :  { %v1335_v14 = vpop.eup %1334  ;;  %1360 = vrcp.f32 %v351_v51  ;;  %v353_v21 = vadd.f32 1.0, %v1333_v61  ;;  %2222 = vst [vmem:[#allocation2_spill] sm:$0xff] %v1865_v23  ;;  %2223 = vst [vmem:[#allocation3_spill] sm:$0xff] %v1868_v35  ;;  %v1878_v51 = vadd.f32 %v1582_v2, %v56_v59  ;;  %v1885_v35 = vadd.f32 %v1582_v2, %v38_v63  ;;  %v59_v59 = vld [vmem:[%s2216_s0 + $0x180] sm:$0xff] }
  0x25   :  { %v1337_v38 = vpop.eup %1336  ;;  %v530_v48 = vmul.f32 %v1335_v14, %v1585_v3  ;;  %1362 = vrcp.f32 %v352_v62  ;;  %v40_v3 = vld [vmem:[%s2216_s0 + $0xe8] sm:$0xff]  ;;  %v1891_v62 = vadd.f32 %v1582_v2, %v39_v10  ;;  %v1900_v63 = vadd.f32 %v1582_v2, %v57_v27 }
  0x26   :  { %2224 = vst [vmem:[#allocation4_spill] sm:$0xff] %v1878_v51  ;;  %v1339_v47 = vpop.eup %1338  ;;  %v531_v61 = vmul.f32 %v1337_v38, %v1588_v4  ;;  %1364 = vrcp.f32 %v353_v21  ;;  %v945_v4 = vmul.f32 -1.442695, %v1856_v5  ;;  %v1905_v10 = vadd.f32 %v1582_v2, %v58_v45 }
  0x27   :  { %v1341_v14 = vpop.eup %1340  ;;  %v532_v51 = vmul.f32 %v1339_v47, %v1600_v8  ;;  %1366 = vpow2.f32 %v1721_v0  ;;  %v60_v8 = vld [vmem:[%s2216_s0 + $0x188] sm:$0xff]  ;;  %v1913_v27 = vadd.f32 %v1582_v2, %v40_v3  ;;  %v62_v3 = vld [vmem:[%s2216_s0 + $0x198] sm:$0xff] }
  0x28   :  { %v1343_v21 = vpop.eup %1342  ;;  %v1114_v38 = vpack.c.bf16 %v531_v61, %v530_v48  ;;  %v533_v23 = vmul.f32 %v1341_v14, %v1603_v9  ;;  %1368 = vpow2.f32 %v1727_v7  ;;  %v1916_v48 = vadd.f32 %v1582_v2, %v59_v59  ;;  %v61_v9 = vld [vmem:[%s2216_s0 + $0x190] sm:$0xff] }
  0x29   :  { %v1345_v47 = vpop.eup %1344  ;;  %v534_v0 = vmul.f32 %v1343_v21, %v1609_v11  ;;  %1370 = vpow2.f32 %v1739_v18  ;;  %v946_v18 = vmul.f32 -1.442695, %v1885_v35  ;;  %v41_v61 = vld [vmem:[%s2216_s0 + $0xf0] sm:$0xff] }
  0x2a   :  { %v1347_v7 = vpop.eup %1346  ;;  %1115 = vst [vmem:[%s2218_s2] sm:$0xff] %v1114_v38   ;;  %v1119_v45 = vpack.c.bf16 %v533_v23, %v532_v51  ;;  %v535_v11 = vmul.f32 %v1345_v47, %v1620_v16  ;;  %1372 = vpow2.f32 %v1748_v25  ;;  %v947_v23 = vmul.f32 -1.442695, %v1891_v62  ;;  %v42_v16 = vld [vmem:[%s2216_s0 + $0xf8] sm:$0xff] }
  0x2b   :  { %v1349_v59 = vpop.eup %1348  ;;  %v536_v14 = vmul.f32 %v1347_v7, %v1623_v17  ;;  %1374 = vpow2.f32 %v1772_v43  ;;  %v1940_v25 = vadd.f32 %v1582_v2, %v60_v8  ;;  %v1948_v17 = vadd.f32 %v1582_v2, %v61_v9  ;;  %v63_v43 = vld [vmem:[%s2216_s0 + $0x1a0] sm:$0xff] }
  0x2c   :  { %v1351_v51 = vpop.eup %1350  ;;  %1271 = vst [vmem:[%s2218_s2 + $0x8] sm:$0xff] %v1119_v45   ;;  %v1124_v21 = vpack.c.bf16 %v535_v11, %v534_v0  ;;  %v537_v38 = vmul.f32 %v1349_v59, %v1634_v22  ;;  %1376 = vpow2.f32 %v1802_v1  ;;  %v1956_v7 = vadd.f32 %v1582_v2, %v41_v61  ;;  %v64_v22 = vld [vmem:[%s2216_s0 + $0x1a8] sm:$0xff]  ;;  %v65_v45 = vld [vmem:[%s2216_s0 + $0x1b0] sm:$0xff] }
  0x2d   :  { %v1353_v47 = vpop.eup %1352  ;;  %v538_v8 = vmul.f32 %v1351_v51, %v1638_v24  ;;  %1378 = vpow2.f32 %v1814_v15  ;;  %v1959_v0 = vadd.f32 %v1582_v2, %v62_v3  ;;  %v1970_v15 = vadd.f32 %v1582_v2, %v42_v16 }
  0x2e   :  { %v1355_v1 = vpop.eup %1354  ;;  %1272 = vst [vmem:[%s2218_s2 + $0x10] sm:$0xff] %v1124_v21   ;;  %v1129_v9 = vpack.c.bf16 %v537_v38, %v536_v14  ;;  %v539_v24 = vmul.f32 %v1353_v47, %v1648_v28  ;;  %1380 = vpow2.f32 %v1844_v53  ;;  %v948_v3 = vmul.f32 -1.442695, %v1913_v27 }
  0x2f   :  { %v1357_v11 = vpop.eup %1356  ;;  %v540_v61 = vmul.f32 %v1355_v1, %v1655_v31  ;;  %1382 = vpow2.f32 %v1847_v55  ;;  %v1979_v59 = vadd.f32 %v1582_v2, %v63_v43  ;;  %v1987_v16 = vadd.f32 %v1582_v2, %v64_v22  ;;  %v66_v31 = vld [vmem:[%s2216_s0 + $0x1b8] sm:$0xff] }
  0x30   :  { %v1359_v28 = vpop.eup %1358  ;;  %1273 = vst [vmem:[%s2218_s2 + $0x18] sm:$0xff] %v1129_v9   ;;  %v1134_v53 = vpack.c.bf16 %v539_v24, %v538_v8  ;;  %v541_v14 = vmul.f32 %v1357_v11, %v1662_v34  ;;  %1384 = vpow2.f32 %v1875_v32  ;;  %v949_v21 = vmul.f32 -1.442695, %v1956_v7  ;;  %v67_v34 = vld [vmem:[%s2216_s0 + $0x1c0] sm:$0xff] }
  0x31   :  { %v1361_v55 = vpop.eup %1360  ;;  %v542_v51 = vmul.f32 %v1359_v28, %v1669_v37  ;;  %1386 = vpow2.f32 %v945_v4  ;;  %v1995_v38 = vadd.f32 %v1582_v2, %v65_v45  ;;  %v950_v37 = vmul.f32 -1.442695, %v1970_v15  ;;  %v68_v4 = vld [vmem:[%s2216_s0 + $0x1c8] sm:$0xff] }
  0x32   :  { %v1363_v32 = vpop.eup %1362  ;;  %1274 = vst [vmem:[%s2218_s2 + $0x20] sm:$0xff] %v1134_v53   ;;  %v1139_v43 = vpack.c.bf16 %v541_v14, %v540_v61  ;;  %v543_v47 = vmul.f32 %v1361_v55, %v1676_v40  ;;  %1388 = vpow2.f32 %v946_v18  ;;  %v2010_v1 = vadd.f32 %v1582_v2, %v66_v31  ;;  %v70_v61 = vld [vmem:[%s2216_s0 + $0x1d8] sm:$0xff]  ;;  %v72_v14 = vld [vmem:[%s2216_s0 + $0x1e8] sm:$0xff] }
  0x33   :  { %v1365_v8 = vpop.eup %1364  ;;  %v544_v22 = vmul.f32 %v1363_v32, %v1680_v42  ;;  %1390 = vpow2.f32 %v947_v23  ;;  %v2017_v24 = vadd.f32 %v1582_v2, %v67_v34  ;;  %v69_v42 = vld [vmem:[%s2216_s0 + $0x1d0] sm:$0xff]  ;;  %v2023_v11 = vadd.f32 %v1582_v2, %v68_v4 }
  0x34   :  { %v1367_v9 = vpop.eup %1366  ;;  %1275 = vst [vmem:[%s2218_s2 + $0x28] sm:$0xff] %v1139_v43   ;;  %v1144_v40 = vpack.c.bf16 %v543_v47, %v542_v51  ;;  %v545_v18 = vmul.f32 %v1365_v8, %v1684_v44  ;;  %1392 = vpow2.f32 %v948_v3  ;;  %v71_v44 = vld [vmem:[%s2216_s0 + $0x1e0] sm:$0xff]  ;;  %v2038_v51 = vadd.f32 %v1582_v2, %v69_v42  ;;  %v73_v47 = vld [vmem:[%s2216_s0 + $0x1f0] sm:$0xff] }
  0x35   :  { %v1369_v23 = vpop.eup %1368  ;;  %v354_v45 = vadd.f32 1.0, %v1367_v9  ;;  %1394 = vpow2.f32 %v949_v21  ;;  %v2044_v32 = vadd.f32 %v1582_v2, %v70_v61  ;;  %v2047_v43 = vadd.f32 %v1582_v2, %v71_v44 }
  0x36   :  { %v1371_v3 = vpop.eup %1370  ;;  %1276 = vst [vmem:[%s2218_s2 + $0x30] sm:$0xff] %v1144_v40   ;;  %v1149_v28 = vpack.c.bf16 %v545_v18, %v544_v22  ;;  %v355_v53 = vadd.f32 1.0, %v1369_v23  ;;  %1396 = vpow2.f32 %v950_v37  ;;  %v2053_v8 = vadd.f32 %v1582_v2, %v72_v14  ;;  %v74_v22 = vld [vmem:[%s2216_s0 + $0x1f8] sm:$0xff] }
  0x37   :  { %v1373_v31 = vpop.eup %1372  ;;  %1398 = vrcp.f32 %v354_v45  ;;  %v356_v55 = vadd.f32 1.0, %v1371_v3  ;;  %v2059_v23 = vadd.f32 %v1582_v2, %v73_v47  ;;  %v2062_v44 = vadd.f32 %v1582_v2, %v74_v22 }
  0x38   :  { %v1375_v21 = vpop.eup %1374  ;;  %1277 = vst [vmem:[%s2218_s2 + $0x38] sm:$0xff] %v1149_v28   ;;  %1400 = vrcp.f32 %v355_v53  ;;  %v357_v34 = vadd.f32 1.0, %v1373_v31 }
  0x39   :  { %v1377_v37 = vpop.eup %1376  ;;  %1402 = vrcp.f32 %v356_v55  ;;  %v358_v4 = vadd.f32 1.0, %v1375_v21 }
  0x3a   :  { %v1379_v9 = vpop.eup %1378  ;;  %1404 = vrcp.f32 %v357_v34  ;;  %v359_v40 = vadd.f32 1.0, %v1377_v37 }
  0x3b   :  { %v1381_v18 = vpop.eup %1380  ;;  %1406 = vrcp.f32 %v358_v4  ;;  %v360_v42 = vadd.f32 1.0, %v1379_v9 }
  0x3c   :  { %v1383_v45 = vpop.eup %1382  ;;  %1408 = vrcp.f32 %v359_v40  ;;  %v361_v61 = vadd.f32 1.0, %v1381_v18  ;;  %v951_v40 = vmul.f32 -1.442695, %v1742_v19 }
  0x3d   :  { %v1385_v3 = vpop.eup %1384  ;;  %1410 = vrcp.f32 %v360_v42  ;;  %v362_v28 = vadd.f32 1.0, %v1383_v45  ;;  %v952_v45 = vmul.f32 -1.442695, %v1751_v26 }
  0x3e   :  { %v1387_v53 = vpop.eup %1386  ;;  %1412 = vrcp.f32 %v361_v61  ;;  %v363_v14 = vadd.f32 1.0, %v1385_v3 }
  0x3f   :  { %v1389_v31 = vpop.eup %1388  ;;  %1414 = vrcp.f32 %v362_v28  ;;  %v364_v55 = vadd.f32 1.0, %v1387_v53  ;;  %v953_v28 = vmul.f32 -1.442695, %v1778_v46 }
  0x40   :  { %v1391_v21 = vpop.eup %1390  ;;  %1416 = vrcp.f32 %v363_v14  ;;  %v365_v34 = vadd.f32 1.0, %v1389_v31  ;;  %v954_v31 = vmul.f32 -1.442695, %v1781_v49 }
  0x41   :  { %v1393_v47 = vpop.eup %1392  ;;  %1418 = vrcp.f32 %v364_v55  ;;  %v366_v37 = vadd.f32 1.0, %v1391_v21 }
  0x42   :  { %v1395_v4 = vpop.eup %1394  ;;  %1420 = vrcp.f32 %v365_v34  ;;  %v367_v9 = vadd.f32 1.0, %v1393_v47  ;;  %v955_v34 = vmul.f32 -1.442695, %v1784_v50 }
  0x43   :  { %v1397_v2 = vpop.eup %1396  ;;  %1422 = vrcp.f32 %v366_v37  ;;  %v368_v22 = vadd.f32 1.0, %v1395_v4 }
  0x44   :  { %v1399_v18 = vpop.eup %1398  ;;  %1424 = vrcp.f32 %v367_v9  ;;  %v369_v42 = vadd.f32 1.0, %v1397_v2 }
  0x45   :  { %v1401_v61 = vpop.eup %1400  ;;  %v546_v3 = vmul.f32 %v1399_v18, %v1700_v52  ;;  %1426 = vrcp.f32 %v368_v22  ;;  %v956_v52 = vmul.f32 -1.442695, %v1793_v58 }
  0x46   :  { %v1403_v53 = vpop.eup %1402  ;;  %v547_v14 = vmul.f32 %v1401_v61, %v1706_v54  ;;  %1428 = vrcp.f32 %v369_v42  ;;  %v957_v54 = vmul.f32 -1.442695, %v1817_v20 }
  0x47   :  { %v1405_v55 = vpop.eup %1404  ;;  %v548_v21 = vmul.f32 %v1403_v53, %v1709_v56  ;;  %1430 = vpow2.f32 %v951_v40 }
  0x48   :  { %v1407_v47 = vpop.eup %1406  ;;  %v1154_v37 = vpack.c.bf16 %v547_v14, %v546_v3  ;;  %v549_v4 = vmul.f32 %v1405_v55, %v1715_v60  ;;  %1432 = vpow2.f32 %v952_v45  ;;  %v958_v60 = vmul.f32 -1.442695, %v1823_v29 }
  0x49   :  { %v1409_v9 = vpop.eup %1408  ;;  %v550_v2 = vmul.f32 %v1407_v47, %v1733_v12  ;;  %1434 = vpow2.f32 %v953_v28  ;;  %v959_v12 = vmul.f32 -1.442695, %v1826_v30 }
  0x4a   :  { %v1411_v22 = vpop.eup %1410  ;;  %1278 = vst [vmem:[%s2218_s2 + $0x40] sm:$0xff] %v1154_v37   ;;  %v1159_v56 = vpack.c.bf16 %v549_v4, %v548_v21  ;;  %v551_v40 = vmul.f32 %v1409_v9, %v1760_v33  ;;  %1436 = vpow2.f32 %v954_v31  ;;  %v960_v33 = vmul.f32 -1.442695, %v1835_v41  ;;  %v2225_v21 = vld [vmem:[#allocation2_spill] sm:$0xff]  ;;  %v2226_v37 = vld [vmem:[#allocation3_spill] sm:$0xff] }
  0x4b   :  { %v1413_v18 = vpop.eup %1412  ;;  %v552_v42 = vmul.f32 %v1411_v22, %v1766_v36  ;;  %1438 = vpow2.f32 %v955_v34  ;;  %v961_v36 = vmul.f32 -1.442695, %v1862_v13 }
  0x4c   :  { %v1415_v45 = vpop.eup %1414  ;;  %1279 = vst [vmem:[%s2218_s2 + $0x48] sm:$0xff] %v1159_v56   ;;  %v1164_v61 = vpack.c.bf16 %v551_v40, %v550_v2  ;;  %v553_v3 = vmul.f32 %v1413_v18, %v1790_v57  ;;  %1440 = vpow2.f32 %v956_v52  ;;  %v962_v57 = vmul.f32 -1.442695, %v2225_v21  ;;  %v2227_v2 = vld [vmem:[#allocation4_spill] sm:$0xff] }
  0x4d   :  { %v1417_v28 = vpop.eup %1416  ;;  %v554_v53 = vmul.f32 %v1415_v45, %v1808_v6  ;;  %1442 = vpow2.f32 %v957_v54  ;;  %v963_v6 = vmul.f32 -1.442695, %v2226_v37 }
  0x4e   :  { %v1419_v14 = vpop.eup %1418  ;;  %1280 = vst [vmem:[%s2218_s2 + $0x50] sm:$0xff] %v1164_v61   ;;  %v1169_v31 = vpack.c.bf16 %v553_v3, %v552_v42  ;;  %v555_v55 = vmul.f32 %v1417_v28, %v1832_v39  ;;  %1444 = vpow2.f32 %v958_v60  ;;  %v964_v39 = vmul.f32 -1.442695, %v2227_v2 }
  0x4f   :  { %v1421_v34 = vpop.eup %1420  ;;  %v556_v47 = vmul.f32 %v1419_v14, %v1856_v5  ;;  %1446 = vpow2.f32 %v959_v12  ;;  %v965_v5 = vmul.f32 -1.442695, %v1900_v63 }
  0x50   :  { %v1423_v4 = vpop.eup %1422  ;;  %1281 = vst [vmem:[%s2218_s2 + $0x58] sm:$0xff] %v1169_v31   ;;  %v1174_v52 = vpack.c.bf16 %v555_v55, %v554_v53  ;;  %v557_v9 = vmul.f32 %v1421_v34, %v1885_v35  ;;  %1448 = vpow2.f32 %v960_v33  ;;  %v966_v35 = vmul.f32 -1.442695, %v1905_v10 }
  0x51   :  { %v1425_v54 = vpop.eup %1424  ;;  %v558_v22 = vmul.f32 %v1423_v4, %v1891_v62  ;;  %1450 = vpow2.f32 %v961_v36 }
  0x52   :  { %v1427_v56 = vpop.eup %1426  ;;  %1282 = vst [vmem:[%s2218_s2 + $0x60] sm:$0xff] %v1174_v52   ;;  %v1179_v40 = vpack.c.bf16 %v557_v9, %v556_v47  ;;  %v559_v60 = vmul.f32 %v1425_v54, %v1913_v27  ;;  %1452 = vpow2.f32 %v962_v57 }
  0x53   :  { %v1429_v18 = vpop.eup %1428  ;;  %v560_v42 = vmul.f32 %v1427_v56, %v1956_v7  ;;  %1454 = vpow2.f32 %v963_v6 }
  0x54   :  { %v1431_v12 = vpop.eup %1430  ;;  %1283 = vst [vmem:[%s2218_s2 + $0x68] sm:$0xff] %v1179_v40   ;;  %v1184_v62 = vpack.c.bf16 %v559_v60, %v558_v22  ;;  %v561_v45 = vmul.f32 %v1429_v18, %v1970_v15  ;;  %1456 = vpow2.f32 %v964_v39 }
  0x55   :  { %v1433_v61 = vpop.eup %1432  ;;  %v370_v3 = vadd.f32 1.0, %v1431_v12  ;;  %1458 = vpow2.f32 %v965_v5 }
  0x56   :  { %v1435_v27 = vpop.eup %1434  ;;  %1284 = vst [vmem:[%s2218_s2 + $0x70] sm:$0xff] %v1184_v62   ;;  %v1189_v33 = vpack.c.bf16 %v561_v45, %v560_v42  ;;  %v371_v7 = vadd.f32 1.0, %v1433_v61  ;;  %1460 = vpow2.f32 %v966_v35  ;;  %v967_v45 = vmul.f32 -1.442695, %v1916_v48 }
  0x57   :  { %v1437_v28 = vpop.eup %1436  ;;  %1462 = vrcp.f32 %v370_v3  ;;  %v372_v53 = vadd.f32 1.0, %v1435_v27  ;;  %v968_v27 = vmul.f32 -1.442695, %v1940_v25 }
  0x58   :  { %v1439_v36 = vpop.eup %1438  ;;  %1285 = vst [vmem:[%s2218_s2 + $0x78] sm:$0xff] %v1189_v33   ;;  %1464 = vrcp.f32 %v371_v7  ;;  %v373_v15 = vadd.f32 1.0, %v1437_v28  ;;  %v969_v28 = vmul.f32 -1.442695, %v1948_v17 }
  0x59   :  { %v1441_v14 = vpop.eup %1440  ;;  %1466 = vrcp.f32 %v372_v53  ;;  %v374_v31 = vadd.f32 1.0, %v1439_v36 }
  0x5a   :  { %v1443_v55 = vpop.eup %1442  ;;  %1468 = vrcp.f32 %v373_v15  ;;  %v375_v57 = vadd.f32 1.0, %v1441_v14  ;;  %v970_v15 = vmul.f32 -1.442695, %v1959_v0 }
  0x5b   :  { %v1445_v34 = vpop.eup %1444  ;;  %1470 = vrcp.f32 %v374_v31  ;;  %v376_v47 = vadd.f32 1.0, %v1443_v55  ;;  %v971_v55 = vmul.f32 -1.442695, %v1979_v59 }
  0x5c   :  { %v1447_v6 = vpop.eup %1446  ;;  %1472 = vrcp.f32 %v375_v57  ;;  %v377_v4 = vadd.f32 1.0, %v1445_v34 }
  0x5d   :  { %v1449_v52 = vpop.eup %1448  ;;  %1474 = vrcp.f32 %v376_v47  ;;  %v378_v9 = vadd.f32 1.0, %v1447_v6 }
  0x5e   :  { %v1451_v39 = vpop.eup %1450  ;;  %1476 = vrcp.f32 %v377_v4  ;;  %v379_v54 = vadd.f32 1.0, %v1449_v52 }
  0x5f   :  { %v1453_v22 = vpop.eup %1452  ;;  %1478 = vrcp.f32 %v378_v9  ;;  %v380_v5 = vadd.f32 1.0, %v1451_v39 }
  0x60   :  { %v1455_v56 = vpop.eup %1454  ;;  %1480 = vrcp.f32 %v379_v54  ;;  %v381_v40 = vadd.f32 1.0, %v1453_v22 }
  0x61   :  { %v1457_v60 = vpop.eup %1456  ;;  %1482 = vrcp.f32 %v380_v5  ;;  %v382_v35 = vadd.f32 1.0, %v1455_v56 }
  0x62   :  { %v1459_v18 = vpop.eup %1458  ;;  %1484 = vrcp.f32 %v381_v40  ;;  %v383_v42 = vadd.f32 1.0, %v1457_v60 }
  0x63   :  { %v1461_v12 = vpop.eup %1460  ;;  %1486 = vrcp.f32 %v382_v35  ;;  %v384_v62 = vadd.f32 1.0, %v1459_v18 }
  0x64   :  { %v1463_v61 = vpop.eup %1462  ;;  %1488 = vrcp.f32 %v383_v42  ;;  %v385_v3 = vadd.f32 1.0, %v1461_v12 }
  0x65   :  { %v1465_v33 = vpop.eup %1464  ;;  %v562_v7 = vmul.f32 %v1463_v61, %v1742_v19  ;;  %1490 = vrcp.f32 %v384_v62  ;;  %v972_v19 = vmul.f32 -1.442695, %v1987_v16 }
  0x66   :  { %v1467_v53 = vpop.eup %1466  ;;  %v563_v36 = vmul.f32 %v1465_v33, %v1751_v26  ;;  %1492 = vrcp.f32 %v385_v3  ;;  %v973_v26 = vmul.f32 -1.442695, %v1995_v38 }
  0x67   :  { %v1469_v14 = vpop.eup %1468  ;;  %v564_v31 = vmul.f32 %v1467_v53, %v1778_v46  ;;  %1494 = vpow2.f32 %v967_v45 }
  0x68   :  { %v1471_v57 = vpop.eup %1470  ;;  %v1194_v34 = vpack.c.bf16 %v563_v36, %v562_v7  ;;  %v565_v47 = vmul.f32 %v1469_v14, %v1781_v49  ;;  %1496 = vpow2.f32 %v968_v27  ;;  %v974_v49 = vmul.f32 -1.442695, %v2010_v1 }
  0x69   :  { %v1473_v6 = vpop.eup %1472  ;;  %v566_v4 = vmul.f32 %v1471_v57, %v1784_v50  ;;  %1498 = vpow2.f32 %v969_v28  ;;  %v975_v50 = vmul.f32 -1.442695, %v2017_v24 }
  0x6a   :  { %v1475_v52 = vpop.eup %1474  ;;  %1286 = vst [vmem:[%s2218_s2 + $0x80] sm:$0xff] %v1194_v34   ;;  %v1199_v46 = vpack.c.bf16 %v565_v47, %v564_v31  ;;  %v567_v9 = vmul.f32 %v1473_v6, %v1793_v58  ;;  %1500 = vpow2.f32 %v970_v15  ;;  %v976_v58 = vmul.f32 -1.442695, %v2023_v11 }
  0x6b   :  { %v1477_v39 = vpop.eup %1476  ;;  %v568_v54 = vmul.f32 %v1475_v52, %v1817_v20  ;;  %1502 = vpow2.f32 %v971_v55  ;;  %v977_v20 = vmul.f32 -1.442695, %v2038_v51 }
  0x6c   :  { %v1479_v22 = vpop.eup %1478  ;;  %1287 = vst [vmem:[%s2218_s2 + $0x88] sm:$0xff] %v1199_v46   ;;  %v1204_v5 = vpack.c.bf16 %v567_v9, %v566_v4  ;;  %v569_v56 = vmul.f32 %v1477_v39, %v1823_v29  ;;  %1504 = vpow2.f32 %v972_v19  ;;  %v978_v29 = vmul.f32 -1.442695, %v2044_v32 }
  0x6d   :  { %v1481_v40 = vpop.eup %1480  ;;  %v570_v60 = vmul.f32 %v1479_v22, %v1826_v30  ;;  %1506 = vpow2.f32 %v973_v26  ;;  %v979_v30 = vmul.f32 -1.442695, %v2047_v43 }
  0x6e   :  { %v1483_v35 = vpop.eup %1482  ;;  %1288 = vst [vmem:[%s2218_s2 + $0x90] sm:$0xff] %v1204_v5   ;;  %v1209_v18 = vpack.c.bf16 %v569_v56, %v568_v54  ;;  %v571_v42 = vmul.f32 %v1481_v40, %v1835_v41  ;;  %1508 = vpow2.f32 %v974_v49  ;;  %v980_v41 = vmul.f32 -1.442695, %v2053_v8 }
  0x6f   :  { %v1485_v12 = vpop.eup %1484  ;;  %v572_v62 = vmul.f32 %v1483_v35, %v1862_v13  ;;  %1510 = vpow2.f32 %v975_v50  ;;  %v981_v13 = vmul.f32 -1.442695, %v2059_v23 }
  0x70   :  { %v1487_v45 = vpop.eup %1486  ;;  %1289 = vst [vmem:[%s2218_s2 + $0x98] sm:$0xff] %v1209_v18   ;;  %v1214_v61 = vpack.c.bf16 %v571_v42, %v570_v60  ;;  %v573_v3 = vmul.f32 %v1485_v12, %v2225_v21  ;;  %1512 = vpow2.f32 %v976_v58  ;;  %v982_v21 = vmul.f32 -1.442695, %v2062_v44 }
  0x71   :  { %v1489_v27 = vpop.eup %1488  ;;  %v574_v33 = vmul.f32 %v1487_v45, %v2226_v37  ;;  %1514 = vpow2.f32 %v977_v20 }
  0x72   :  { %v1491_v7 = vpop.eup %1490  ;;  %1290 = vst [vmem:[%s2218_s2 + $0xa0] sm:$0xff] %v1214_v61   ;;  %v1219_v28 = vpack.c.bf16 %v573_v3, %v572_v62  ;;  %v575_v53 = vmul.f32 %v1489_v27, %v2227_v2  ;;  %1516 = vpow2.f32 %v978_v29 }
  0x73   :  { %v1493_v36 = vpop.eup %1492  ;;  %v576_v15 = vmul.f32 %v1491_v7, %v1900_v63  ;;  %1518 = vpow2.f32 %v979_v30 }
  0x74   :  { %v1495_v14 = vpop.eup %1494  ;;  %1291 = vst [vmem:[%s2218_s2 + $0xa8] sm:$0xff] %v1219_v28   ;;  %v1224_v37 = vpack.c.bf16 %v575_v53, %v574_v33  ;;  %v577_v31 = vmul.f32 %v1493_v36, %v1905_v10  ;;  %1520 = vpow2.f32 %v980_v41 }
  0x75   :  { %v1497_v55 = vpop.eup %1496  ;;  %v386_v57 = vadd.f32 1.0, %v1495_v14  ;;  %1522 = vpow2.f32 %v981_v13 }
  0x76   :  { %v1499_v2 = vpop.eup %1498  ;;  %1292 = vst [vmem:[%s2218_s2 + $0xb0] sm:$0xff] %v1224_v37   ;;  %v1229_v34 = vpack.c.bf16 %v577_v31, %v576_v15  ;;  %v387_v63 = vadd.f32 1.0, %v1497_v55  ;;  %1524 = vpow2.f32 %v982_v21 }
  0x77   :  { %v1501_v47 = vpop.eup %1500  ;;  %1526 = vrcp.f32 %v386_v57  ;;  %v388_v19 = vadd.f32 1.0, %v1499_v2 }
  0x78   :  { %v1503_v6 = vpop.eup %1502  ;;  %1293 = vst [vmem:[%s2218_s2 + $0xb8] sm:$0xff] %v1229_v34   ;;  %1528 = vrcp.f32 %v387_v63  ;;  %v389_v10 = vadd.f32 1.0, %v1501_v47 }
  0x79   :  { %v1505_v4 = vpop.eup %1504  ;;  %1530 = vrcp.f32 %v388_v19  ;;  %v390_v26 = vadd.f32 1.0, %v1503_v6 }
  0x7a   :  { %v1507_v52 = vpop.eup %1506  ;;  %1532 = vrcp.f32 %v389_v10  ;;  %v391_v46 = vadd.f32 1.0, %v1505_v4 }
  0x7b   :  { %v1509_v9 = vpop.eup %1508  ;;  %1534 = vrcp.f32 %v390_v26  ;;  %v392_v49 = vadd.f32 1.0, %v1507_v52 }
  0x7c   :  { %v1511_v39 = vpop.eup %1510  ;;  %1536 = vrcp.f32 %v391_v46  ;;  %v393_v54 = vadd.f32 1.0, %v1509_v9 }
  0x7d   :  { %v1513_v50 = vpop.eup %1512  ;;  %1538 = vrcp.f32 %v392_v49  ;;  %v394_v22 = vadd.f32 1.0, %v1511_v39 }
  0x7e   :  { %v1515_v5 = vpop.eup %1514  ;;  %1540 = vrcp.f32 %v393_v54  ;;  %v395_v56 = vadd.f32 1.0, %v1513_v50 }
  0x7f   :  { %v1517_v58 = vpop.eup %1516  ;;  %1542 = vrcp.f32 %v394_v22  ;;  %v396_v40 = vadd.f32 1.0, %v1515_v5 }
  0x80   :  { %v1519_v60 = vpop.eup %1518  ;;  %1544 = vrcp.f32 %v395_v56  ;;  %v397_v20 = vadd.f32 1.0, %v1517_v58 }
  0x81   :  { %v1521_v35 = vpop.eup %1520  ;;  %1546 = vrcp.f32 %v396_v40  ;;  %v398_v18 = vadd.f32 1.0, %v1519_v60 }
  0x82   :  { %v1523_v42 = vpop.eup %1522  ;;  %1548 = vrcp.f32 %v397_v20  ;;  %v399_v29 = vadd.f32 1.0, %v1521_v35 }
  0x83   :  { %v1525_v12 = vpop.eup %1524  ;;  %1550 = vrcp.f32 %v398_v18  ;;  %v400_v62 = vadd.f32 1.0, %v1523_v42 }
  0x84   :  { %v1527_v30 = vpop.eup %1526  ;;  %1552 = vrcp.f32 %v399_v29  ;;  %v401_v45 = vadd.f32 1.0, %v1525_v12 }
  0x85   :  { %v1529_v61 = vpop.eup %1528  ;;  %v578_v3 = vmul.f32 %v1527_v30, %v1916_v48  ;;  %1554 = vrcp.f32 %v400_v62 }
  0x86   :  { %v1531_v41 = vpop.eup %1530  ;;  %v579_v27 = vmul.f32 %v1529_v61, %v1940_v25  ;;  %1556 = vrcp.f32 %v401_v45 }
  0x87   :  { %v1533_v33 = vpop.eup %1532  ;;  %v580_v13 = vmul.f32 %v1531_v41, %v1948_v17 }
  0x88   :  { %v1535_v7 = vpop.eup %1534  ;;  %v1234_v28 = vpack.c.bf16 %v579_v27, %v578_v3  ;;  %v581_v53 = vmul.f32 %v1533_v33, %v1959_v0 }
  0x89   :  { %v1537_v21 = vpop.eup %1536  ;;  %v582_v36 = vmul.f32 %v1535_v7, %v1979_v59 }
  0x8a   :  { %v1539_v15 = vpop.eup %1538  ;;  %1294 = vst [vmem:[%s2218_s2 + $0xc0] sm:$0xff] %v1234_v28   ;;  %v1239_v48 = vpack.c.bf16 %v581_v53, %v580_v13  ;;  %v583_v14 = vmul.f32 %v1537_v21, %v1987_v16 }
  0x8b   :  { %v1541_v25 = vpop.eup %1540  ;;  %v584_v37 = vmul.f32 %v1539_v15, %v1995_v38 }
  0x8c   :  { %v1543_v31 = vpop.eup %1542  ;;  %1295 = vst [vmem:[%s2218_s2 + $0xc8] sm:$0xff] %v1239_v48   ;;  %v1244_v17 = vpack.c.bf16 %v583_v14, %v582_v36  ;;  %v585_v0 = vmul.f32 %v1541_v25, %v2010_v1 }
  0x8d   :  { %v1545_v59 = vpop.eup %1544  ;;  %v586_v55 = vmul.f32 %v1543_v31, %v2017_v24 }
  0x8e   :  { %v1547_v57 = vpop.eup %1546  ;;  %1296 = vst [vmem:[%s2218_s2 + $0xd0] sm:$0xff] %v1244_v17   ;;  %v1249_v16 = vpack.c.bf16 %v585_v0, %v584_v37  ;;  %v587_v2 = vmul.f32 %v1545_v59, %v2023_v11 }
  0x8f   :  { %v1549_v38 = vpop.eup %1548  ;;  %v588_v34 = vmul.f32 %v1547_v57, %v2038_v51 }
  0x90   :  { %v1551_v63 = vpop.eup %1550  ;;  %1297 = vst [vmem:[%s2218_s2 + $0xd8] sm:$0xff] %v1249_v16   ;;  %v1254_v1 = vpack.c.bf16 %v587_v2, %v586_v55  ;;  %v589_v47 = vmul.f32 %v1549_v38, %v2044_v32 }
  0x91   :  { %v1553_v24 = vpop.eup %1552  ;;  %v590_v19 = vmul.f32 %v1551_v63, %v2047_v43 }
  0x92   :  { %v1555_v6 = vpop.eup %1554  ;;  %1298 = vst [vmem:[%s2218_s2 + $0xe0] sm:$0xff] %v1254_v1   ;;  %v1259_v11 = vpack.c.bf16 %v589_v47, %v588_v34  ;;  %v591_v10 = vmul.f32 %v1553_v24, %v2053_v8 }
  0x93   :  { %v1557_v51 = vpop.eup %1556  ;;  %v592_v4 = vmul.f32 %v1555_v6, %v2059_v23 }
  0x94   :  { %1299 = vst [vmem:[%s2218_s2 + $0xe8] sm:$0xff] %v1259_v11   ;;  %v1264_v26 = vpack.c.bf16 %v591_v10, %v590_v19  ;;  %v593_v32 = vmul.f32 %v1557_v51, %v2062_v44 }
  0x96   :  { %1300 = vst [vmem:[%s2218_s2 + $0xf0] sm:$0xff] %v1264_v26   ;;  %v1269_v43 = vpack.c.bf16 %v593_v32, %v592_v4 }
  0x98   :  { %1301 = vst [vmem:[%s2218_s2 + $0xf8] sm:$0xff] %v1269_v43  }

// kernel: _lambda_.11
= control target key start
LH: loop header
LB: loop body
LE: loop exit
PB: predicated region body
PF: predicated region fallthrough
CT: control target
= control target key end

     0   :  { %s2842_s0 = inlined_call_operand.vmem [shape: f32[512,128], index: 0, kind: input, shape index: {}]   ;;  %s2843_s1 = inlined_call_operand.vmem [shape: f32[1,128], index: 1, kind: input, shape index: {}]   ;;  %s2844_s2 = inlined_call_operand.vmem [shape: bf16[512,128], index: 2, kind: input, shape index: {}]   ;;  %s2845_s3 = inlined_call_operand.vmem [shape: bf16[512,128], index: 3, kind: output, shape index: {}]  }
   0x1   :  { %v14_v0 = vld [vmem:[%s2842_s0] sm:$0xff]  ;;  %v15_v1 = vld [vmem:[%s2842_s0 + $0x8] sm:$0xff]  ;;  %v16_v5 = vld [vmem:[%s2842_s0 + $0x10] sm:$0xff] }
   0x2   :  { %v1942_v2 = vld [vmem:[%s2843_s1] ss:$0 sm:$0xff]  ;;  %v17_v6 = vld [vmem:[%s2842_s0 + $0x18] sm:$0xff]  ;;  %v19_v10 = vld [vmem:[%s2842_s0 + $0x28] sm:$0xff] }
   0x3   :  { %v1945_v3 = vadd.f32 %v1942_v2, %v14_v0  ;;  %v1948_v4 = vadd.f32 %v1942_v2, %v15_v1  ;;  %v1957_v7 = vadd.f32 %v1942_v2, %v16_v5  ;;  %v1960_v8 = vadd.f32 %v1942_v2, %v17_v6  ;;  %v18_v9 = vld [vmem:[%s2842_s0 + $0x20] sm:$0xff]  ;;  %v20_v13 = vld [vmem:[%s2842_s0 + $0x30] sm:$0xff]  ;;  %v21_v18 = vld [vmem:[%s2842_s0 + $0x38] sm:$0xff] }
   0x4   :  { %v1976_v16 = vadd.f32 %v1942_v2, %v18_v9  ;;  %v1979_v17 = vadd.f32 %v1942_v2, %v19_v10  ;;  %v1985_v19 = vadd.f32 %v1942_v2, %v20_v13  ;;  %v22_v20 = vld [vmem:[%s2842_s0 + $0x40] sm:$0xff]  ;;  %v23_v21 = vld [vmem:[%s2842_s0 + $0x48] sm:$0xff]  ;;  %v1996_v24 = vadd.f32 %v1942_v2, %v21_v18  ;;  %v24_v25 = vld [vmem:[%s2842_s0 + $0x50] sm:$0xff] }
   0x5   :  { %v1114_v11 = vmul.f32 -1.442695, %v1945_v3  ;;  %v1115_v12 = vmul.f32 -1.442695, %v1948_v4  ;;  %v1116_v14 = vmul.f32 -1.442695, %v1957_v7  ;;  %v2007_v29 = vadd.f32 %v1942_v2, %v22_v20 }
   0x6   :  { %v1117_v15 = vmul.f32 -1.442695, %v1960_v8  ;;  %v1118_v22 = vmul.f32 -1.442695, %v1976_v16  ;;  %v1119_v23 = vmul.f32 -1.442695, %v1979_v17  ;;  %v2010_v30 = vadd.f32 %v1942_v2, %v23_v21 }
   0x7   :  { %1656 = vpow2.f32 %v1114_v11  ;;  %v1120_v26 = vmul.f32 -1.442695, %v1985_v19  ;;  %v25_v27 = vld [vmem:[%s2842_s0 + $0x58] sm:$0xff]  ;;  %v1121_v28 = vmul.f32 -1.442695, %v1996_v24  ;;  %v2013_v31 = vadd.f32 %v1942_v2, %v24_v25  ;;  %v26_v32 = vld [vmem:[%s2842_s0 + $0x60] sm:$0xff] }
   0x8   :  { %1658 = vpow2.f32 %v1115_v12  ;;  %v27_v33 = vld [vmem:[%s2842_s0 + $0x68] sm:$0xff]  ;;  %v1122_v34 = vmul.f32 -1.442695, %v2007_v29  ;;  %v1123_v35 = vmul.f32 -1.442695, %v2010_v30  ;;  %v2024_v36 = vadd.f32 %v1942_v2, %v25_v27  ;;  %v28_v37 = vld [vmem:[%s2842_s0 + $0x70] sm:$0xff] }
   0x9   :  { %1660 = vpow2.f32 %v1116_v14  ;;  %v1124_v38 = vmul.f32 -1.442695, %v2013_v31  ;;  %v29_v39 = vld [vmem:[%s2842_s0 + $0x78] sm:$0xff]  ;;  %v2036_v40 = vld [vmem:[%s2844_s2] sm:$0xff]   ;;  %v2040_v42 = vadd.f32 %v1942_v2, %v26_v32  ;;  %v2043_v43 = vadd.f32 %v1942_v2, %v27_v33  ;;  %v2048_v44 = vld [vmem:[%s2844_s2 + $0x8] sm:$0xff]  }
   0xa   :  { %1662 = vpow2.f32 %v1117_v15  ;;  %v1125_v41 = vmul.f32 -1.442695, %v2024_v36  ;;  %v2051_v45 = vadd.f32 %v1942_v2, %v28_v37  ;;  %v2056_v46 = vld [vmem:[%s2844_s2 + $0x10] sm:$0xff]   ;;  %v2061_v49 = vadd.f32 %v1942_v2, %v29_v39  ;;  %v2067_v51 = vld [vmem:[%s2844_s2 + $0x18] sm:$0xff]   ;;  %v2072_v52 = vld [vmem:[%s2844_s2 + $0x20] sm:$0xff]  }
   0xb   :  { %1664 = vpow2.f32 %v1118_v22  ;;  %v1126_v47 = vmul.f32 -1.442695, %v2040_v42  ;;  %v1127_v48 = vmul.f32 -1.442695, %v2043_v43  ;;  %v1308_v50 = vunpack.c.l.bf16 %v2036_v40  ;;  %v2080_v56 = vld [vmem:[%s2844_s2 + $0x28] sm:$0xff]   ;;  %v2089_v61 = vld [vmem:[%s2844_s2 + $0x30] sm:$0xff]  }
   0xc   :  { %1666 = vpow2.f32 %v1119_v23  ;;  %v1128_v53 = vmul.f32 -1.442695, %v2051_v45  ;;  %v1309_v54 = vunpack.c.h.bf16 %v2036_v40  ;;  %v1129_v57 = vmul.f32 -1.442695, %v2061_v49  ;;  %v30_v5 = vld [vmem:[%s2842_s0 + $0x80] sm:$0xff]  ;;  %v2102_v12 = vld [vmem:[%s2844_s2 + $0x38] sm:$0xff]  }
   0xd   :  { %1668 = vpow2.f32 %v1120_v26  ;;  %v31_v13 = vld [vmem:[%s2842_s0 + $0x88] sm:$0xff]  ;;  %v32_v21 = vld [vmem:[%s2842_s0 + $0x90] sm:$0xff]  ;;  %v2114_v26 = vadd.f32 %v1942_v2, %v30_v5  ;;  %v2119_v27 = vld [vmem:[%s2844_s2 + $0x40] sm:$0xff]  }
   0xe   :  { %1670 = vpow2.f32 %v1121_v28  ;;  %v33_v28 = vld [vmem:[%s2842_s0 + $0x98] sm:$0xff]  ;;  %v35_v5 = vld [vmem:[%s2842_s0 + $0xa8] sm:$0xff] }
   0xf   :  { %1672 = vpow2.f32 %v1122_v34 }
  0x10   :  { %1674 = vpow2.f32 %v1123_v35  ;;  %v2126_v35 = vadd.f32 %v1942_v2, %v31_v13  ;;  %v2143_v13 = vmul.f32 -1.442695, %v2114_v26 }
  0x11   :  { %1676 = vpow2.f32 %v1124_v38 }
  0x12   :  { %1678 = vpow2.f32 %v1125_v41  ;;  %v2130_v41 = vadd.f32 %v1942_v2, %v32_v21 }
  0x13   :  { %1680 = vpow2.f32 %v1126_v47  ;;  %v34_v47 = vld [vmem:[%s2842_s0 + $0xa0] sm:$0xff] }
  0x14   :  { %v1657_v62 = vpop.eup %1656  ;;  %1682 = vpow2.f32 %v1127_v48 }
  0x15   :  { %v1659_v6 = vpop.eup %1658  ;;  %v341_v9 = vadd.f32 1.0, %v1657_v62  ;;  %1684 = vpow2.f32 %v1128_v53  ;;  %v2137_v62 = vadd.f32 %v1942_v2, %v33_v28  ;;  %v2155_v28 = vadd.f32 %v1942_v2, %v34_v47 }
  0x16   :  { %v1661_v14 = vpop.eup %1660  ;;  %v342_v15 = vadd.f32 1.0, %v1659_v6  ;;  %1686 = vpow2.f32 %v1129_v57 }
  0x17   :  { %v1663_v22 = vpop.eup %1662  ;;  %1688 = vrcp.f32 %v341_v9  ;;  %v343_v23 = vadd.f32 1.0, %v1661_v14  ;;  %v2170_v14 = vmul.f32 -1.442695, %v2137_v62  ;;  %v1134_v20 = vmul.f32 -1.442695, %v2155_v28 }
  0x18   :  { %v1665_v32 = vpop.eup %1664  ;;  %1690 = vrcp.f32 %v342_v15  ;;  %v344_v33 = vadd.f32 1.0, %v1663_v22  ;;  %v2149_v15 = vld [vmem:[%s2844_s2 + $0x48] sm:$0xff]  }
  0x19   :  { %v1667_v37 = vpop.eup %1666  ;;  %1692 = vrcp.f32 %v343_v23  ;;  %v345_v38 = vadd.f32 1.0, %v1665_v32  ;;  %v2152_v23 = vmul.f32 -1.442695, %v2126_v35  ;;  %v36_v32 = vld [vmem:[%s2842_s0 + $0xb0] sm:$0xff] }
  0x1a   :  { %v1669_v48 = vpop.eup %1668  ;;  %1694 = vrcp.f32 %v344_v33  ;;  %v346_v53 = vadd.f32 1.0, %v1667_v37  ;;  %v2178_v34 = vadd.f32 %v1942_v2, %v36_v32  ;;  %v41_v32 = vld [vmem:[%s2842_s0 + $0xd8] sm:$0xff] }
  0x1b   :  { %v1671_v6 = vpop.eup %1670  ;;  %1696 = vrcp.f32 %v345_v38  ;;  %v347_v9 = vadd.f32 1.0, %v1669_v48  ;;  %v2161_v38 = vmul.f32 -1.442695, %v2130_v41  ;;  %v2164_v48 = vadd.f32 %v1942_v2, %v35_v5 }
  0x1c   :  { %v1673_v21 = vpop.eup %1672  ;;  %1698 = vrcp.f32 %v346_v53  ;;  %v348_v22 = vadd.f32 1.0, %v1671_v6  ;;  %v37_v53 = vld [vmem:[%s2842_s0 + $0xb8] sm:$0xff]  ;;  %v1136_v0 = vmul.f32 -1.442695, %v2178_v34  ;;  %v2211_v63 = vadd.f32 %v1942_v2, %v41_v32 }
  0x1d   :  { %v1675_v33 = vpop.eup %1674  ;;  %1700 = vrcp.f32 %v347_v9  ;;  %v349_v37 = vadd.f32 1.0, %v1673_v21  ;;  %v38_v9 = vld [vmem:[%s2842_s0 + $0xc0] sm:$0xff]  ;;  %v1135_v18 = vmul.f32 -1.442695, %v2164_v48 }
  0x1e   :  { %v1677_v6 = vpop.eup %1676  ;;  %1702 = vrcp.f32 %v348_v22  ;;  %v350_v47 = vadd.f32 1.0, %v1675_v33  ;;  %v39_v22 = vld [vmem:[%s2842_s0 + $0xc8] sm:$0xff]  ;;  %v40_v33 = vld [vmem:[%s2842_s0 + $0xd0] sm:$0xff]  ;;  %v2195_v11 = vadd.f32 %v1942_v2, %v38_v9 }
  0x1f   :  { %v1679_v21 = vpop.eup %1678  ;;  %1704 = vrcp.f32 %v349_v37  ;;  %v351_v5 = vadd.f32 1.0, %v1677_v6  ;;  %v2188_v37 = vadd.f32 %v1942_v2, %v37_v53  ;;  %v2201_v10 = vadd.f32 %v1942_v2, %v39_v22 }
  0x20   :  { %v1681_v57 = vpop.eup %1680  ;;  %1706 = vrcp.f32 %v350_v47  ;;  %v352_v25 = vadd.f32 1.0, %v1679_v21  ;;  %v42_v47 = vld [vmem:[%s2842_s0 + $0xe0] sm:$0xff]  ;;  %v2204_v1 = vadd.f32 %v1942_v2, %v40_v33 }
  0x21   :  { %v1683_v6 = vpop.eup %1682  ;;  %1708 = vrcp.f32 %v351_v5  ;;  %v353_v39 = vadd.f32 1.0, %v1681_v57  ;;  %v43_v57 = vld [vmem:[%s2842_s0 + $0xe8] sm:$0xff]  ;;  %v1137_v22 = vmul.f32 -1.442695, %v2188_v37  ;;  %v2215_v33 = vadd.f32 %v1942_v2, %v42_v47 }
  0x22   :  { %v1685_v21 = vpop.eup %1684  ;;  %1710 = vrcp.f32 %v352_v25  ;;  %v354_v53 = vadd.f32 1.0, %v1683_v6 }
  0x23   :  { %v1687_v5 = vpop.eup %1686  ;;  %1712 = vrcp.f32 %v353_v39  ;;  %v355_v9 = vadd.f32 1.0, %v1685_v21  ;;  %v1138_v39 = vmul.f32 -1.442695, %v2195_v11  ;;  %v2220_v21 = vadd.f32 %v1942_v2, %v43_v57 }
  0x24   :  { %v1689_v25 = vpop.eup %1688  ;;  %1714 = vrcp.f32 %v354_v53  ;;  %v356_v6 = vadd.f32 1.0, %v1687_v5  ;;  %v1139_v53 = vmul.f32 -1.442695, %v2201_v10  ;;  %v1140_v5 = vmul.f32 -1.442695, %v2204_v1 }
  0x25   :  { %v1691_v60 = vpop.eup %1690  ;;  %v533_v59 = vmul.f32 %v1689_v25, %v1945_v3  ;;  %1716 = vrcp.f32 %v355_v9  ;;  %v2230_v9 = vmul.f32 -1.442695, %v2211_v63  ;;  %v1142_v25 = vmul.f32 -1.442695, %v2215_v33 }
  0x26   :  { %v1693_v58 = vpop.eup %1692  ;;  %v534_v32 = vmul.f32 %v1691_v60, %v1948_v4  ;;  %1718 = vrcp.f32 %v356_v6  ;;  %v1143_v40 = vmul.f32 -1.442695, %v2220_v21 }
  0x27   :  { %v1695_v55 = vpop.eup %1694  ;;  %v725_v47 = vadd.f32 %v1308_v50, %v533_v59  ;;  %v535_v3 = vmul.f32 %v1693_v58, %v1957_v7  ;;  %1720 = vpow2.f32 %v2143_v13  ;;  %v44_v50 = vld [vmem:[%s2842_s0 + $0xf0] sm:$0xff]  ;;  %v2846_v58 = vunpack.c.l.bf16 %v2048_v44 }
  0x28   :  { %v1697_v57 = vpop.eup %1696  ;;  %v726_v4 = vadd.f32 %v1309_v54, %v534_v32  ;;  %v536_v60 = vmul.f32 %v1695_v55, %v1960_v8  ;;  %1722 = vpow2.f32 %v2152_v23  ;;  %v2847_v55 = vunpack.c.h.bf16 %v2048_v44  ;;  %v45_v32 = vld [vmem:[%s2842_s0 + $0xf8] sm:$0xff] }
  0x29   :  { %v1699_v7 = vpop.eup %1698  ;;  %v727_v59 = vadd.f32 %v2846_v58, %v535_v3  ;;  %v537_v13 = vmul.f32 %v1697_v57, %v1976_v16  ;;  %1724 = vpow2.f32 %v2161_v38  ;;  %v2848_v16 = vunpack.c.l.bf16 %v2056_v46 }
  0x2a   :  { %v1701_v54 = vpop.eup %1700  ;;  %v1437_v8 = vpack.c.bf16 %v726_v4, %v725_v47  ;;  %v728_v23 = vadd.f32 %v2847_v55, %v536_v60  ;;  %v538_v6 = vmul.f32 %v1699_v7, %v1979_v17  ;;  %1726 = vpow2.f32 %v2170_v14 }
  0x2b   :  { %v1703_v3 = vpop.eup %1702  ;;  %v729_v57 = vadd.f32 %v2848_v16, %v537_v13  ;;  %v539_v38 = vmul.f32 %v1701_v54, %v1985_v19  ;;  %1728 = vpow2.f32 %v1134_v20  ;;  %v2256_v47 = vadd.f32 %v1942_v2, %v44_v50 }
  0x2c   :  { %v1705_v44 = vpop.eup %1704  ;;  %1438 = vst [vmem:[%s2845_s3] sm:$0xff] %v1437_v8   ;;  %v1442_v17 = vpack.c.bf16 %v728_v23, %v727_v59  ;;  %v2849_v14 = vunpack.c.h.bf16 %v2056_v46  ;;  %v540_v60 = vmul.f32 %v1703_v3, %v1996_v24  ;;  %1730 = vpow2.f32 %v1135_v18 }
  0x2d   :  { %v1707_v7 = vpop.eup %1706  ;;  %v2850_v58 = vunpack.c.l.bf16 %v2067_v51  ;;  %v541_v20 = vmul.f32 %v1705_v44, %v2007_v29  ;;  %1732 = vpow2.f32 %v1136_v0  ;;  %v2268_v50 = vadd.f32 %v1942_v2, %v45_v32 }
  0x2e   :  { %v730_v4 = vadd.f32 %v2849_v14, %v538_v6  ;;  %v1709_v13 = vpop.eup %1708  ;;  %1625 = vst [vmem:[%s2845_s3 + $0x8] sm:$0xff] %v1442_v17   ;;  %v2851_v59 = vunpack.c.h.bf16 %v2067_v51  ;;  %v542_v18 = vmul.f32 %v1707_v7, %v2010_v30  ;;  %1734 = vpow2.f32 %v1137_v22  ;;  %v2289_v22 = vld [vmem:[%s2844_s2 + $0x50] sm:$0xff]  }
  0x2f   :  { %v731_v19 = vadd.f32 %v2850_v58, %v539_v38  ;;  %v1711_v54 = vpop.eup %1710  ;;  %v2852_v8 = vunpack.c.l.bf16 %v2072_v52  ;;  %v543_v0 = vmul.f32 %v1709_v13, %v2013_v31  ;;  %1736 = vpow2.f32 %v1138_v39  ;;  %v2315_v58 = vld [vmem:[%s2844_s2 + $0x58] sm:$0xff]  }
  0x30   :  { %v1447_v46 = vpack.c.bf16 %v730_v4, %v729_v57  ;;  %v732_v24 = vadd.f32 %v2851_v59, %v540_v60  ;;  %v1144_v55 = vmul.f32 -1.442695, %v2256_v47  ;;  %v1713_v23 = vpop.eup %1712  ;;  %v2853_v51 = vunpack.c.h.bf16 %v2072_v52 }
  0x31   :  { %v733_v29 = vadd.f32 %v2852_v8, %v541_v20  ;;  %v544_v30 = vmul.f32 %v1711_v54, %v2024_v36  ;;  %1738 = vpow2.f32 %v1139_v53  ;;  %v1715_v31 = vpop.eup %1714  ;;  %v2854_v39 = vunpack.c.l.bf16 %v2080_v56 }
  0x32   :  { %1626 = vst [vmem:[%s2845_s3 + $0x10] sm:$0xff] %v1447_v46   ;;  %v1452_v6 = vpack.c.bf16 %v732_v24, %v731_v19  ;;  %v734_v32 = vadd.f32 %v2853_v51, %v542_v18  ;;  %v545_v16 = vmul.f32 %v1713_v23, %v2040_v42  ;;  %1740 = vpow2.f32 %v1140_v5  ;;  %v1717_v38 = vpop.eup %1716  ;;  %v2333_v18 = vld [vmem:[%s2844_s2 + $0x68] sm:$0xff]  }
  0x33   :  { %v735_v3 = vadd.f32 %v2854_v39, %v543_v0  ;;  %v1145_v57 = vmul.f32 -1.442695, %v2268_v50  ;;  %v2855_v52 = vunpack.c.h.bf16 %v2080_v56  ;;  %v546_v53 = vmul.f32 %v1715_v31, %v2043_v43  ;;  %v1719_v17 = vpop.eup %1718 }
  0x34   :  { %1627 = vst [vmem:[%s2845_s3 + $0x18] sm:$0xff] %v1452_v6   ;;  %v1457_v36 = vpack.c.bf16 %v734_v32, %v733_v29  ;;  %1742 = vpow2.f32 %v2230_v9  ;;  %v2856_v14 = vunpack.c.l.bf16 %v2089_v61  ;;  %v547_v5 = vmul.f32 %v1717_v38, %v2051_v45  ;;  %v1721_v60 = vpop.eup %1720  ;;  %v49_v38 = vld [vmem:[%s2842_s0 + $0x118] sm:$0xff]  ;;  %v59_v32 = vld [vmem:[%s2842_s0 + $0x168] sm:$0xff] }
  0x35   :  { %v736_v44 = vadd.f32 %v2855_v52, %v544_v30  ;;  %v1348_v4 = vunpack.c.l.bf16 %v2289_v22  ;;  %1744 = vpow2.f32 %v1142_v25  ;;  %v2857_v7 = vunpack.c.h.bf16 %v2089_v61  ;;  %v1723_v45 = vpop.eup %1722  ;;  %v2323_v61 = vld [vmem:[%s2844_s2 + $0x60] sm:$0xff]   ;;  %v2350_v30 = vld [vmem:[%s2844_s2 + $0x70] sm:$0xff]  }
  0x36   :  { %v737_v42 = vadd.f32 %v2856_v14, %v545_v16  ;;  %1628 = vst [vmem:[%s2845_s3 + $0x20] sm:$0xff] %v1457_v36   ;;  %v548_v9 = vmul.f32 %v1719_v17, %v2061_v49  ;;  %1746 = vpow2.f32 %v1143_v40  ;;  %v2858_v25 = vunpack.c.l.bf16 %v2102_v12  ;;  %v1725_v49 = vpop.eup %1724 }
  0x37   :  { %v1462_v56 = vpack.c.bf16 %v736_v44, %v735_v3  ;;  %v738_v43 = vadd.f32 %v2857_v7, %v546_v53  ;;  %v357_v20 = vadd.f32 1.0, %v1721_v60  ;;  %v1349_v13 = vunpack.c.h.bf16 %v2289_v22  ;;  %v1727_v54 = vpop.eup %1726  ;;  %v2366_v44 = vld [vmem:[%s2844_s2 + $0x78] sm:$0xff]  }
  0x38   :  { %v739_v19 = vadd.f32 %v2858_v25, %v547_v5  ;;  %1748 = vpow2.f32 %v1144_v55  ;;  %v2859_v40 = vunpack.c.h.bf16 %v2102_v12  ;;  %v358_v24 = vadd.f32 1.0, %v1723_v45  ;;  %v46_v55 = vld [vmem:[%s2842_s0 + $0x100] sm:$0xff]  ;;  %v47_v12 = vld [vmem:[%s2842_s0 + $0x108] sm:$0xff]  ;;  %v1729_v23 = vpop.eup %1728 }
  0x39   :  { %1629 = vst [vmem:[%s2845_s3 + $0x28] sm:$0xff] %v1462_v56   ;;  %v1467_v46 = vpack.c.bf16 %v738_v43, %v737_v42  ;;  %1750 = vpow2.f32 %v1145_v57  ;;  %v359_v8 = vadd.f32 1.0, %v1725_v49  ;;  %v1352_v29 = vunpack.c.l.bf16 %v2315_v58  ;;  %v1731_v31 = vpop.eup %1730  ;;  %v48_v57 = vld [vmem:[%s2842_s0 + $0x110] sm:$0xff]  ;;  %v50_v45 = vld [vmem:[%s2842_s0 + $0x120] sm:$0xff]  ;;  %v51_v25 = vld [vmem:[%s2842_s0 + $0x128] sm:$0xff] }
  0x3a   :  { %v740_v59 = vadd.f32 %v2859_v40, %v548_v9  ;;  %1752 = vrcp.f32 %v357_v20  ;;  %v360_v51 = vadd.f32 1.0, %v1727_v54  ;;  %v361_v39 = vadd.f32 1.0, %v1729_v23  ;;  %v1733_v36 = vpop.eup %1732  ;;  %v52_v40 = vld [vmem:[%s2842_s0 + $0x130] sm:$0xff] }
  0x3b   :  { %1630 = vst [vmem:[%s2845_s3 + $0x30] sm:$0xff] %v1467_v46   ;;  %1754 = vrcp.f32 %v358_v24  ;;  %v362_v52 = vadd.f32 1.0, %v1731_v31  ;;  %v2369_v53 = vadd.f32 %v1942_v2, %v46_v55  ;;  %v2372_v17 = vadd.f32 %v1942_v2, %v47_v12  ;;  %v1735_v14 = vpop.eup %1734  ;;  %v53_v55 = vld [vmem:[%s2842_s0 + $0x138] sm:$0xff]  ;;  %v54_v31 = vld [vmem:[%s2842_s0 + $0x140] sm:$0xff] }
  0x3c   :  { %v1472_v6 = vpack.c.bf16 %v740_v59, %v739_v19  ;;  %1756 = vrcp.f32 %v359_v8  ;;  %v363_v42 = vadd.f32 1.0, %v1733_v36  ;;  %v1737_v56 = vpop.eup %1736  ;;  %v364_v7 = vadd.f32 1.0, %v1735_v14 }
  0x3d   :  { %1758 = vrcp.f32 %v360_v51  ;;  %v2377_v43 = vadd.f32 %v1942_v2, %v48_v57  ;;  %v2380_v9 = vadd.f32 %v1942_v2, %v49_v38  ;;  %v365_v20 = vadd.f32 1.0, %v1737_v56 }
  0x3e   :  { %1631 = vst [vmem:[%s2845_s3 + $0x38] sm:$0xff] %v1472_v6   ;;  %1760 = vrcp.f32 %v361_v39  ;;  %v1739_v19 = vpop.eup %1738  ;;  %v1146_v54 = vmul.f32 -1.442695, %v2369_v53  ;;  %v1147_v8 = vmul.f32 -1.442695, %v2372_v17  ;;  %v2399_v6 = vadd.f32 %v1942_v2, %v50_v45  ;;  %v55_v39 = vld [vmem:[%s2842_s0 + $0x148] sm:$0xff] }
  0x3f   :  { %1762 = vrcp.f32 %v362_v52  ;;  %v1741_v59 = vpop.eup %1740  ;;  %v366_v24 = vadd.f32 1.0, %v1739_v19  ;;  %v2402_v51 = vadd.f32 %v1942_v2, %v51_v25  ;;  %v1148_v36 = vmul.f32 -1.442695, %v2377_v43  ;;  %v56_v45 = vld [vmem:[%s2842_s0 + $0x150] sm:$0xff]  ;;  %v57_v25 = vld [vmem:[%s2842_s0 + $0x158] sm:$0xff] }
  0x40   :  { %1764 = vrcp.f32 %v363_v42  ;;  %v367_v23 = vadd.f32 1.0, %v1741_v59  ;;  %v1149_v52 = vmul.f32 -1.442695, %v2380_v9  ;;  %v2413_v56 = vadd.f32 %v1942_v2, %v52_v40 }
  0x41   :  { %1766 = vrcp.f32 %v364_v7  ;;  %v1743_v12 = vpop.eup %1742  ;;  %v2416_v7 = vadd.f32 %v1942_v2, %v53_v55  ;;  %v2425_v59 = vadd.f32 %v1942_v2, %v54_v31  ;;  %v2428_v40 = vadd.f32 %v1942_v2, %v55_v39 }
  0x42   :  { %1768 = vrcp.f32 %v365_v20  ;;  %v1745_v57 = vpop.eup %1744  ;;  %v368_v38 = vadd.f32 1.0, %v1743_v12  ;;  %v1150_v12 = vmul.f32 -1.442695, %v2399_v6  ;;  %v2433_v49 = vadd.f32 %v1942_v2, %v56_v45 }
  0x43   :  { %1770 = vrcp.f32 %v366_v24  ;;  %v1747_v14 = vpop.eup %1746  ;;  %v369_v42 = vadd.f32 1.0, %v1745_v57  ;;  %v1155_v45 = vmul.f32 -1.442695, %v2428_v40  ;;  %v2864_v22 = vunpack.c.h.bf16 %v2315_v58 }
  0x44   :  { %1772 = vrcp.f32 %v367_v23  ;;  %v370_v20 = vadd.f32 1.0, %v1747_v14  ;;  %v1151_v23 = vmul.f32 -1.442695, %v2402_v51  ;;  %v1152_v14 = vmul.f32 -1.442695, %v2413_v56 }
  0x45   :  { %v1749_v19 = vpop.eup %1748  ;;  %1774 = vrcp.f32 %v368_v38  ;;  %v2436_v38 = vadd.f32 %v1942_v2, %v57_v25  ;;  %v58_v25 = vld [vmem:[%s2842_s0 + $0x160] sm:$0xff]  ;;  %v1156_v5 = vmul.f32 -1.442695, %v2433_v49  ;;  %v2866_v58 = vunpack.c.h.bf16 %v2323_v61 }
  0x46   :  { %v1751_v24 = vpop.eup %1750  ;;  %1776 = vrcp.f32 %v369_v42  ;;  %v371_v55 = vadd.f32 1.0, %v1749_v19  ;;  %v1153_v42 = vmul.f32 -1.442695, %v2416_v7 }
  0x47   :  { %v1753_v57 = vpop.eup %1752  ;;  %1778 = vrcp.f32 %v370_v20  ;;  %v372_v46 = vadd.f32 1.0, %v1751_v24  ;;  %v1154_v20 = vmul.f32 -1.442695, %v2425_v59  ;;  %v1157_v3 = vmul.f32 -1.442695, %v2436_v38 }
  0x48   :  { %v1755_v31 = vpop.eup %1754  ;;  %v549_v39 = vmul.f32 %v1753_v57, %v2114_v26  ;;  %1780 = vrcp.f32 %v371_v55  ;;  %v2860_v26 = vunpack.c.l.bf16 %v2119_v27 }
  0x49   :  { %v1757_v19 = vpop.eup %1756  ;;  %v550_v60 = vmul.f32 %v1755_v31, %v2126_v35  ;;  %1782 = vrcp.f32 %v372_v46  ;;  %v2861_v35 = vunpack.c.h.bf16 %v2119_v27 }
  0x4a   :  { %v1759_v24 = vpop.eup %1758  ;;  %v741_v55 = vadd.f32 %v2860_v26, %v549_v39  ;;  %v551_v57 = vmul.f32 %v1757_v19, %v2130_v41  ;;  %1784 = vpow2.f32 %v1146_v54  ;;  %v2862_v39 = vunpack.c.l.bf16 %v2149_v15 }
  0x4b   :  { %v1761_v16 = vpop.eup %1760  ;;  %v742_v46 = vadd.f32 %v2861_v35, %v550_v60  ;;  %v552_v31 = vmul.f32 %v1759_v24, %v2137_v62  ;;  %1786 = vpow2.f32 %v1147_v8  ;;  %v2462_v19 = vadd.f32 %v1942_v2, %v58_v25 }
  0x4c   :  { %v1763_v0 = vpop.eup %1762  ;;  %v743_v41 = vadd.f32 %v2862_v39, %v551_v57  ;;  %v553_v54 = vmul.f32 %v1761_v16, %v2155_v28  ;;  %1788 = vpow2.f32 %v1148_v36  ;;  %v2863_v62 = vunpack.c.h.bf16 %v2149_v15 }
  0x4d   :  { %v1765_v27 = vpop.eup %1764  ;;  %v1477_v60 = vpack.c.bf16 %v742_v46, %v741_v55  ;;  %v554_v24 = vmul.f32 %v1763_v0, %v2164_v48  ;;  %1790 = vpow2.f32 %v1149_v52  ;;  %v2471_v28 = vadd.f32 %v1942_v2, %v59_v32 }
  0x4e   :  { %v744_v8 = vadd.f32 %v2863_v62, %v552_v31  ;;  %v1767_v26 = vpop.eup %1766  ;;  %v745_v35 = vadd.f32 %v1348_v4, %v553_v54  ;;  %v555_v57 = vmul.f32 %v1765_v27, %v2178_v34  ;;  %1792 = vpow2.f32 %v1150_v12  ;;  %v2517_v62 = vld [vmem:[%s2844_s2 + $0x88] sm:$0xff]  }
  0x4f   :  { %v1769_v16 = vpop.eup %1768  ;;  %1632 = vst [vmem:[%s2845_s3 + $0x40] sm:$0xff] %v1477_v60   ;;  %v746_v48 = vadd.f32 %v1349_v13, %v554_v24  ;;  %v556_v0 = vmul.f32 %v1767_v26, %v2188_v37  ;;  %1794 = vpow2.f32 %v1151_v23  ;;  %v1158_v32 = vmul.f32 -1.442695, %v2462_v19 }
  0x50   :  { %v1482_v15 = vpack.c.bf16 %v744_v8, %v743_v41  ;;  %v1771_v36 = vpop.eup %1770  ;;  %v747_v34 = vadd.f32 %v1352_v29, %v555_v57  ;;  %v557_v4 = vmul.f32 %v1769_v16, %v2195_v11  ;;  %1796 = vpow2.f32 %v1152_v14  ;;  %v2532_v16 = vld [vmem:[%s2844_s2 + $0x90] sm:$0xff]  }
  0x51   :  { %v1773_v52 = vpop.eup %1772  ;;  %v1487_v12 = vpack.c.bf16 %v746_v48, %v745_v35  ;;  %v748_v13 = vadd.f32 %v2864_v22, %v556_v0  ;;  %v558_v37 = vmul.f32 %v1771_v36, %v2201_v10  ;;  %1798 = vpow2.f32 %v1153_v42  ;;  %v2502_v42 = vld [vmem:[%s2844_s2 + $0x80] sm:$0xff]  }
  0x52   :  { %1633 = vst [vmem:[%s2845_s3 + $0x48] sm:$0xff] %v1482_v15   ;;  %v1775_v23 = vpop.eup %1774  ;;  %v2865_v29 = vunpack.c.l.bf16 %v2323_v61  ;;  %v559_v11 = vmul.f32 %v1773_v52, %v2204_v1  ;;  %1800 = vpow2.f32 %v1154_v20  ;;  %v1159_v14 = vmul.f32 -1.442695, %v2471_v28 }
  0x53   :  { %v1777_v55 = vpop.eup %1776  ;;  %1634 = vst [vmem:[%s2845_s3 + $0x50] sm:$0xff] %v1487_v12   ;;  %v1492_v46 = vpack.c.bf16 %v748_v13, %v747_v34  ;;  %v750_v31 = vadd.f32 %v2866_v58, %v558_v37  ;;  %v560_v10 = vmul.f32 %v1775_v23, %v2211_v63  ;;  %1802 = vpow2.f32 %v1155_v45  ;;  %v60_v12 = vld [vmem:[%s2842_s0 + $0x170] sm:$0xff]  ;;  %v2567_v58 = vld [vmem:[%s2844_s2 + $0xa8] sm:$0xff]  }
  0x54   :  { %v749_v25 = vadd.f32 %v2865_v29, %v557_v4  ;;  %v1779_v1 = vpop.eup %1778  ;;  %v2867_v20 = vunpack.c.l.bf16 %v2333_v18  ;;  %v561_v41 = vmul.f32 %v1777_v55, %v2215_v33  ;;  %v1369_v54 = vunpack.c.h.bf16 %v2366_v44  ;;  %v2555_v29 = vld [vmem:[%s2844_s2 + $0xa0] sm:$0xff]  }
  0x55   :  { %1804 = vpow2.f32 %v1156_v5  ;;  %v1781_v27 = vpop.eup %1780  ;;  %1635 = vst [vmem:[%s2845_s3 + $0x58] sm:$0xff] %v1492_v46   ;;  %v2868_v61 = vunpack.c.h.bf16 %v2333_v18  ;;  %v562_v45 = vmul.f32 %v1779_v1, %v2220_v21  ;;  %v2869_v5 = vunpack.c.l.bf16 %v2350_v30 }
  0x56   :  { %v751_v39 = vadd.f32 %v2867_v20, %v559_v11  ;;  %v1497_v63 = vpack.c.bf16 %v750_v31, %v749_v25  ;;  %1806 = vpow2.f32 %v1157_v3  ;;  %v1783_v33 = vpop.eup %1782  ;;  %v563_v24 = vmul.f32 %v1781_v27, %v2256_v47  ;;  %v61_v25 = vld [vmem:[%s2842_s0 + $0x178] sm:$0xff]  ;;  %v2573_v20 = vld [vmem:[%s2844_s2 + $0xb0] sm:$0xff]  }
  0x57   :  { %v752_v60 = vadd.f32 %v2868_v61, %v560_v10  ;;  %v753_v8 = vadd.f32 %v2869_v5, %v561_v41  ;;  %v1372_v26 = vunpack.c.l.bf16 %v2502_v42  ;;  %1808 = vpow2.f32 %v1158_v32  ;;  %v1785_v35 = vpop.eup %1784  ;;  %v62_v61 = vld [vmem:[%s2842_s0 + $0x180] sm:$0xff] }
  0x58   :  { %1636 = vst [vmem:[%s2845_s3 + $0x60] sm:$0xff] %v1497_v63   ;;  %v2870_v18 = vunpack.c.h.bf16 %v2350_v30  ;;  %v564_v3 = vmul.f32 %v1783_v33, %v2268_v50  ;;  %1810 = vpow2.f32 %v1159_v14  ;;  %v1787_v47 = vpop.eup %1786  ;;  %v2871_v15 = vunpack.c.l.bf16 %v2366_v44  ;;  %v2541_v30 = vld [vmem:[%s2844_s2 + $0x98] sm:$0xff]  }
  0x59   :  { %v1502_v21 = vpack.c.bf16 %v752_v60, %v751_v39  ;;  %v373_v0 = vadd.f32 1.0, %v1785_v35  ;;  %v1373_v36 = vunpack.c.h.bf16 %v2502_v42  ;;  %v1376_v34 = vunpack.c.l.bf16 %v2517_v62  ;;  %v1789_v50 = vpop.eup %1788 }
  0x5a   :  { %v754_v57 = vadd.f32 %v2870_v18, %v562_v45  ;;  %v755_v48 = vadd.f32 %v2871_v15, %v563_v24  ;;  %v756_v32 = vadd.f32 %v1369_v54, %v564_v3  ;;  %v374_v52 = vadd.f32 1.0, %v1787_v47  ;;  %v1791_v22 = vpop.eup %1790  ;;  %v64_v18 = vld [vmem:[%s2842_s0 + $0x190] sm:$0xff] }
  0x5b   :  { %1637 = vst [vmem:[%s2845_s3 + $0x68] sm:$0xff] %v1502_v21   ;;  %v1377_v44 = vunpack.c.h.bf16 %v2517_v62  ;;  %1812 = vrcp.f32 %v373_v0  ;;  %v375_v13 = vadd.f32 1.0, %v1789_v50  ;;  %v1380_v37 = vunpack.c.l.bf16 %v2532_v16  ;;  %v1793_v11 = vpop.eup %1792  ;;  %v66_v50 = vld [vmem:[%s2842_s0 + $0x1a0] sm:$0xff] }
  0x5c   :  { %v1507_v4 = vpack.c.bf16 %v754_v57, %v753_v8  ;;  %v1381_v23 = vunpack.c.h.bf16 %v2532_v16  ;;  %v1512_v14 = vpack.c.bf16 %v756_v32, %v755_v48  ;;  %1814 = vrcp.f32 %v374_v52  ;;  %v1795_v31 = vpop.eup %1794  ;;  %v63_v8 = vld [vmem:[%s2842_s0 + $0x188] sm:$0xff]  ;;  %v65_v57 = vld [vmem:[%s2842_s0 + $0x198] sm:$0xff]  ;;  %v2605_v48 = vld [vmem:[%s2843_s1] ss:$0 sm:$0xff] }
  0x5d   :  { %v376_v55 = vadd.f32 1.0, %v1791_v22  ;;  %v1384_v46 = vunpack.c.l.bf16 %v2541_v30  ;;  %1816 = vrcp.f32 %v375_v13  ;;  %v377_v10 = vadd.f32 1.0, %v1793_v11  ;;  %v1797_v41 = vpop.eup %1796  ;;  %v68_v13 = vld [vmem:[%s2842_s0 + $0x1b0] sm:$0xff] }
  0x5e   :  { %1638 = vst [vmem:[%s2845_s3 + $0x70] sm:$0xff] %v1507_v4   ;;  %v1385_v1 = vunpack.c.h.bf16 %v2541_v30  ;;  %v2576_v39 = vadd.f32 %v1942_v2, %v60_v12  ;;  %1639 = vst [vmem:[%s2845_s3 + $0x78] sm:$0xff] %v1512_v14   ;;  %v378_v54 = vadd.f32 1.0, %v1795_v31  ;;  %v2583_v63 = vadd.f32 %v1942_v2, %v61_v25  ;;  %v1799_v60 = vpop.eup %1798  ;;  %v67_v4 = vld [vmem:[%s2842_s0 + $0x1a8] sm:$0xff]  ;;  %v69_v31 = vld [vmem:[%s2842_s0 + $0x1b8] sm:$0xff] }
  0x5f   :  { %1818 = vrcp.f32 %v376_v55  ;;  %v379_v45 = vadd.f32 1.0, %v1797_v41  ;;  %v1801_v24 = vpop.eup %1800  ;;  %v380_v35 = vadd.f32 1.0, %v1799_v60  ;;  %v2608_v0 = vadd.f32 %v2605_v48, %v62_v61  ;;  %v70_v60 = vld [vmem:[%s2842_s0 + $0x1c0] sm:$0xff] }
  0x60   :  { %1820 = vrcp.f32 %v377_v10  ;;  %v1803_v3 = vpop.eup %1802  ;;  %v381_v47 = vadd.f32 1.0, %v1801_v24  ;;  %v1160_v15 = vmul.f32 -1.442695, %v2576_v39  ;;  %v1161_v12 = vmul.f32 -1.442695, %v2583_v63 }
  0x61   :  { %1822 = vrcp.f32 %v378_v54  ;;  %v382_v52 = vadd.f32 1.0, %v1803_v3  ;;  %v2618_v22 = vadd.f32 %v2605_v48, %v63_v8  ;;  %v2624_v14 = vadd.f32 %v2605_v48, %v64_v18  ;;  %v71_v18 = vld [vmem:[%s2842_s0 + $0x1c8] sm:$0xff] }
  0x62   :  { %1824 = vrcp.f32 %v379_v45  ;;  %v1805_v32 = vpop.eup %1804  ;;  %v2627_v55 = vadd.f32 %v2605_v48, %v65_v57  ;;  %v2633_v54 = vadd.f32 %v2605_v48, %v66_v50  ;;  %v2636_v61 = vadd.f32 %v2605_v48, %v67_v4  ;;  %v72_v50 = vld [vmem:[%s2842_s0 + $0x1d0] sm:$0xff] }
  0x63   :  { %1826 = vrcp.f32 %v380_v35  ;;  %v1807_v25 = vpop.eup %1806  ;;  %v383_v11 = vadd.f32 1.0, %v1805_v32  ;;  %v1162_v24 = vmul.f32 -1.442695, %v2608_v0  ;;  %v2643_v35 = vadd.f32 %v2605_v48, %v68_v13 }
  0x64   :  { %1828 = vrcp.f32 %v381_v47  ;;  %v1809_v10 = vpop.eup %1808  ;;  %v384_v41 = vadd.f32 1.0, %v1807_v25  ;;  %v1163_v3 = vmul.f32 -1.442695, %v2618_v22  ;;  %v2650_v47 = vadd.f32 %v2605_v48, %v69_v31 }
  0x65   :  { %1830 = vrcp.f32 %v382_v52  ;;  %v1811_v45 = vpop.eup %1810  ;;  %v385_v8 = vadd.f32 1.0, %v1809_v10  ;;  %v1164_v4 = vmul.f32 -1.442695, %v2624_v14  ;;  %v1165_v32 = vmul.f32 -1.442695, %v2627_v55  ;;  %v73_v10 = vld [vmem:[%s2842_s0 + $0x1d8] sm:$0xff] }
  0x66   :  { %1832 = vrcp.f32 %v383_v11  ;;  %v386_v57 = vadd.f32 1.0, %v1811_v45  ;;  %v2658_v52 = vadd.f32 %v2605_v48, %v70_v60  ;;  %v1166_v25 = vmul.f32 -1.442695, %v2633_v54 }
  0x67   :  { %1834 = vrcp.f32 %v384_v41  ;;  %v1167_v11 = vmul.f32 -1.442695, %v2636_v61  ;;  %v2663_v31 = vadd.f32 %v2605_v48, %v71_v18  ;;  %v1168_v60 = vmul.f32 -1.442695, %v2643_v35 }
  0x68   :  { %1836 = vrcp.f32 %v385_v8  ;;  %v1813_v13 = vpop.eup %1812  ;;  %v2671_v8 = vadd.f32 %v2605_v48, %v72_v50  ;;  %v1169_v18 = vmul.f32 -1.442695, %v2650_v47  ;;  %v1170_v2 = vmul.f32 -1.442695, %v2658_v52 }
  0x69   :  { %1838 = vrcp.f32 %v386_v57  ;;  %v1815_v41 = vpop.eup %1814  ;;  %v565_v45 = vmul.f32 %v1813_v13, %v2369_v53  ;;  %v2873_v30 = vunpack.c.h.bf16 %v2555_v29 }
  0x6a   :  { %1840 = vpow2.f32 %v1160_v15  ;;  %v1817_v57 = vpop.eup %1816  ;;  %v566_v21 = vmul.f32 %v1815_v41, %v2372_v17  ;;  %v2680_v15 = vadd.f32 %v2605_v48, %v73_v10 }
  0x6b   :  { %1842 = vpow2.f32 %v1161_v12  ;;  %v757_v33 = vadd.f32 %v1372_v26, %v565_v45  ;;  %v567_v53 = vmul.f32 %v1817_v57, %v2377_v43  ;;  %v1171_v12 = vmul.f32 -1.442695, %v2663_v31 }
  0x6c   :  { %v1819_v5 = vpop.eup %1818  ;;  %1844 = vpow2.f32 %v1162_v24  ;;  %v758_v13 = vadd.f32 %v1373_v36, %v566_v21  ;;  %v1172_v43 = vmul.f32 -1.442695, %v2671_v8  ;;  %v1173_v21 = vmul.f32 -1.442695, %v2680_v15 }
  0x6d   :  { %v1821_v50 = vpop.eup %1820  ;;  %v568_v17 = vmul.f32 %v1819_v5, %v2380_v9  ;;  %1846 = vpow2.f32 %v1163_v3  ;;  %v759_v27 = vadd.f32 %v1376_v34, %v567_v53  ;;  %v74_v9 = vld [vmem:[%s2842_s0 + $0x1e0] sm:$0xff] }
  0x6e   :  { %v1823_v41 = vpop.eup %1822  ;;  %v569_v26 = vmul.f32 %v1821_v50, %v2399_v6  ;;  %1848 = vpow2.f32 %v1164_v4  ;;  %v1517_v10 = vpack.c.bf16 %v758_v13, %v757_v33  ;;  %v2710_v4 = vadd.f32 %v2605_v48, %v74_v9 }
  0x6f   :  { %v1825_v24 = vpop.eup %1824  ;;  %v760_v42 = vadd.f32 %v1377_v44, %v568_v17  ;;  %v570_v36 = vmul.f32 %v1823_v41, %v2402_v51  ;;  %1850 = vpow2.f32 %v1165_v32  ;;  %v2876_v41 = vunpack.c.l.bf16 %v2573_v20 }
  0x70   :  { %v1827_v5 = vpop.eup %1826  ;;  %v761_v34 = vadd.f32 %v1380_v37, %v569_v26  ;;  %v571_v6 = vmul.f32 %v1825_v24, %v2413_v56  ;;  %1852 = vpow2.f32 %v1166_v25  ;;  %1640 = vst [vmem:[%s2845_s3 + $0x80] sm:$0xff] %v1517_v10  }
  0x71   :  { %v1829_v33 = vpop.eup %1828  ;;  %v1522_v51 = vpack.c.bf16 %v760_v42, %v759_v27  ;;  %v762_v62 = vadd.f32 %v1381_v23, %v570_v36  ;;  %v572_v44 = vmul.f32 %v1827_v5, %v2416_v7  ;;  %1854 = vpow2.f32 %v1167_v11 }
  0x72   :  { %v1831_v3 = vpop.eup %1830  ;;  %v763_v37 = vadd.f32 %v1384_v46, %v571_v6  ;;  %v573_v56 = vmul.f32 %v1829_v33, %v2425_v59  ;;  %1856 = vpow2.f32 %v1168_v60  ;;  %v2872_v46 = vunpack.c.l.bf16 %v2555_v29  ;;  %v75_v33 = vld [vmem:[%s2842_s0 + $0x1e8] sm:$0xff] }
  0x73   :  { %v1833_v32 = vpop.eup %1832  ;;  %1641 = vst [vmem:[%s2845_s3 + $0x88] sm:$0xff] %v1522_v51   ;;  %v1527_v16 = vpack.c.bf16 %v762_v62, %v761_v34  ;;  %v764_v7 = vadd.f32 %v1385_v1, %v572_v44  ;;  %v574_v23 = vmul.f32 %v1831_v3, %v2428_v40  ;;  %1858 = vpow2.f32 %v1169_v18 }
  0x74   :  { %v1835_v27 = vpop.eup %1834  ;;  %v765_v59 = vadd.f32 %v2872_v46, %v573_v56  ;;  %v575_v25 = vmul.f32 %v1833_v32, %v2433_v49  ;;  %v1397_v11 = vunpack.c.h.bf16 %v2573_v20  ;;  %1860 = vpow2.f32 %v1170_v2 }
  0x75   :  { %v1837_v45 = vpop.eup %1836  ;;  %1642 = vst [vmem:[%s2845_s3 + $0x90] sm:$0xff] %v1527_v16   ;;  %v1532_v60 = vpack.c.bf16 %v764_v7, %v763_v37  ;;  %v766_v1 = vadd.f32 %v2873_v30, %v574_v23  ;;  %v576_v40 = vmul.f32 %v1835_v27, %v2436_v38  ;;  %1862 = vpow2.f32 %v1171_v12  ;;  %v76_v37 = vld [vmem:[%s2842_s0 + $0x1f0] sm:$0xff]  ;;  %v77_v7 = vld [vmem:[%s2842_s0 + $0x1f8] sm:$0xff] }
  0x76   :  { %v1839_v57 = vpop.eup %1838  ;;  %v2874_v18 = vunpack.c.l.bf16 %v2567_v58  ;;  %v577_v49 = vmul.f32 %v1837_v45, %v2462_v19  ;;  %1864 = vpow2.f32 %v1172_v43  ;;  %v1174_v2 = vmul.f32 -1.442695, %v2710_v4  ;;  %v1616_v45 = vld [vmem:[%s2844_s2 + $0xb8] sm:$0xff]  }
  0x77   :  { %v1841_v50 = vpop.eup %1840  ;;  %1643 = vst [vmem:[%s2845_s3 + $0x98] sm:$0xff] %v1532_v60   ;;  %v1537_v13 = vpack.c.bf16 %v766_v1, %v765_v59  ;;  %v2875_v29 = vunpack.c.h.bf16 %v2567_v58  ;;  %v578_v38 = vmul.f32 %v1839_v57, %v2471_v28  ;;  %1866 = vpow2.f32 %v1173_v21 }
  0x78   :  { %v767_v53 = vadd.f32 %v2874_v18, %v575_v25  ;;  %v1843_v12 = vpop.eup %1842  ;;  %v769_v26 = vadd.f32 %v2876_v41, %v577_v49  ;;  %v387_v19 = vadd.f32 1.0, %v1841_v50  ;;  %1868 = vpow2.f32 %v1174_v2 }
  0x79   :  { %v768_v17 = vadd.f32 %v2875_v29, %v576_v40  ;;  %v1845_v43 = vpop.eup %1844  ;;  %1644 = vst [vmem:[%s2845_s3 + $0xa0] sm:$0xff] %v1537_v13   ;;  %v770_v10 = vadd.f32 %v1397_v11, %v578_v38  ;;  %v388_v42 = vadd.f32 1.0, %v1843_v12  ;;  %v2756_v16 = vadd.f32 %v2605_v48, %v75_v33 }
  0x7a   :  { %v1847_v36 = vpop.eup %1846  ;;  %1870 = vrcp.f32 %v387_v19  ;;  %v389_v58 = vadd.f32 1.0, %v1845_v43  ;;  %v2762_v25 = vadd.f32 %v2605_v48, %v76_v37  ;;  %v2768_v30 = vadd.f32 %v2605_v48, %v77_v7 }
  0x7b   :  { %v1542_v24 = vpack.c.bf16 %v768_v17, %v767_v53  ;;  %v1849_v9 = vpop.eup %1848  ;;  %v1547_v28 = vpack.c.bf16 %v770_v10, %v769_v26  ;;  %1872 = vrcp.f32 %v388_v42  ;;  %v390_v20 = vadd.f32 1.0, %v1847_v36  ;;  %v1617_v53 = vld [vmem:[%s2844_s2 + $0xc0] sm:$0xff]   ;;  %v1618_v17 = vld [vmem:[%s2844_s2 + $0xc8] sm:$0xff]   ;;  %v1619_v10 = vld [vmem:[%s2844_s2 + $0xd0] sm:$0xff]  }
  0x7c   :  { %v1851_v5 = vpop.eup %1850  ;;  %1874 = vrcp.f32 %v389_v58  ;;  %v391_v34 = vadd.f32 1.0, %v1849_v9  ;;  %v1175_v57 = vmul.f32 -1.442695, %v2756_v16  ;;  %v1400_v2 = vunpack.c.l.bf16 %v1616_v45 }
  0x7d   :  { %1645 = vst [vmem:[%s2845_s3 + $0xa8] sm:$0xff] %v1542_v24   ;;  %v1853_v6 = vpop.eup %1852  ;;  %1646 = vst [vmem:[%s2845_s3 + $0xb0] sm:$0xff] %v1547_v28   ;;  %1876 = vrcp.f32 %v390_v20  ;;  %v392_v21 = vadd.f32 1.0, %v1851_v5  ;;  %v1176_v13 = vmul.f32 -1.442695, %v2762_v25  ;;  %v1401_v48 = vunpack.c.h.bf16 %v1616_v45 }
  0x7e   :  { %v1855_v51 = vpop.eup %1854  ;;  %1878 = vrcp.f32 %v391_v34  ;;  %v393_v62 = vadd.f32 1.0, %v1853_v6  ;;  %v1177_v38 = vmul.f32 -1.442695, %v2768_v30  ;;  %v1404_v26 = vunpack.c.l.bf16 %v1617_v53 }
  0x7f   :  { %v1857_v44 = vpop.eup %1856  ;;  %1880 = vrcp.f32 %v392_v21  ;;  %v394_v3 = vadd.f32 1.0, %v1855_v51  ;;  %v1405_v24 = vunpack.c.h.bf16 %v1617_v53  ;;  %v1408_v9 = vunpack.c.l.bf16 %v1618_v17 }
  0x80   :  { %v1859_v56 = vpop.eup %1858  ;;  %1882 = vrcp.f32 %v393_v62  ;;  %v395_v32 = vadd.f32 1.0, %v1857_v44  ;;  %v1409_v5 = vunpack.c.h.bf16 %v1618_v17  ;;  %v1412_v33 = vunpack.c.l.bf16 %v1619_v10 }
  0x81   :  { %v1861_v23 = vpop.eup %1860  ;;  %1884 = vrcp.f32 %v394_v3  ;;  %v396_v27 = vadd.f32 1.0, %v1859_v56  ;;  %v1413_v3 = vunpack.c.h.bf16 %v1619_v10 }
  0x82   :  { %v1863_v46 = vpop.eup %1862  ;;  %1886 = vrcp.f32 %v395_v32  ;;  %v397_v59 = vadd.f32 1.0, %v1861_v23 }
  0x83   :  { %v1865_v11 = vpop.eup %1864  ;;  %1888 = vrcp.f32 %v396_v27  ;;  %v398_v60 = vadd.f32 1.0, %v1863_v46 }
  0x84   :  { %v1867_v1 = vpop.eup %1866  ;;  %1890 = vrcp.f32 %v397_v59  ;;  %v399_v40 = vadd.f32 1.0, %v1865_v11  ;;  %v1622_v59 = vld [vmem:[%s2844_s2 + $0xe8] sm:$0xff]  }
  0x85   :  { %v1869_v18 = vpop.eup %1868  ;;  %1892 = vrcp.f32 %v398_v60  ;;  %v400_v49 = vadd.f32 1.0, %v1867_v1 }
  0x86   :  { %1894 = vrcp.f32 %v399_v40  ;;  %v401_v50 = vadd.f32 1.0, %v1869_v18 }
  0x87   :  { %v1871_v29 = vpop.eup %1870  ;;  %1896 = vrcp.f32 %v400_v49 }
  0x88   :  { %v1873_v12 = vpop.eup %1872  ;;  %v579_v41 = vmul.f32 %v1871_v29, %v2576_v39  ;;  %1898 = vpow2.f32 %v1175_v57 }
  0x89   :  { %v1875_v19 = vpop.eup %1874  ;;  %v580_v43 = vmul.f32 %v1873_v12, %v2583_v63  ;;  %1900 = vrcp.f32 %v401_v50  ;;  %v1620_v63 = vld [vmem:[%s2844_s2 + $0xd8] sm:$0xff]   ;;  %v1424_v50 = vunpack.c.l.bf16 %v1622_v59 }
  0x8a   :  { %v1877_v42 = vpop.eup %1876  ;;  %v771_v36 = vadd.f32 %v1400_v2, %v579_v41  ;;  %v581_v58 = vmul.f32 %v1875_v19, %v2608_v0  ;;  %1902 = vpow2.f32 %v1176_v13  ;;  %v1416_v7 = vunpack.c.l.bf16 %v1620_v63 }
  0x8b   :  { %v1879_v28 = vpop.eup %1878  ;;  %v772_v20 = vadd.f32 %v1401_v48, %v580_v43  ;;  %v582_v39 = vmul.f32 %v1877_v42, %v2618_v22  ;;  %1904 = vpow2.f32 %v1177_v38  ;;  %v1621_v22 = vld [vmem:[%s2844_s2 + $0xe0] sm:$0xff]  }
  0x8c   :  { %v1881_v34 = vpop.eup %1880  ;;  %v773_v6 = vadd.f32 %v1404_v26, %v581_v58  ;;  %v583_v21 = vmul.f32 %v1879_v28, %v2624_v14 }
  0x8d   :  { %v1883_v51 = vpop.eup %1882  ;;  %v1552_v62 = vpack.c.bf16 %v772_v20, %v771_v36  ;;  %v774_v0 = vadd.f32 %v1405_v24, %v582_v39  ;;  %v584_v44 = vmul.f32 %v1881_v34, %v2627_v55  ;;  %v1417_v55 = vunpack.c.h.bf16 %v1620_v63 }
  0x8e   :  { %v1885_v37 = vpop.eup %1884  ;;  %v775_v56 = vadd.f32 %v1408_v9, %v583_v21  ;;  %v585_v32 = vmul.f32 %v1883_v51, %v2633_v54  ;;  %v1420_v54 = vunpack.c.l.bf16 %v1621_v22 }
  0x8f   :  { %v1887_v23 = vpop.eup %1886  ;;  %1647 = vst [vmem:[%s2845_s3 + $0xb8] sm:$0xff] %v1552_v62   ;;  %v1557_v14 = vpack.c.bf16 %v774_v0, %v773_v6  ;;  %v776_v27 = vadd.f32 %v1409_v5, %v584_v44  ;;  %v586_v46 = vmul.f32 %v1885_v37, %v2636_v61  ;;  %v1421_v61 = vunpack.c.h.bf16 %v1621_v22 }
  0x90   :  { %v1889_v11 = vpop.eup %1888  ;;  %v777_v45 = vadd.f32 %v1412_v33, %v585_v32  ;;  %v587_v60 = vmul.f32 %v1887_v23, %v2643_v35  ;;  %v1623_v35 = vld [vmem:[%s2844_s2 + $0xf0] sm:$0xff]  }
  0x91   :  { %v1891_v1 = vpop.eup %1890  ;;  %1648 = vst [vmem:[%s2845_s3 + $0xc0] sm:$0xff] %v1557_v14   ;;  %v1562_v40 = vpack.c.bf16 %v776_v27, %v775_v56  ;;  %v778_v57 = vadd.f32 %v1413_v3, %v586_v46  ;;  %v588_v18 = vmul.f32 %v1889_v11, %v2650_v47  ;;  %v1425_v47 = vunpack.c.h.bf16 %v1622_v59 }
  0x92   :  { %v1893_v53 = vpop.eup %1892  ;;  %v779_v49 = vadd.f32 %v1416_v7, %v587_v60  ;;  %v589_v2 = vmul.f32 %v1891_v1, %v2658_v52  ;;  %v1428_v24 = vunpack.c.l.bf16 %v1623_v35  ;;  %v1429_v63 = vunpack.c.h.bf16 %v1623_v35 }
  0x93   :  { %v1895_v13 = vpop.eup %1894  ;;  %1649 = vst [vmem:[%s2845_s3 + $0xc8] sm:$0xff] %v1562_v40   ;;  %v1567_v29 = vpack.c.bf16 %v778_v57, %v777_v45  ;;  %v780_v48 = vadd.f32 %v1417_v55, %v588_v18  ;;  %v590_v17 = vmul.f32 %v1893_v53, %v2663_v31 }
  0x94   :  { %v1897_v38 = vpop.eup %1896  ;;  %v781_v12 = vadd.f32 %v1420_v54, %v589_v2  ;;  %v591_v41 = vmul.f32 %v1895_v13, %v2671_v8 }
  0x95   :  { %v1899_v52 = vpop.eup %1898  ;;  %1650 = vst [vmem:[%s2845_s3 + $0xd0] sm:$0xff] %v1567_v29   ;;  %v1572_v26 = vpack.c.bf16 %v780_v48, %v779_v49  ;;  %v782_v19 = vadd.f32 %v1421_v61, %v590_v17  ;;  %v592_v43 = vmul.f32 %v1897_v38, %v2680_v15 }
  0x96   :  { %v1901_v10 = vpop.eup %1900  ;;  %v783_v42 = vadd.f32 %v1424_v50, %v591_v41  ;;  %v402_v36 = vadd.f32 1.0, %v1899_v52 }
  0x97   :  { %v1903_v58 = vpop.eup %1902  ;;  %1651 = vst [vmem:[%s2845_s3 + $0xd8] sm:$0xff] %v1572_v26   ;;  %v1577_v31 = vpack.c.bf16 %v782_v19, %v781_v12  ;;  %v784_v8 = vadd.f32 %v1425_v47, %v592_v43  ;;  %v593_v9 = vmul.f32 %v1901_v10, %v2710_v4  ;;  %v1624_v4 = vld [vmem:[%s2844_s2 + $0xf8] sm:$0xff]  }
  0x98   :  { %v1905_v28 = vpop.eup %1904  ;;  %1906 = vrcp.f32 %v402_v36  ;;  %v403_v20 = vadd.f32 1.0, %v1903_v58  ;;  %v1432_v21 = vunpack.c.l.bf16 %v1624_v4  ;;  %v1433_v51 = vunpack.c.h.bf16 %v1624_v4 }
  0x99   :  { %1652 = vst [vmem:[%s2845_s3 + $0xe0] sm:$0xff] %v1577_v31   ;;  %v1582_v15 = vpack.c.bf16 %v784_v8, %v783_v42  ;;  %v785_v39 = vadd.f32 %v1428_v24, %v593_v9  ;;  %v404_v5 = vadd.f32 1.0, %v1905_v28 }
  0x9a   :  { %1908 = vrcp.f32 %v403_v20 }
  0x9b   :  { %1653 = vst [vmem:[%s2845_s3 + $0xe8] sm:$0xff] %v1582_v15   ;;  %1910 = vrcp.f32 %v404_v5 }
  0xa5   :  { %v1907_v34 = vpop.eup %1906 }
  0xa6   :  { %v594_v6 = vmul.f32 %v1907_v34, %v2756_v16 }
  0xa7   :  { %v1909_v33 = vpop.eup %1908 }
  0xa8   :  { %v1911_v62 = vpop.eup %1910  ;;  %v786_v0 = vadd.f32 %v1429_v63, %v594_v6  ;;  %v595_v44 = vmul.f32 %v1909_v33, %v2762_v25 }
  0xa9   :  { %v596_v3 = vmul.f32 %v1911_v62, %v2768_v30 }
  0xaa   :  { %v1587_v22 = vpack.c.bf16 %v786_v0, %v785_v39  ;;  %v787_v37 = vadd.f32 %v1432_v21, %v595_v44 }
  0xab   :  { %v788_v56 = vadd.f32 %v1433_v51, %v596_v3 }
  0xac   :  { %1654 = vst [vmem:[%s2845_s3 + $0xf0] sm:$0xff] %v1587_v22  }
  0xad   :  { %v1592_v32 = vpack.c.bf16 %v788_v56, %v787_v37 }
  0xaf   :  { %1655 = vst [vmem:[%s2845_s3 + $0xf8] sm:$0xff] %v1592_v32  }

// kernel: _lambda_.12
= control target key start
LH: loop header
LB: loop body
LE: loop exit
PB: predicated region body
PF: predicated region fallthrough
CT: control target
= control target key end

     0   :  { %s560_s0 = inlined_call_operand.vmem [shape: f32[128,128], index: 0, kind: input, shape index: {}]   ;;  %s561_s1 = inlined_call_operand.vmem [shape: f32[1,128], index: 1, kind: input, shape index: {}]   ;;  %s562_s2 = inlined_call_operand.vmem [shape: bf16[128,128], index: 2, kind: output, shape index: {}]  }
   0x1   :  { %v11_v0 = vld [vmem:[%s560_s0] sm:$0xff]  ;;  %v12_v1 = vld [vmem:[%s560_s0 + $0x8] sm:$0xff]  ;;  %v13_v5 = vld [vmem:[%s560_s0 + $0x10] sm:$0xff] }
   0x2   :  { %v246_v2 = vld [vmem:[%s561_s1] ss:$0 sm:$0xff]  ;;  %v14_v6 = vld [vmem:[%s560_s0 + $0x18] sm:$0xff]  ;;  %v16_v10 = vld [vmem:[%s560_s0 + $0x28] sm:$0xff] }
   0x3   :  { %v430_v3 = vadd.f32 %v246_v2, %v11_v0  ;;  %v432_v4 = vadd.f32 %v246_v2, %v12_v1  ;;  %v15_v7 = vld [vmem:[%s560_s0 + $0x20] sm:$0xff]  ;;  %v443_v8 = vadd.f32 %v246_v2, %v13_v5  ;;  %v445_v9 = vadd.f32 %v246_v2, %v14_v6  ;;  %v17_v12 = vld [vmem:[%s560_s0 + $0x30] sm:$0xff]  ;;  %v18_v13 = vld [vmem:[%s560_s0 + $0x38] sm:$0xff] }
   0x4   :  { %v450_v11 = vadd.f32 %v246_v2, %v15_v7  ;;  %v460_v16 = vadd.f32 %v246_v2, %v16_v10  ;;  %v462_v17 = vadd.f32 %v246_v2, %v17_v12  ;;  %v19_v18 = vld [vmem:[%s560_s0 + $0x40] sm:$0xff]  ;;  %v20_v19 = vld [vmem:[%s560_s0 + $0x48] sm:$0xff]  ;;  %v472_v22 = vadd.f32 %v246_v2, %v18_v13  ;;  %v21_v25 = vld [vmem:[%s560_s0 + $0x50] sm:$0xff] }
   0x5   :  { %v247_v14 = vmul.f32 -1.442695, %v430_v3  ;;  %v248_v15 = vmul.f32 -1.442695, %v432_v4  ;;  %v249_v20 = vmul.f32 -1.442695, %v443_v8  ;;  %v475_v24 = vadd.f32 %v246_v2, %v19_v18 }
   0x6   :  { %v250_v21 = vmul.f32 -1.442695, %v445_v9  ;;  %v251_v23 = vmul.f32 -1.442695, %v450_v11  ;;  %v22_v26 = vld [vmem:[%s560_s0 + $0x58] sm:$0xff]  ;;  %v484_v28 = vadd.f32 %v246_v2, %v20_v19  ;;  %v23_v29 = vld [vmem:[%s560_s0 + $0x60] sm:$0xff]  ;;  %v490_v31 = vadd.f32 %v246_v2, %v21_v25 }
   0x7   :  { %342 = vpow2.f32 %v247_v14  ;;  %v252_v27 = vmul.f32 -1.442695, %v460_v16  ;;  %v253_v30 = vmul.f32 -1.442695, %v462_v17  ;;  %v24_v32 = vld [vmem:[%s560_s0 + $0x68] sm:$0xff]  ;;  %v496_v34 = vadd.f32 %v246_v2, %v22_v26  ;;  %v25_v35 = vld [vmem:[%s560_s0 + $0x70] sm:$0xff] }
   0x8   :  { %344 = vpow2.f32 %v248_v15  ;;  %v254_v33 = vmul.f32 -1.442695, %v472_v22  ;;  %v255_v36 = vmul.f32 -1.442695, %v475_v24  ;;  %v502_v37 = vadd.f32 %v246_v2, %v23_v29  ;;  %v26_v38 = vld [vmem:[%s560_s0 + $0x78] sm:$0xff] }
   0x9   :  { %346 = vpow2.f32 %v249_v20  ;;  %v256_v39 = vmul.f32 -1.442695, %v484_v28  ;;  %v508_v40 = vadd.f32 %v246_v2, %v24_v32  ;;  %v257_v41 = vmul.f32 -1.442695, %v490_v31 }
   0xa   :  { %348 = vpow2.f32 %v250_v21  ;;  %v511_v42 = vadd.f32 %v246_v2, %v25_v35  ;;  %v258_v43 = vmul.f32 -1.442695, %v496_v34  ;;  %v514_v44 = vadd.f32 %v246_v2, %v26_v38 }
   0xb   :  { %350 = vpow2.f32 %v251_v23  ;;  %v259_v45 = vmul.f32 -1.442695, %v502_v37  ;;  %v260_v46 = vmul.f32 -1.442695, %v508_v40 }
   0xc   :  { %352 = vpow2.f32 %v252_v27  ;;  %v261_v47 = vmul.f32 -1.442695, %v511_v42  ;;  %v262_v48 = vmul.f32 -1.442695, %v514_v44 }
   0xd   :  { %354 = vpow2.f32 %v253_v30 }
   0xe   :  { %356 = vpow2.f32 %v254_v33 }
   0xf   :  { %358 = vpow2.f32 %v255_v36 }
  0x10   :  { %360 = vpow2.f32 %v256_v39 }
  0x11   :  { %362 = vpow2.f32 %v257_v41 }
  0x12   :  { %364 = vpow2.f32 %v258_v43 }
  0x13   :  { %366 = vpow2.f32 %v259_v45 }
  0x14   :  { %v343_v49 = vpop.eup %342  ;;  %368 = vpow2.f32 %v260_v46 }
  0x15   :  { %v345_v50 = vpop.eup %344  ;;  %v98_v51 = vadd.f32 1.0, %v343_v49  ;;  %370 = vpow2.f32 %v261_v47 }
  0x16   :  { %v347_v52 = vpop.eup %346  ;;  %v99_v53 = vadd.f32 1.0, %v345_v50  ;;  %372 = vpow2.f32 %v262_v48 }
  0x17   :  { %v349_v54 = vpop.eup %348  ;;  %374 = vrcp.f32 %v98_v51  ;;  %v100_v55 = vadd.f32 1.0, %v347_v52 }
  0x18   :  { %v351_v56 = vpop.eup %350  ;;  %376 = vrcp.f32 %v99_v53  ;;  %v101_v57 = vadd.f32 1.0, %v349_v54 }
  0x19   :  { %v353_v58 = vpop.eup %352  ;;  %378 = vrcp.f32 %v100_v55  ;;  %v102_v59 = vadd.f32 1.0, %v351_v56 }
  0x1a   :  { %v355_v60 = vpop.eup %354  ;;  %380 = vrcp.f32 %v101_v57  ;;  %v103_v61 = vadd.f32 1.0, %v353_v58 }
  0x1b   :  { %v357_v62 = vpop.eup %356  ;;  %382 = vrcp.f32 %v102_v59  ;;  %v104_v63 = vadd.f32 1.0, %v355_v60 }
  0x1c   :  { %v359_v0 = vpop.eup %358  ;;  %384 = vrcp.f32 %v103_v61  ;;  %v105_v1 = vadd.f32 1.0, %v357_v62 }
  0x1d   :  { %v361_v2 = vpop.eup %360  ;;  %386 = vrcp.f32 %v104_v63  ;;  %v106_v5 = vadd.f32 1.0, %v359_v0 }
  0x1e   :  { %v363_v6 = vpop.eup %362  ;;  %388 = vrcp.f32 %v105_v1  ;;  %v107_v7 = vadd.f32 1.0, %v361_v2 }
  0x1f   :  { %v365_v10 = vpop.eup %364  ;;  %390 = vrcp.f32 %v106_v5  ;;  %v108_v12 = vadd.f32 1.0, %v363_v6 }
  0x20   :  { %v367_v13 = vpop.eup %366  ;;  %392 = vrcp.f32 %v107_v7  ;;  %v109_v14 = vadd.f32 1.0, %v365_v10 }
  0x21   :  { %v369_v15 = vpop.eup %368  ;;  %394 = vrcp.f32 %v108_v12  ;;  %v110_v18 = vadd.f32 1.0, %v367_v13 }
  0x22   :  { %v371_v19 = vpop.eup %370  ;;  %396 = vrcp.f32 %v109_v14  ;;  %v111_v20 = vadd.f32 1.0, %v369_v15 }
  0x23   :  { %v373_v21 = vpop.eup %372  ;;  %398 = vrcp.f32 %v110_v18  ;;  %v112_v23 = vadd.f32 1.0, %v371_v19 }
  0x24   :  { %v375_v25 = vpop.eup %374  ;;  %400 = vrcp.f32 %v111_v20  ;;  %v113_v26 = vadd.f32 1.0, %v373_v21 }
  0x25   :  { %v377_v27 = vpop.eup %376  ;;  %v146_v29 = vmul.f32 %v375_v25, %v430_v3  ;;  %402 = vrcp.f32 %v112_v23 }
  0x26   :  { %v379_v30 = vpop.eup %378  ;;  %v147_v32 = vmul.f32 %v377_v27, %v432_v4  ;;  %404 = vrcp.f32 %v113_v26 }
  0x27   :  { %v381_v33 = vpop.eup %380  ;;  %v148_v35 = vmul.f32 %v379_v30, %v443_v8 }
  0x28   :  { %v383_v36 = vpop.eup %382  ;;  %v298_v38 = vpack.c.bf16 %v147_v32, %v146_v29  ;;  %v149_v39 = vmul.f32 %v381_v33, %v445_v9 }
  0x29   :  { %v385_v41 = vpop.eup %384  ;;  %v150_v43 = vmul.f32 %v383_v36, %v450_v11 }
  0x2a   :  { %v387_v45 = vpop.eup %386  ;;  %299 = vst [vmem:[%s562_s2] sm:$0xff] %v298_v38   ;;  %v303_v3 = vpack.c.bf16 %v149_v39, %v148_v35  ;;  %v151_v46 = vmul.f32 %v385_v41, %v460_v16 }
  0x2b   :  { %v389_v4 = vpop.eup %388  ;;  %v152_v47 = vmul.f32 %v387_v45, %v462_v17 }
  0x2c   :  { %v391_v48 = vpop.eup %390  ;;  %335 = vst [vmem:[%s562_s2 + $0x8] sm:$0xff] %v303_v3   ;;  %v308_v8 = vpack.c.bf16 %v151_v46, %v150_v43  ;;  %v153_v9 = vmul.f32 %v389_v4, %v472_v22 }
  0x2d   :  { %v393_v11 = vpop.eup %392  ;;  %v154_v49 = vmul.f32 %v391_v48, %v475_v24 }
  0x2e   :  { %v395_v50 = vpop.eup %394  ;;  %336 = vst [vmem:[%s562_s2 + $0x10] sm:$0xff] %v308_v8   ;;  %v313_v16 = vpack.c.bf16 %v153_v9, %v152_v47  ;;  %v155_v51 = vmul.f32 %v393_v11, %v484_v28 }
  0x2f   :  { %v397_v17 = vpop.eup %396  ;;  %v156_v52 = vmul.f32 %v395_v50, %v490_v31 }
  0x30   :  { %v399_v53 = vpop.eup %398  ;;  %337 = vst [vmem:[%s562_s2 + $0x18] sm:$0xff] %v313_v16   ;;  %v318_v22 = vpack.c.bf16 %v155_v51, %v154_v49  ;;  %v157_v54 = vmul.f32 %v397_v17, %v496_v34 }
  0x31   :  { %v401_v24 = vpop.eup %400  ;;  %v158_v55 = vmul.f32 %v399_v53, %v502_v37 }
  0x32   :  { %v403_v56 = vpop.eup %402  ;;  %338 = vst [vmem:[%s562_s2 + $0x20] sm:$0xff] %v318_v22   ;;  %v323_v28 = vpack.c.bf16 %v157_v54, %v156_v52  ;;  %v159_v57 = vmul.f32 %v401_v24, %v508_v40 }
  0x33   :  { %v405_v31 = vpop.eup %404  ;;  %v160_v58 = vmul.f32 %v403_v56, %v511_v42 }
  0x34   :  { %339 = vst [vmem:[%s562_s2 + $0x28] sm:$0xff] %v323_v28   ;;  %v328_v59 = vpack.c.bf16 %v159_v57, %v158_v55  ;;  %v161_v34 = vmul.f32 %v405_v31, %v514_v44 }
  0x36   :  { %340 = vst [vmem:[%s562_s2 + $0x30] sm:$0xff] %v328_v59   ;;  %v333_v37 = vpack.c.bf16 %v161_v34, %v160_v58 }
  0x38   :  { %341 = vst [vmem:[%s562_s2 + $0x38] sm:$0xff] %v333_v37  }

// kernel: _lambda_.13
= control target key start
LH: loop header
LB: loop body
LE: loop exit
PB: predicated region body
PF: predicated region fallthrough
CT: control target
= control target key end

     0   :  { %s705_s1 = inlined_call_operand.vmem [shape: bf16[128,128], index: 1, kind: input, shape index: {}]   ;;  %s706_s0 = inlined_call_operand.vmem [shape: bf16[1,128,128], index: 0, kind: input, shape index: {}]   ;;  %s707_s2 = inlined_call_operand.vmem [shape: f32[1,128], index: 2, kind: input, shape index: {}]   ;;  %s708_s3 = inlined_call_operand.vmem [shape: bf16[1,128,128], index: 3, kind: output, shape index: {}]  }
   0x1   :  { %v594_v0 = vld [vmem:[%s705_s1 + $0x38] sm:$0xff]   ;;  %v595_v1 = vld [vmem:[%s705_s1 + $0x30] sm:$0xff]   ;;  %v596_v2 = vld [vmem:[%s705_s1 + $0x28] sm:$0xff]  }
   0x2   :  { %546 = vmatprep.subr.bf16.mxu0 %v594_v0  ;;  %578 = vmatprep.subr.bf16.mxu1 %v594_v0  ;;  %v597_v3 = vld [vmem:[%s705_s1 + $0x20] sm:$0xff]   ;;  %v598_v6 = vld [vmem:[%s705_s1 + $0x18] sm:$0xff]   ;;  %v599_v7 = vld [vmem:[%s705_s1 + $0x10] sm:$0xff]  }
   0x3   :  { %547 = vmatpush3.bf16.msra.mxu0 %v594_v0  ;;  %586 = vmatpush3.bf16.msra.mxu1 %v594_v0  ;;  %v602_v4 = vld [vmem:[%s706_s0] sm:$0xff]   ;;  %v600_v8 = vld [vmem:[%s705_s1 + $0x8] sm:$0xff]   ;;  %v606_v12 = vld [vmem:[%s706_s0 + $0x10] sm:$0xff]  }
   0x4   :  { %548 = vmatprep.subr.bf16.mxu0 %v595_v1  ;;  %579 = vmatprep.subr.bf16.mxu1 %v595_v1  ;;  %v603_v5 = vld [vmem:[%s706_s0 + $0x20] sm:$0xff]   ;;  %v604_v10 = vld [vmem:[%s706_s0 + $0x8] sm:$0xff]   ;;  %v607_v13 = vld [vmem:[%s706_s0 + $0x30] sm:$0xff]  }
   0x5   :  { %562 = vmatprep.mubr.bf16.mxu0 %v602_v4  ;;  %570 = vmatprep.mubr.bf16.mxu1 %v603_v5  ;;  %v601_v9 = vld [vmem:[%s705_s1] sm:$0xff]   ;;  %v605_v11 = vld [vmem:[%s706_s0 + $0x28] sm:$0xff]   ;;  %v608_v14 = vld [vmem:[%s706_s0 + $0x18] sm:$0xff]  }
   0x6   :  { %v609_v15 = vld [vmem:[%s706_s0 + $0x38] sm:$0xff]   ;;  %v450_v18 = vld [vmem:[%s707_s2] ss:$0 sm:$0xff] }
   0x7   :  { %549 = vmatpush3.bf16.msra.mxu0 %v595_v1  ;;  %587 = vmatpush3.bf16.msra.mxu1 %v595_v1 }
   0x8   :  { %550 = vmatprep.subr.bf16.mxu0 %v596_v2  ;;  %580 = vmatprep.subr.bf16.mxu1 %v596_v2 }
   0xb   :  { %551 = vmatpush3.bf16.msra.mxu0 %v596_v2  ;;  %588 = vmatpush3.bf16.msra.mxu1 %v596_v2 }
   0xc   :  { %552 = vmatprep.subr.bf16.mxu0 %v597_v3  ;;  %581 = vmatprep.subr.bf16.mxu1 %v597_v3 }
   0xf   :  { %553 = vmatpush3.bf16.msra.mxu0 %v597_v3  ;;  %589 = vmatpush3.bf16.msra.mxu1 %v597_v3 }
  0x10   :  { %554 = vmatprep.subr.bf16.mxu0 %v598_v6  ;;  %582 = vmatprep.subr.bf16.mxu1 %v598_v6 }
  0x13   :  { %555 = vmatpush3.bf16.msra.mxu0 %v598_v6  ;;  %590 = vmatpush3.bf16.msra.mxu1 %v598_v6 }
  0x14   :  { %556 = vmatprep.subr.bf16.mxu0 %v599_v7  ;;  %583 = vmatprep.subr.bf16.mxu1 %v599_v7 }
  0x17   :  { %557 = vmatpush3.bf16.msra.mxu0 %v599_v7  ;;  %591 = vmatpush3.bf16.msra.mxu1 %v599_v7 }
  0x18   :  { %558 = vmatprep.subr.bf16.mxu0 %v600_v8  ;;  %584 = vmatprep.subr.bf16.mxu1 %v600_v8 }
  0x1b   :  { %559 = vmatpush3.bf16.msra.mxu0 %v600_v8  ;;  %592 = vmatpush3.bf16.msra.mxu1 %v600_v8 }
  0x1c   :  { %560 = vmatprep.subr.bf16.mxu0 %v601_v9  ;;  %585 = vmatprep.subr.bf16.mxu1 %v601_v9 }
  0x1f   :  { %561 = vmatpush3.bf16.msra.mxu0 %v601_v9  ;;  %593 = vmatpush3.bf16.msra.mxu1 %v601_v9 }
  0x22   :  { %563 = vmatmul.mubr.bf16.vlgmr.msra.gmra.mxu0 %v604_v10  ;;  %571 = vmatmul.mubr.bf16.vlgmr.msra.gmra.mxu1 %v605_v11 }
  0x23   :  { %566 = vmatprep.mubr.bf16.mxu0 %v606_v12  ;;  %574 = vmatprep.mubr.bf16.mxu1 %v607_v13 }
  0x2a   :  { %567 = vmatmul.mubr.bf16.gmra.mxu0 %v608_v14  ;;  %575 = vmatmul.mubr.bf16.gmra.mxu1 %v609_v15 }
  0xe2   :  { %v564_v16 = vpop.f32.mrf.mxu0  ;;  %v572_v17 = vpop.f32.mrf.mxu1 }
  0xe3   :  { %v336_v23 = vadd.f32 %v564_v16, %v450_v18  ;;  %v344_v24 = vadd.f32 %v572_v17, %v450_v18 }
  0xe4   :  { %v213_v19 = vpop.f32.mrf.mxu0  ;;  %v245_v20 = vpop.f32.mrf.mxu1 }
  0xe5   :  { %v334_v27 = vadd.f32 %v450_v18, %v213_v19  ;;  %v342_v28 = vadd.f32 %v450_v18, %v245_v20 }
  0xe6   :  { %v565_v21 = vpop.f32.mrf.mxu0  ;;  %v573_v22 = vpop.f32.mrf.mxu1 }
  0xe7   :  { %v337_v25 = vadd.f32 %v565_v21, %v450_v18  ;;  %v345_v26 = vadd.f32 %v573_v22, %v450_v18 }
  0xe8   :  { %v216_v29 = vpop.f32.mrf.mxu0  ;;  %v248_v30 = vpop.f32.mrf.mxu1 }
  0xe9   :  { %v491_v31 = vpack.c.bf16 %v337_v25, %v336_v23  ;;  %v511_v32 = vpack.c.bf16 %v345_v26, %v344_v24  ;;  %v335_v33 = vadd.f32 %v450_v18, %v216_v29  ;;  %v343_v34 = vadd.f32 %v450_v18, %v248_v30 }
  0xea   :  { %v568_v35 = vpop.f32.mrf.mxu0  ;;  %v576_v36 = vpop.f32.mrf.mxu1 }
  0xeb   :  { %523 = vst [vmem:[%s708_s3 + $0x8] sm:$0xff] %v491_v31   ;;  %527 = vst [vmem:[%s708_s3 + $0x28] sm:$0xff] %v511_v32   ;;  %v486_v37 = vpack.c.bf16 %v335_v33, %v334_v27  ;;  %v506_v38 = vpack.c.bf16 %v343_v34, %v342_v28  ;;  %v340_v43 = vadd.f32 %v568_v35, %v450_v18 }
  0xec   :  { %v229_v39 = vpop.f32.mrf.mxu0  ;;  %v261_v40 = vpop.f32.mrf.mxu1  ;;  %v348_v44 = vadd.f32 %v576_v36, %v450_v18 }
  0xed   :  { %487 = vst [vmem:[%s708_s3] sm:$0xff] %v486_v37   ;;  %526 = vst [vmem:[%s708_s3 + $0x20] sm:$0xff] %v506_v38   ;;  %v338_v47 = vadd.f32 %v450_v18, %v229_v39  ;;  %v346_v48 = vadd.f32 %v450_v18, %v261_v40 }
  0xee   :  { %v569_v41 = vpop.f32.mrf.mxu0  ;;  %v577_v42 = vpop.f32.mrf.mxu1 }
  0xef   :  { %v341_v45 = vadd.f32 %v569_v41, %v450_v18  ;;  %v349_v46 = vadd.f32 %v577_v42, %v450_v18 }
  0xf0   :  { %v232_v49 = vpop.f32.mrf.mxu0  ;;  %v264_v50 = vpop.f32.mrf.mxu1 }
  0xf1   :  { %v501_v51 = vpack.c.bf16 %v341_v45, %v340_v43  ;;  %v521_v52 = vpack.c.bf16 %v349_v46, %v348_v44  ;;  %v339_v53 = vadd.f32 %v450_v18, %v232_v49  ;;  %v347_v54 = vadd.f32 %v450_v18, %v264_v50 }
  0xf3   :  { %525 = vst [vmem:[%s708_s3 + $0x18] sm:$0xff] %v501_v51   ;;  %529 = vst [vmem:[%s708_s3 + $0x38] sm:$0xff] %v521_v52   ;;  %v496_v55 = vpack.c.bf16 %v339_v53, %v338_v47  ;;  %v516_v56 = vpack.c.bf16 %v347_v54, %v346_v48 }
  0xf5   :  { %524 = vst [vmem:[%s708_s3 + $0x10] sm:$0xff] %v496_v55   ;;  %528 = vst [vmem:[%s708_s3 + $0x30] sm:$0xff] %v516_v56  }

// kernel: _lambda_.14
= control target key start
LH: loop header
LB: loop body
LE: loop exit
PB: predicated region body
PF: predicated region fallthrough
CT: control target
= control target key end

     0   :  { %s961_s1 = inlined_call_operand.vmem [shape: bf16[128,128], index: 1, kind: input, shape index: {}]   ;;  %s962_s0 = inlined_call_operand.vmem [shape: bf16[1,128,128], index: 0, kind: input, shape index: {}]   ;;  %s963_s2 = inlined_call_operand.vmem [shape: f32[1,128], index: 2, kind: input, shape index: {}]   ;;  %s964_s3 = inlined_call_operand.vmem [shape: bf16[1,128,128], index: 3, kind: output, shape index: {}]  }
   0x1   :  { %v722_v0 = vld [vmem:[%s961_s1 + $0x38] sm:$0xff]   ;;  %v723_v1 = vld [vmem:[%s961_s1 + $0x30] sm:$0xff]   ;;  %v724_v2 = vld [vmem:[%s961_s1 + $0x28] sm:$0xff]  }
   0x2   :  { %674 = vmatprep.subr.bf16.mxu0 %v722_v0  ;;  %706 = vmatprep.subr.bf16.mxu1 %v722_v0  ;;  %v725_v3 = vld [vmem:[%s961_s1 + $0x20] sm:$0xff]   ;;  %v726_v6 = vld [vmem:[%s961_s1 + $0x18] sm:$0xff]   ;;  %v727_v7 = vld [vmem:[%s961_s1 + $0x10] sm:$0xff]  }
   0x3   :  { %675 = vmatpush3.bf16.msra.mxu0 %v722_v0  ;;  %714 = vmatpush3.bf16.msra.mxu1 %v722_v0  ;;  %v730_v4 = vld [vmem:[%s962_s0] sm:$0xff]   ;;  %v728_v8 = vld [vmem:[%s961_s1 + $0x8] sm:$0xff]   ;;  %v734_v12 = vld [vmem:[%s962_s0 + $0x10] sm:$0xff]  }
   0x4   :  { %676 = vmatprep.subr.bf16.mxu0 %v723_v1  ;;  %707 = vmatprep.subr.bf16.mxu1 %v723_v1  ;;  %v731_v5 = vld [vmem:[%s962_s0 + $0x20] sm:$0xff]   ;;  %v732_v10 = vld [vmem:[%s962_s0 + $0x8] sm:$0xff]   ;;  %v735_v13 = vld [vmem:[%s962_s0 + $0x30] sm:$0xff]  }
   0x5   :  { %690 = vmatprep.mubr.bf16.mxu0 %v730_v4  ;;  %698 = vmatprep.mubr.bf16.mxu1 %v731_v5  ;;  %v729_v9 = vld [vmem:[%s961_s1] sm:$0xff]   ;;  %v733_v11 = vld [vmem:[%s962_s0 + $0x28] sm:$0xff]   ;;  %v736_v14 = vld [vmem:[%s962_s0 + $0x18] sm:$0xff]  }
   0x6   :  { %v737_v15 = vld [vmem:[%s962_s0 + $0x38] sm:$0xff]   ;;  %v562_v16 = vld [vmem:[%s963_s2] ss:$0 sm:$0xff] }
   0x7   :  { %677 = vmatpush3.bf16.msra.mxu0 %v723_v1  ;;  %715 = vmatpush3.bf16.msra.mxu1 %v723_v1 }
   0x8   :  { %678 = vmatprep.subr.bf16.mxu0 %v724_v2  ;;  %708 = vmatprep.subr.bf16.mxu1 %v724_v2 }
   0xb   :  { %679 = vmatpush3.bf16.msra.mxu0 %v724_v2  ;;  %716 = vmatpush3.bf16.msra.mxu1 %v724_v2 }
   0xc   :  { %680 = vmatprep.subr.bf16.mxu0 %v725_v3  ;;  %709 = vmatprep.subr.bf16.mxu1 %v725_v3 }
   0xf   :  { %681 = vmatpush3.bf16.msra.mxu0 %v725_v3  ;;  %717 = vmatpush3.bf16.msra.mxu1 %v725_v3 }
  0x10   :  { %682 = vmatprep.subr.bf16.mxu0 %v726_v6  ;;  %710 = vmatprep.subr.bf16.mxu1 %v726_v6 }
  0x13   :  { %683 = vmatpush3.bf16.msra.mxu0 %v726_v6  ;;  %718 = vmatpush3.bf16.msra.mxu1 %v726_v6 }
  0x14   :  { %684 = vmatprep.subr.bf16.mxu0 %v727_v7  ;;  %711 = vmatprep.subr.bf16.mxu1 %v727_v7 }
  0x17   :  { %685 = vmatpush3.bf16.msra.mxu0 %v727_v7  ;;  %719 = vmatpush3.bf16.msra.mxu1 %v727_v7 }
  0x18   :  { %686 = vmatprep.subr.bf16.mxu0 %v728_v8  ;;  %712 = vmatprep.subr.bf16.mxu1 %v728_v8 }
  0x1b   :  { %687 = vmatpush3.bf16.msra.mxu0 %v728_v8  ;;  %720 = vmatpush3.bf16.msra.mxu1 %v728_v8 }
  0x1c   :  { %688 = vmatprep.subr.bf16.mxu0 %v729_v9  ;;  %713 = vmatprep.subr.bf16.mxu1 %v729_v9 }
  0x1f   :  { %689 = vmatpush3.bf16.msra.mxu0 %v729_v9  ;;  %721 = vmatpush3.bf16.msra.mxu1 %v729_v9 }
  0x22   :  { %691 = vmatmul.mubr.bf16.vlgmr.msra.gmra.mxu0 %v732_v10  ;;  %699 = vmatmul.mubr.bf16.vlgmr.msra.gmra.mxu1 %v733_v11 }
  0x23   :  { %694 = vmatprep.mubr.bf16.mxu0 %v734_v12  ;;  %702 = vmatprep.mubr.bf16.mxu1 %v735_v13 }
  0x2a   :  { %695 = vmatmul.mubr.bf16.gmra.mxu0 %v736_v14  ;;  %703 = vmatmul.mubr.bf16.gmra.mxu1 %v737_v15 }
  0xe2   :  { %v692_v17 = vpop.f32.mrf.mxu0  ;;  %v700_v18 = vpop.f32.mrf.mxu1 }
  0xe3   :  { %v873_v19 = vadd.f32 %v692_v17, %v562_v16  ;;  %v875_v20 = vadd.f32 %v700_v18, %v562_v16 }
  0xe4   :  { %v213_v21 = vpop.f32.mrf.mxu0  ;;  %v245_v22 = vpop.f32.mrf.mxu1 }
  0xe5   :  { %v565_v23 = vmul.f32 -1.442695, %v873_v19  ;;  %v573_v24 = vmul.f32 -1.442695, %v875_v20  ;;  %v879_v25 = vadd.f32 %v562_v16, %v213_v21  ;;  %v881_v26 = vadd.f32 %v562_v16, %v245_v22 }
  0xe6   :  { %v693_v27 = vpop.f32.mrf.mxu0  ;;  %v701_v28 = vpop.f32.mrf.mxu1 }
  0xe7   :  { %738 = vpow2.f32 %v565_v23  ;;  %v563_v29 = vmul.f32 -1.442695, %v879_v25  ;;  %v571_v30 = vmul.f32 -1.442695, %v881_v26  ;;  %v885_v31 = vadd.f32 %v693_v27, %v562_v16 }
  0xe8   :  { %740 = vpow2.f32 %v573_v24  ;;  %v887_v32 = vadd.f32 %v701_v28, %v562_v16  ;;  %v216_v33 = vpop.f32.mrf.mxu0  ;;  %v248_v34 = vpop.f32.mrf.mxu1 }
  0xe9   :  { %742 = vpow2.f32 %v563_v29  ;;  %v566_v35 = vmul.f32 -1.442695, %v885_v31  ;;  %v890_v36 = vadd.f32 %v562_v16, %v216_v33  ;;  %v892_v37 = vadd.f32 %v562_v16, %v248_v34 }
  0xea   :  { %744 = vpow2.f32 %v571_v30  ;;  %v574_v38 = vmul.f32 -1.442695, %v887_v32  ;;  %v696_v39 = vpop.f32.mrf.mxu0  ;;  %v704_v40 = vpop.f32.mrf.mxu1 }
  0xeb   :  { %746 = vpow2.f32 %v566_v35  ;;  %v564_v41 = vmul.f32 -1.442695, %v890_v36  ;;  %v572_v42 = vmul.f32 -1.442695, %v892_v37  ;;  %v897_v43 = vadd.f32 %v696_v39, %v562_v16 }
  0xec   :  { %748 = vpow2.f32 %v574_v38  ;;  %v899_v44 = vadd.f32 %v704_v40, %v562_v16  ;;  %v229_v45 = vpop.f32.mrf.mxu0  ;;  %v261_v46 = vpop.f32.mrf.mxu1 }
  0xed   :  { %750 = vpow2.f32 %v564_v41  ;;  %v569_v47 = vmul.f32 -1.442695, %v897_v43  ;;  %v902_v48 = vadd.f32 %v562_v16, %v229_v45  ;;  %v904_v49 = vadd.f32 %v562_v16, %v261_v46 }
  0xee   :  { %752 = vpow2.f32 %v572_v42  ;;  %v577_v50 = vmul.f32 -1.442695, %v899_v44  ;;  %v697_v51 = vpop.f32.mrf.mxu0  ;;  %v705_v52 = vpop.f32.mrf.mxu1 }
  0xef   :  { %754 = vpow2.f32 %v569_v47  ;;  %v567_v53 = vmul.f32 -1.442695, %v902_v48  ;;  %v575_v54 = vmul.f32 -1.442695, %v904_v49  ;;  %v909_v55 = vadd.f32 %v697_v51, %v562_v16 }
  0xf0   :  { %756 = vpow2.f32 %v577_v50  ;;  %v911_v56 = vadd.f32 %v705_v52, %v562_v16  ;;  %v232_v57 = vpop.f32.mrf.mxu0  ;;  %v264_v58 = vpop.f32.mrf.mxu1 }
  0xf1   :  { %758 = vpow2.f32 %v567_v53  ;;  %v570_v59 = vmul.f32 -1.442695, %v909_v55  ;;  %v914_v60 = vadd.f32 %v562_v16, %v232_v57  ;;  %v916_v61 = vadd.f32 %v562_v16, %v264_v58 }
  0xf2   :  { %760 = vpow2.f32 %v575_v54  ;;  %v578_v62 = vmul.f32 -1.442695, %v911_v56 }
  0xf3   :  { %762 = vpow2.f32 %v570_v59  ;;  %v568_v63 = vmul.f32 -1.442695, %v914_v60  ;;  %v576_v0 = vmul.f32 -1.442695, %v916_v61 }
  0xf4   :  { %v739_v1 = vpop.eup %738  ;;  %764 = vpow2.f32 %v578_v62 }
  0xf5   :  { %v741_v2 = vpop.eup %740  ;;  %v400_v3 = vadd.f32 1.0, %v739_v1  ;;  %766 = vpow2.f32 %v568_v63 }
  0xf6   :  { %v743_v4 = vpop.eup %742  ;;  %v408_v5 = vadd.f32 1.0, %v741_v2  ;;  %768 = vpow2.f32 %v576_v0 }
  0xf7   :  { %v745_v6 = vpop.eup %744  ;;  %770 = vrcp.f32 %v400_v3  ;;  %v398_v7 = vadd.f32 1.0, %v743_v4 }
  0xf8   :  { %v747_v8 = vpop.eup %746  ;;  %772 = vrcp.f32 %v408_v5  ;;  %v406_v9 = vadd.f32 1.0, %v745_v6 }
  0xf9   :  { %v749_v10 = vpop.eup %748  ;;  %774 = vrcp.f32 %v398_v7  ;;  %v401_v11 = vadd.f32 1.0, %v747_v8 }
  0xfa   :  { %v751_v12 = vpop.eup %750  ;;  %776 = vrcp.f32 %v406_v9  ;;  %v409_v13 = vadd.f32 1.0, %v749_v10 }
  0xfb   :  { %v753_v14 = vpop.eup %752  ;;  %778 = vrcp.f32 %v401_v11  ;;  %v399_v15 = vadd.f32 1.0, %v751_v12 }
  0xfc   :  { %v755_v16 = vpop.eup %754  ;;  %780 = vrcp.f32 %v409_v13  ;;  %v407_v17 = vadd.f32 1.0, %v753_v14 }
  0xfd   :  { %v757_v18 = vpop.eup %756  ;;  %782 = vrcp.f32 %v399_v15  ;;  %v404_v21 = vadd.f32 1.0, %v755_v16 }
  0xfe   :  { %v759_v22 = vpop.eup %758  ;;  %784 = vrcp.f32 %v407_v17  ;;  %v412_v23 = vadd.f32 1.0, %v757_v18 }
  0xff   :  { %v761_v24 = vpop.eup %760  ;;  %786 = vrcp.f32 %v404_v21  ;;  %v402_v27 = vadd.f32 1.0, %v759_v22 }
 0x100   :  { %v763_v28 = vpop.eup %762  ;;  %788 = vrcp.f32 %v412_v23  ;;  %v410_v29 = vadd.f32 1.0, %v761_v24 }
 0x101   :  { %v765_v30 = vpop.eup %764  ;;  %790 = vrcp.f32 %v402_v27  ;;  %v405_v33 = vadd.f32 1.0, %v763_v28 }
 0x102   :  { %v767_v34 = vpop.eup %766  ;;  %792 = vrcp.f32 %v410_v29  ;;  %v413_v35 = vadd.f32 1.0, %v765_v30 }
 0x103   :  { %v769_v38 = vpop.eup %768  ;;  %794 = vrcp.f32 %v405_v33  ;;  %v403_v39 = vadd.f32 1.0, %v767_v34 }
 0x104   :  { %v771_v40 = vpop.eup %770  ;;  %796 = vrcp.f32 %v413_v35  ;;  %v411_v41 = vadd.f32 1.0, %v769_v38 }
 0x105   :  { %v773_v42 = vpop.eup %772  ;;  %798 = vrcp.f32 %v403_v39  ;;  %v448_v51 = vmul.f32 %v771_v40, %v873_v19 }
 0x106   :  { %v775_v45 = vpop.eup %774  ;;  %800 = vrcp.f32 %v411_v41  ;;  %v456_v54 = vmul.f32 %v773_v42, %v875_v20 }
 0x107   :  { %v777_v46 = vpop.eup %776  ;;  %v446_v59 = vmul.f32 %v775_v45, %v879_v25 }
 0x108   :  { %v779_v47 = vpop.eup %778  ;;  %v454_v1 = vmul.f32 %v777_v46, %v881_v26 }
 0x109   :  { %v781_v50 = vpop.eup %780  ;;  %v449_v52 = vmul.f32 %v779_v47, %v885_v31 }
 0x10a   :  { %v783_v53 = vpop.eup %782  ;;  %v457_v57 = vmul.f32 %v781_v50, %v887_v32 }
 0x10b   :  { %v785_v58 = vpop.eup %784  ;;  %v619_v62 = vpack.c.bf16 %v449_v52, %v448_v51  ;;  %v447_v63 = vmul.f32 %v783_v53, %v890_v36 }
 0x10c   :  { %v787_v0 = vpop.eup %786  ;;  %v639_v2 = vpack.c.bf16 %v457_v57, %v456_v54  ;;  %v455_v3 = vmul.f32 %v785_v58, %v892_v37 }
 0x10d   :  { %v789_v19 = vpop.eup %788  ;;  %651 = vst [vmem:[%s964_s3 + $0x8] sm:$0xff] %v619_v62   ;;  %v614_v20 = vpack.c.bf16 %v447_v63, %v446_v59  ;;  %v452_v37 = vmul.f32 %v787_v0, %v897_v43 }
 0x10e   :  { %v791_v31 = vpop.eup %790  ;;  %655 = vst [vmem:[%s964_s3 + $0x28] sm:$0xff] %v639_v2   ;;  %v634_v25 = vpack.c.bf16 %v455_v3, %v454_v1  ;;  %v460_v6 = vmul.f32 %v789_v19, %v899_v44 }
 0x10f   :  { %v793_v32 = vpop.eup %792  ;;  %615 = vst [vmem:[%s964_s3] sm:$0xff] %v614_v20   ;;  %v450_v9 = vmul.f32 %v791_v31, %v902_v48 }
 0x110   :  { %v795_v26 = vpop.eup %794  ;;  %654 = vst [vmem:[%s964_s3 + $0x20] sm:$0xff] %v634_v25   ;;  %v458_v12 = vmul.f32 %v793_v32, %v904_v49 }
 0x111   :  { %v797_v36 = vpop.eup %796  ;;  %v453_v4 = vmul.f32 %v795_v26, %v909_v55 }
 0x112   :  { %v799_v5 = vpop.eup %798  ;;  %v461_v7 = vmul.f32 %v797_v36, %v911_v56 }
 0x113   :  { %v801_v8 = vpop.eup %800  ;;  %v629_v10 = vpack.c.bf16 %v453_v4, %v452_v37  ;;  %v451_v11 = vmul.f32 %v799_v5, %v914_v60 }
 0x114   :  { %v649_v13 = vpack.c.bf16 %v461_v7, %v460_v6  ;;  %v459_v14 = vmul.f32 %v801_v8, %v916_v61 }
 0x115   :  { %653 = vst [vmem:[%s964_s3 + $0x18] sm:$0xff] %v629_v10   ;;  %v624_v43 = vpack.c.bf16 %v451_v11, %v450_v9 }
 0x116   :  { %657 = vst [vmem:[%s964_s3 + $0x38] sm:$0xff] %v649_v13   ;;  %v644_v44 = vpack.c.bf16 %v459_v14, %v458_v12 }
 0x117   :  { %652 = vst [vmem:[%s964_s3 + $0x10] sm:$0xff] %v624_v43  }
 0x118   :  { %656 = vst [vmem:[%s964_s3 + $0x30] sm:$0xff] %v644_v44  }

// kernel: _lambda_.15
= control target key start
LH: loop header
LB: loop body
LE: loop exit
PB: predicated region body
PF: predicated region fallthrough
CT: control target
= control target key end

     0   :  { %s1307_s12 = smov 0   ;;  %s1309_s13 = smov 0   ;;  %s1721_s0 = inlined_call_operand.vmem [shape: bf16[2,10,10,128], index: 0, kind: input, shape index: {}]   ;;  %s1722_s1 = inlined_call_operand.vmem [shape: f32[9,128], index: 1, kind: input, shape index: {}]   ;;  %s1723_s2 = inlined_call_operand.vmem [shape: f32[1,128], index: 2, kind: input, shape index: {}]   ;;  %s1724_s3 = inlined_call_operand.vmem [shape: bf16[2,8,8,128], index: 3, kind: output, shape index: {}]  }
   0x1   :  { %s1311_s14 = smov 0  }
   0x2 LB: > { %s25_s15 = sadd.s32 1, %s1281_s13  ;;  %p1110_p0 = scmp.ge.s32.totalorder %s1285_s14, 1  ;;  %s1285_s14 = sphi %s1311_s14, %s13_s14   ;;  %s1281_s13 = sphi %s1309_s13, %s1726_s13   ;;  %s1277_s12 = sphi %s1307_s12, %s1725_s12  }
   0x3   : > { %p27_p1 = scmp.ge.s32.totalorder %s25_s15, 2  ;;  %p173_p2 = scmp.lt.s32.totalorder %s1285_s14, 3 }
   0x5   : > { %s1728_s15 = smov (%p27_p1, %s25_s15), 0  ;;  %p174_p3 = pnand %p1110_p0, %p173_p2 }
   0x6   : > { %p210_p4 = scmp.lt.s32.totalorder (!%p174_p3), %s1277_s12, 1 }
   0x7   : > { %177 = sbr.rel (%p174_p3) target bundleno = 162 (0xa2), region = 32 }
   0xc   : > { %s1730_s12 = smov (!%p210_p4, %s1277_s12), 1  ;;  %v1114_v0 = vld [vmem:[%s1722_s1] ss:$0 sm:$0xff]  ;;  %vm323_vm0 = vcmask 1046528   ;;  %v1115_v29 = vld [vmem:[%s1722_s1 + $0x1] ss:$0 sm:$0xff] }
   0xd   : > { %s1206_s16 = smul.u32 80, %s1730_s12  ;;  %vm417_vm1 = vcmask 1045504   ;;  %s1182_s17 = sshll.u32 %s1730_s12, 5 }
   0xe   : > { %s232_s20 = scalar_lea.vmem %s1724_s3, %s1182_s17 }
   0xf   : > { %s1331_s19 = scalar_lea.vmem %s1721_s0, %s1206_s16 }
  0x10   : > { %v233_v1 = vld [vmem:[%s1331_s19] ss:$8 sps:$4 sm:$0xff]   ;;  %v235_v2 = vld [vmem:[%s1331_s19 + $0x10] ss:$8 sps:$4 sm:$0xff]   ;;  %v1341_v9 = vld [vmem:[%s1331_s19 + $0x4] sm:$0x1] }
  0x11   : > { %v237_v3 = vld [vmem:[%s1331_s19 + $0x20] ss:$8 sps:$4 sm:$0xff]   ;;  %v239_v4 = vld [vmem:[%s1331_s19 + $0x30] ss:$8 sps:$4 sm:$0xff]   ;;  %v241_v5 = vunpack.c.l.bf16 %v233_v1  ;;  %v242_v6 = vunpack.c.h.bf16 %v233_v1  ;;  %v243_v7 = vunpack.c.l.bf16 %v235_v2  ;;  %v244_v8 = vunpack.c.h.bf16 %v235_v2  ;;  %v1344_v10 = vld [vmem:[%s1331_s19 + $0xc] sm:$0x1] }
  0x12   : > { %v245_v11 = vunpack.c.l.bf16 %v237_v3  ;;  %v246_v12 = vunpack.c.h.bf16 %v237_v3  ;;  %v247_v13 = vunpack.c.l.bf16 %v239_v4  ;;  %v248_v14 = vunpack.c.h.bf16 %v239_v4  ;;  %v1347_v15 = vld [vmem:[%s1331_s19 + $0x14] sm:$0x1]  ;;  %v1350_v16 = vld [vmem:[%s1331_s19 + $0x1c] sm:$0x1]  ;;  %v1353_v17 = vld [vmem:[%s1331_s19 + $0x24] sm:$0x1] }
  0x13   : > { %v254_v18 = vmul.f32 %v1114_v0, %v241_v5  ;;  %v255_v19 = vmul.f32 %v1114_v0, %v242_v6  ;;  %v1355_v20 = vmul.f32 %v1114_v0, %v243_v7  ;;  %v1357_v21 = vmul.f32 %v1114_v0, %v244_v8  ;;  %v1360_v22 = vld [vmem:[%s1331_s19 + $0x2c] sm:$0x1]  ;;  %v1363_v23 = vld [vmem:[%s1331_s19 + $0x34] sm:$0x1]  ;;  %v1366_v24 = vld [vmem:[%s1331_s19 + $0x3c] sm:$0x1] }
  0x14   : > { %v258_v25 = vmul.f32 %v1114_v0, %v245_v11  ;;  %v1368_v26 = vmul.f32 %v1114_v0, %v246_v12  ;;  %v1370_v27 = vmul.f32 %v1114_v0, %v247_v13  ;;  %v1372_v28 = vmul.f32 %v1114_v0, %v248_v14 }
  0x15   : > { %v278_v30 = vunpack.c.l.bf16 %v1341_v9  ;;  %v279_v31 = vunpack.c.l.bf16 %v1344_v10  ;;  %v280_v32 = vunpack.c.l.bf16 %v1347_v15  ;;  %v281_v33 = vunpack.c.l.bf16 %v1350_v16 }
  0x16   : > { %v282_v34 = vunpack.c.l.bf16 %v1353_v17  ;;  %v283_v35 = vunpack.c.l.bf16 %v1360_v22  ;;  %v284_v36 = vunpack.c.l.bf16 %v1363_v23  ;;  %v285_v37 = vunpack.c.l.bf16 %v1366_v24 }
  0x17   : > { %v291_v38 = vmul.f32 %v1115_v29, %v241_v5  ;;  %v292_v39 = vmul.f32 %v1115_v29, %v278_v30  ;;  %v293_v40 = vmul.f32 %v1115_v29, %v242_v6  ;;  %v294_v41 = vmul.f32 %v1115_v29, %v279_v31  ;;  %v364_v6 = vld [vmem:[%s1331_s19] sm:$0xe] }
  0x18   : > { %v295_v42 = vmul.f32 %v1115_v29, %v243_v7  ;;  %v296_v43 = vmul.f32 %v1115_v29, %v280_v32  ;;  %v297_v44 = vmul.f32 %v1115_v29, %v244_v8  ;;  %v298_v45 = vmul.f32 %v1115_v29, %v281_v33  ;;  %v365_v7 = vld [vmem:[%s1331_s19 + $0x8] sm:$0xe] }
  0x19   : > { %v299_v46 = vmul.f32 %v1115_v29, %v245_v11  ;;  %v300_v47 = vmul.f32 %v1115_v29, %v282_v34  ;;  %v301_v48 = vmul.f32 %v1115_v29, %v246_v12  ;;  %v302_v49 = vmul.f32 %v1115_v29, %v283_v35 }
  0x1a   : > { %v303_v50 = vmul.f32 %v1115_v29, %v247_v13  ;;  %v304_v51 = vmul.f32 %v1115_v29, %v284_v36  ;;  %v305_v52 = vmul.f32 %v1115_v29, %v248_v14  ;;  %v306_v53 = vmul.f32 %v1115_v29, %v285_v37  ;;  %v366_v14 = vld [vmem:[%s1331_s19 + $0x10] sm:$0xe] }
  0x1b   : > { %v324_v54 = vrot.slane %v291_v38, 1  ;;  %v325_v55 = vrot.slane %v292_v39, 1  ;;  %v327_v56 = vrot.slane %v293_v40, 1  ;;  %v328_v57 = vrot.slane %v294_v41, 1  ;;  %v367_v41 = vld [vmem:[%s1331_s19 + $0x18] sm:$0xe] }
  0x1c   : > { %v330_v58 = vrot.slane %v295_v42, 1  ;;  %v331_v59 = vrot.slane %v296_v43, 1  ;;  %v333_v60 = vrot.slane %v297_v44, 1  ;;  %v334_v61 = vrot.slane %v298_v45, 1  ;;  %v368_v42 = vld [vmem:[%s1331_s19 + $0x20] sm:$0xe] }
  0x1d   : > { %v326_v62 = vsel %vm323_vm0, %v324_v54, %v325_v55  ;;  %v329_v63 = vsel %vm323_vm0, %v327_v56, %v328_v57  ;;  %v336_v0 = vrot.slane %v299_v46, 1  ;;  %v337_v1 = vrot.slane %v300_v47, 1  ;;  %v369_v47 = vld [vmem:[%s1331_s19 + $0x28] sm:$0xe] }
  0x1e   : > { %v332_v2 = vsel %vm323_vm0, %v330_v58, %v331_v59  ;;  %v335_v3 = vsel %vm323_vm0, %v333_v60, %v334_v61  ;;  %v339_v4 = vrot.slane %v301_v48, 1  ;;  %v340_v5 = vrot.slane %v302_v49, 1  ;;  %v370_v48 = vld [vmem:[%s1331_s19 + $0x30] sm:$0xe]  ;;  %v371_v49 = vld [vmem:[%s1331_s19 + $0x38] sm:$0xe] }
  0x1f   : > { %v338_v8 = vsel %vm323_vm0, %v336_v0, %v337_v1  ;;  %v342_v11 = vrot.slane %v303_v50, 1  ;;  %v343_v12 = vrot.slane %v304_v51, 1  ;;  %v345_v13 = vrot.slane %v305_v52, 1  ;;  %v1116_v52 = vld [vmem:[%s1722_s1 + $0x2] ss:$0 sm:$0xff] }
  0x20   : > { %v341_v29 = vsel %vm323_vm0, %v339_v4, %v340_v5  ;;  %v346_v38 = vrot.slane %v306_v53, 1  ;;  %v1410_v39 = vadd.f32 %v326_v62, %v254_v18  ;;  %v1412_v40 = vadd.f32 %v329_v63, %v255_v19 }
  0x21   : > { %v344_v43 = vsel %vm323_vm0, %v342_v11, %v343_v12  ;;  %v1418_v44 = vadd.f32 %v332_v2, %v1355_v20  ;;  %v359_v45 = vadd.f32 %v335_v3, %v1357_v21  ;;  %v360_v46 = vadd.f32 %v338_v8, %v258_v25 }
  0x22   : > { %v347_v50 = vsel %vm323_vm0, %v345_v13, %v346_v38  ;;  %v361_v18 = vadd.f32 %v341_v29, %v1368_v26  ;;  %v362_v19 = vadd.f32 %v344_v43, %v1370_v27  ;;  %v372_v51 = vunpack.c.l.bf16 %v364_v6  ;;  %v1117_v13 = vld [vmem:[%s1331_s19 + $0x8] ss:$8 sps:$4 sm:$0xff]  }
  0x23   : > { %v363_v20 = vadd.f32 %v347_v50, %v1372_v28  ;;  %v373_v53 = vunpack.c.l.bf16 %v365_v7  ;;  %v374_v54 = vunpack.c.l.bf16 %v366_v14  ;;  %v375_v21 = vunpack.c.l.bf16 %v367_v41  ;;  %v1121_v50 = vld [vmem:[%s1331_s19 + $0x28] ss:$8 sps:$4 sm:$0xff]  }
  0x24   : > { %v376_v25 = vunpack.c.l.bf16 %v368_v42  ;;  %v377_v55 = vunpack.c.l.bf16 %v369_v47  ;;  %v378_v56 = vunpack.c.l.bf16 %v370_v48  ;;  %v379_v57 = vunpack.c.l.bf16 %v371_v49  ;;  %v1119_v42 = vld [vmem:[%s1331_s19 + $0x18] ss:$8 sps:$4 sm:$0xff]  }
  0x25   : > { %v385_v58 = vmul.f32 %v1116_v52, %v372_v51  ;;  %v386_v26 = vmul.f32 %v1116_v52, %v278_v30  ;;  %v387_v59 = vmul.f32 %v1116_v52, %v373_v53  ;;  %v388_v27 = vmul.f32 %v1116_v52, %v279_v31  ;;  %v1123_v51 = vld [vmem:[%s1331_s19 + $0x38] ss:$8 sps:$4 sm:$0xff]  }
  0x26   : > { %v389_v60 = vmul.f32 %v1116_v52, %v374_v54  ;;  %v390_v61 = vmul.f32 %v1116_v52, %v280_v32  ;;  %v391_v28 = vmul.f32 %v1116_v52, %v375_v21  ;;  %v392_v62 = vmul.f32 %v1116_v52, %v281_v33 }
  0x27   : > { %v393_v63 = vmul.f32 %v1116_v52, %v376_v25  ;;  %v394_v0 = vmul.f32 %v1116_v52, %v282_v34  ;;  %v395_v1 = vmul.f32 %v1116_v52, %v377_v55  ;;  %v396_v9 = vmul.f32 %v1116_v52, %v283_v35 }
  0x28   : > { %v397_v30 = vmul.f32 %v1116_v52, %v378_v56  ;;  %v398_v10 = vmul.f32 %v1116_v52, %v284_v36  ;;  %v399_v31 = vmul.f32 %v1116_v52, %v379_v57  ;;  %v400_v15 = vmul.f32 %v1116_v52, %v285_v37 }
  0x29   : > { %v418_v32 = vrot.slane %v385_v58, 2  ;;  %v419_v2 = vrot.slane %v386_v26, 2  ;;  %v421_v16 = vrot.slane %v387_v59, 2  ;;  %v422_v33 = vrot.slane %v388_v27, 2  ;;  %v1466_v59 = vld [vmem:[%s1331_s19 + $0xc] sm:$0x1] }
  0x2a   : > { %v424_v3 = vrot.slane %v389_v60, 2  ;;  %v425_v17 = vrot.slane %v390_v61, 2  ;;  %v427_v34 = vrot.slane %v391_v28, 2  ;;  %v428_v4 = vrot.slane %v392_v62, 2  ;;  %v1472_v62 = vld [vmem:[%s1331_s19 + $0x1c] sm:$0x1] }
  0x2b   : > { %v420_v22 = vsel %vm417_vm1, %v418_v32, %v419_v2  ;;  %v423_v35 = vsel %vm417_vm1, %v421_v16, %v422_v33  ;;  %v430_v23 = vrot.slane %v393_v63, 2  ;;  %v431_v36 = vrot.slane %v394_v0, 2  ;;  %v1475_v63 = vld [vmem:[%s1331_s19 + $0x24] sm:$0x1]  ;;  %v1478_v0 = vld [vmem:[%s1331_s19 + $0x2c] sm:$0x1] }
  0x2c   : > { %v426_v5 = vsel %vm417_vm1, %v424_v3, %v425_v17  ;;  %v429_v24 = vsel %vm417_vm1, %v427_v34, %v428_v4  ;;  %v433_v37 = vrot.slane %v395_v1, 2  ;;  %v434_v6 = vrot.slane %v396_v9, 2  ;;  %v1491_v32 = vld [vmem:[%s1331_s19 + $0x44] sm:$0x1] }
  0x2d   : > { %v432_v7 = vsel %vm417_vm1, %v430_v23, %v431_v36  ;;  %v436_v8 = vrot.slane %v397_v30, 2  ;;  %v437_v11 = vrot.slane %v398_v10, 2  ;;  %v439_v12 = vrot.slane %v399_v31, 2  ;;  %v1485_v31 = vld [vmem:[%s1331_s19 + $0x34] sm:$0x1] }
  0x2e   : > { %v435_v14 = vsel %vm417_vm1, %v433_v37, %v434_v6  ;;  %v440_v29 = vrot.slane %v400_v15, 2  ;;  %v450_v38 = vadd.f32 %v420_v22, %v1410_v39  ;;  %v451_v41 = vadd.f32 %v423_v35, %v1412_v40  ;;  %v1125_v39 = vld [vmem:[%s1722_s1 + $0x3] ss:$0 sm:$0xff]  ;;  %v1488_v15 = vld [vmem:[%s1331_s19 + $0x3c] sm:$0x1] }
  0x2f   : > { %v438_v43 = vsel %vm417_vm1, %v436_v8, %v437_v11  ;;  %v452_v47 = vadd.f32 %v426_v5, %v1418_v44  ;;  %v453_v48 = vadd.f32 %v429_v24, %v359_v45  ;;  %v454_v49 = vadd.f32 %v432_v7, %v360_v46  ;;  %v1134_v17 = vld [vmem:[%s1722_s1 + $0x4] ss:$0 sm:$0xff] }
  0x30   : > { %v441_v52 = vsel %vm417_vm1, %v439_v12, %v440_v29  ;;  %v455_v53 = vadd.f32 %v435_v14, %v361_v18  ;;  %v456_v54 = vadd.f32 %v438_v43, %v362_v19  ;;  %v467_v21 = vunpack.c.l.bf16 %v1117_v13 }
  0x31   : > { %v457_v40 = vadd.f32 %v441_v52, %v363_v20  ;;  %v468_v25 = vunpack.c.h.bf16 %v1117_v13  ;;  %v469_v55 = vunpack.c.l.bf16 %v1119_v42  ;;  %v470_v44 = vunpack.c.h.bf16 %v1119_v42  ;;  %v1469_v20 = vld [vmem:[%s1331_s19 + $0x14] sm:$0x1] }
  0x32   : > { %v471_v45 = vunpack.c.l.bf16 %v1121_v50  ;;  %v472_v46 = vunpack.c.h.bf16 %v1121_v50  ;;  %v473_v56 = vunpack.c.l.bf16 %v1123_v51  ;;  %v474_v57 = vunpack.c.h.bf16 %v1123_v51 }
  0x33   : > { %v480_v18 = vmul.f32 %v1125_v39, %v467_v21  ;;  %v481_v58 = vmul.f32 %v1125_v39, %v468_v25  ;;  %v482_v19 = vmul.f32 %v1125_v39, %v469_v55  ;;  %v483_v26 = vmul.f32 %v1125_v39, %v470_v44 }
  0x34   : > { %v484_v27 = vmul.f32 %v1125_v39, %v471_v45  ;;  %v485_v60 = vmul.f32 %v1125_v39, %v472_v46  ;;  %v486_v61 = vmul.f32 %v1125_v39, %v473_v56  ;;  %v487_v28 = vmul.f32 %v1125_v39, %v474_v57 }
  0x35   : > { %v488_v1 = vadd.f32 %v480_v18, %v450_v38  ;;  %v489_v9 = vadd.f32 %v481_v58, %v451_v41  ;;  %v1480_v30 = vadd.f32 %v482_v19, %v452_v47  ;;  %v1482_v10 = vadd.f32 %v483_v26, %v453_v48  ;;  %v1135_v58 = vld [vmem:[%s1331_s19 + $0x8] sm:$0xe]  ;;  %v1136_v19 = vld [vmem:[%s1331_s19 + $0x10] sm:$0xe] }
  0x36   : > { %v492_v2 = vadd.f32 %v484_v27, %v454_v49  ;;  %v1493_v16 = vadd.f32 %v485_v60, %v455_v53  ;;  %v1495_v33 = vadd.f32 %v486_v61, %v456_v54  ;;  %v1497_v3 = vadd.f32 %v487_v28, %v457_v40  ;;  %v1137_v28 = vld [vmem:[%s1331_s19 + $0x18] sm:$0xe] }
  0x37   : > { %v504_v34 = vunpack.c.l.bf16 %v1466_v59  ;;  %v505_v4 = vunpack.c.l.bf16 %v1469_v20  ;;  %v506_v22 = vunpack.c.l.bf16 %v1472_v62  ;;  %v507_v35 = vunpack.c.l.bf16 %v1475_v63 }
  0x38   : > { %v508_v23 = vunpack.c.l.bf16 %v1478_v0  ;;  %v509_v36 = vunpack.c.l.bf16 %v1485_v31  ;;  %v510_v5 = vunpack.c.l.bf16 %v1488_v15  ;;  %v511_v24 = vunpack.c.l.bf16 %v1491_v32 }
  0x39   : > { %v517_v37 = vmul.f32 %v1134_v17, %v467_v21  ;;  %v518_v6 = vmul.f32 %v1134_v17, %v504_v34  ;;  %v519_v7 = vmul.f32 %v1134_v17, %v468_v25  ;;  %v520_v8 = vmul.f32 %v1134_v17, %v505_v4 }
  0x3a   : > { %v521_v11 = vmul.f32 %v1134_v17, %v469_v55  ;;  %v522_v12 = vmul.f32 %v1134_v17, %v506_v22  ;;  %v523_v13 = vmul.f32 %v1134_v17, %v470_v44  ;;  %v524_v14 = vmul.f32 %v1134_v17, %v507_v35 }
  0x3b   : > { %v525_v29 = vmul.f32 %v1134_v17, %v471_v45  ;;  %v526_v38 = vmul.f32 %v1134_v17, %v508_v23  ;;  %v527_v41 = vmul.f32 %v1134_v17, %v472_v46  ;;  %v528_v42 = vmul.f32 %v1134_v17, %v509_v36 }
  0x3c   : > { %v529_v43 = vmul.f32 %v1134_v17, %v473_v56  ;;  %v530_v47 = vmul.f32 %v1134_v17, %v510_v5  ;;  %v531_v48 = vmul.f32 %v1134_v17, %v474_v57  ;;  %v532_v49 = vmul.f32 %v1134_v17, %v511_v24 }
  0x3d   : > { %v549_v50 = vrot.slane %v517_v37, 1  ;;  %v550_v51 = vrot.slane %v518_v6, 1  ;;  %v552_v52 = vrot.slane %v519_v7, 1  ;;  %v553_v53 = vrot.slane %v520_v8, 1  ;;  %v1138_v8 = vld [vmem:[%s1331_s19 + $0x20] sm:$0xe] }
  0x3e   : > { %v555_v54 = vrot.slane %v521_v11, 1  ;;  %v556_v21 = vrot.slane %v522_v12, 1  ;;  %v558_v39 = vrot.slane %v523_v13, 1  ;;  %v559_v40 = vrot.slane %v524_v14, 1  ;;  %v1139_v11 = vld [vmem:[%s1331_s19 + $0x28] sm:$0xe] }
  0x3f   : > { %v551_v25 = vsel %vm323_vm0, %v549_v50, %v550_v51  ;;  %v554_v55 = vsel %vm323_vm0, %v552_v52, %v553_v53  ;;  %v561_v44 = vrot.slane %v525_v29, 1  ;;  %v562_v45 = vrot.slane %v526_v38, 1  ;;  %v1140_v38 = vld [vmem:[%s1331_s19 + $0x30] sm:$0xe] }
  0x40   : > { %v557_v46 = vsel %vm323_vm0, %v555_v54, %v556_v21  ;;  %v560_v56 = vsel %vm323_vm0, %v558_v39, %v559_v40  ;;  %v564_v57 = vrot.slane %v527_v41, 1  ;;  %v565_v18 = vrot.slane %v528_v42, 1  ;;  %v1141_v41 = vld [vmem:[%s1331_s19 + $0x38] sm:$0xe]  ;;  %v1142_v42 = vld [vmem:[%s1331_s19 + $0x40] sm:$0xe] }
  0x41   : > { %v563_v26 = vsel %vm323_vm0, %v561_v44, %v562_v45  ;;  %v567_v27 = vrot.slane %v529_v43, 1  ;;  %v568_v60 = vrot.slane %v530_v47, 1  ;;  %v570_v61 = vrot.slane %v531_v48, 1  ;;  %v1143_v48 = vld [vmem:[%s1722_s1 + $0x5] ss:$0 sm:$0xff] }
  0x42   : > { %v566_v17 = vsel %vm323_vm0, %v564_v57, %v565_v18  ;;  %v571_v37 = vrot.slane %v532_v49, 1  ;;  %v1535_v6 = vadd.f32 %v551_v25, %v488_v1  ;;  %v1537_v7 = vadd.f32 %v554_v55, %v489_v9 }
  0x43   : > { %v569_v12 = vsel %vm323_vm0, %v567_v27, %v568_v60  ;;  %v1543_v13 = vadd.f32 %v557_v46, %v1480_v30  ;;  %v584_v14 = vadd.f32 %v560_v56, %v1482_v10  ;;  %v585_v29 = vadd.f32 %v563_v26, %v492_v2 }
  0x44   : > { %v572_v43 = vsel %vm323_vm0, %v570_v61, %v571_v37  ;;  %v586_v1 = vadd.f32 %v566_v17, %v1493_v16  ;;  %v587_v9 = vadd.f32 %v569_v12, %v1495_v33  ;;  %v597_v47 = vunpack.c.l.bf16 %v1135_v58  ;;  %v1144_v61 = vld [vmem:[%s1331_s19 + $0x10] ss:$8 sps:$4 sm:$0xff]  }
  0x45   : > { %v588_v30 = vadd.f32 %v572_v43, %v1497_v3  ;;  %v598_v49 = vunpack.c.l.bf16 %v1136_v19  ;;  %v599_v50 = vunpack.c.l.bf16 %v1137_v28  ;;  %v600_v10 = vunpack.c.l.bf16 %v1138_v8  ;;  %v1148_v43 = vld [vmem:[%s1331_s19 + $0x30] ss:$8 sps:$4 sm:$0xff]  }
  0x46   : > { %v601_v2 = vunpack.c.l.bf16 %v1139_v11  ;;  %v602_v51 = vunpack.c.l.bf16 %v1140_v38  ;;  %v603_v52 = vunpack.c.l.bf16 %v1141_v41  ;;  %v604_v53 = vunpack.c.l.bf16 %v1142_v42  ;;  %v1146_v11 = vld [vmem:[%s1331_s19 + $0x20] ss:$8 sps:$4 sm:$0xff]  }
  0x47   : > { %v610_v54 = vmul.f32 %v1143_v48, %v597_v47  ;;  %v611_v16 = vmul.f32 %v1143_v48, %v504_v34  ;;  %v612_v21 = vmul.f32 %v1143_v48, %v598_v49  ;;  %v613_v33 = vmul.f32 %v1143_v48, %v505_v4  ;;  %v1150_v47 = vld [vmem:[%s1331_s19 + $0x40] ss:$8 sps:$4 sm:$0xff]  }
  0x48   : > { %v614_v39 = vmul.f32 %v1143_v48, %v599_v50  ;;  %v615_v40 = vmul.f32 %v1143_v48, %v506_v22  ;;  %v616_v3 = vmul.f32 %v1143_v48, %v600_v10  ;;  %v617_v25 = vmul.f32 %v1143_v48, %v507_v35 }
  0x49   : > { %v618_v55 = vmul.f32 %v1143_v48, %v601_v2  ;;  %v619_v44 = vmul.f32 %v1143_v48, %v508_v23  ;;  %v620_v45 = vmul.f32 %v1143_v48, %v602_v51  ;;  %v621_v59 = vmul.f32 %v1143_v48, %v509_v36 }
  0x4a   : > { %v622_v34 = vmul.f32 %v1143_v48, %v603_v52  ;;  %v623_v20 = vmul.f32 %v1143_v48, %v510_v5  ;;  %v624_v4 = vmul.f32 %v1143_v48, %v604_v53  ;;  %v625_v62 = vmul.f32 %v1143_v48, %v511_v24 }
  0x4b   : > { %v642_v22 = vrot.slane %v610_v54, 2  ;;  %v643_v46 = vrot.slane %v611_v16, 2  ;;  %v645_v63 = vrot.slane %v612_v21, 2  ;;  %v646_v35 = vrot.slane %v613_v33, 2  ;;  %v1591_v21 = vld [vmem:[%s1331_s19 + $0x14] sm:$0x1] }
  0x4c   : > { %v648_v56 = vrot.slane %v614_v39, 2  ;;  %v649_v0 = vrot.slane %v615_v40, 2  ;;  %v651_v23 = vrot.slane %v616_v3, 2  ;;  %v652_v57 = vrot.slane %v617_v25, 2  ;;  %v1597_v25 = vld [vmem:[%s1331_s19 + $0x24] sm:$0x1] }
  0x4d   : > { %v644_v31 = vsel %vm417_vm1, %v642_v22, %v643_v46  ;;  %v647_v36 = vsel %vm417_vm1, %v645_v63, %v646_v35  ;;  %v654_v15 = vrot.slane %v618_v55, 2  ;;  %v655_v5 = vrot.slane %v619_v44, 2  ;;  %v1600_v55 = vld [vmem:[%s1331_s19 + $0x2c] sm:$0x1]  ;;  %v1603_v44 = vld [vmem:[%s1331_s19 + $0x34] sm:$0x1] }
  0x4e   : > { %v650_v18 = vsel %vm417_vm1, %v648_v56, %v649_v0  ;;  %v653_v32 = vsel %vm417_vm1, %v651_v23, %v652_v57  ;;  %v657_v24 = vrot.slane %v620_v45, 2  ;;  %v658_v58 = vrot.slane %v621_v59, 2  ;;  %v1616_v22 = vld [vmem:[%s1331_s19 + $0x4c] sm:$0x1]  ;;  %v1161_v0 = vld [vmem:[%s1722_s1 + $0x7] ss:$0 sm:$0xff] }
  0x4f   : > { %v656_v19 = vsel %vm417_vm1, %v654_v15, %v655_v5  ;;  %v660_v26 = vrot.slane %v622_v34, 2  ;;  %v661_v27 = vrot.slane %v623_v20, 2  ;;  %v663_v60 = vrot.slane %v624_v4, 2  ;;  %v1610_v4 = vld [vmem:[%s1331_s19 + $0x3c] sm:$0x1] }
  0x50   : > { %v659_v28 = vsel %vm417_vm1, %v657_v24, %v658_v58  ;;  %v664_v17 = vrot.slane %v625_v62, 2  ;;  %v674_v37 = vadd.f32 %v644_v31, %v1535_v6  ;;  %v675_v8 = vadd.f32 %v647_v36, %v1537_v7  ;;  %v1152_v6 = vld [vmem:[%s1722_s1 + $0x6] ss:$0 sm:$0xff]  ;;  %v1613_v62 = vld [vmem:[%s1331_s19 + $0x44] sm:$0x1] }
  0x51   : > { %v662_v12 = vsel %vm417_vm1, %v660_v26, %v661_v27  ;;  %v676_v38 = vadd.f32 %v650_v18, %v1543_v13  ;;  %v677_v41 = vadd.f32 %v653_v32, %v584_v14  ;;  %v678_v42 = vadd.f32 %v656_v19, %v585_v29 }
  0x52   : > { %v665_v48 = vsel %vm417_vm1, %v663_v60, %v664_v17  ;;  %v679_v49 = vadd.f32 %v659_v28, %v586_v1  ;;  %v680_v50 = vadd.f32 %v662_v12, %v587_v9  ;;  %v691_v10 = vunpack.c.l.bf16 %v1144_v61 }
  0x53   : > { %v681_v7 = vadd.f32 %v665_v48, %v588_v30  ;;  %v692_v2 = vunpack.c.h.bf16 %v1144_v61  ;;  %v693_v51 = vunpack.c.l.bf16 %v1146_v11  ;;  %v694_v13 = vunpack.c.h.bf16 %v1146_v11  ;;  %v1594_v30 = vld [vmem:[%s1331_s19 + $0x1c] sm:$0x1] }
  0x54   : > { %v695_v14 = vunpack.c.l.bf16 %v1148_v43  ;;  %v696_v29 = vunpack.c.h.bf16 %v1148_v43  ;;  %v697_v52 = vunpack.c.l.bf16 %v1150_v47  ;;  %v698_v53 = vunpack.c.h.bf16 %v1150_v47 }
  0x55   : > { %v704_v1 = vmul.f32 %v1152_v6, %v691_v10  ;;  %v705_v54 = vmul.f32 %v1152_v6, %v692_v2  ;;  %v706_v9 = vmul.f32 %v1152_v6, %v693_v51  ;;  %v707_v16 = vmul.f32 %v1152_v6, %v694_v13 }
  0x56   : > { %v708_v33 = vmul.f32 %v1152_v6, %v695_v14  ;;  %v709_v39 = vmul.f32 %v1152_v6, %v696_v29  ;;  %v710_v40 = vmul.f32 %v1152_v6, %v697_v52  ;;  %v711_v3 = vmul.f32 %v1152_v6, %v698_v53 }
  0x57   : > { %v712_v45 = vadd.f32 %v704_v1, %v674_v37  ;;  %v713_v59 = vadd.f32 %v705_v54, %v675_v8  ;;  %v1605_v34 = vadd.f32 %v706_v9, %v676_v38  ;;  %v1607_v20 = vadd.f32 %v707_v16, %v677_v41  ;;  %v1162_v54 = vld [vmem:[%s1331_s19 + $0x10] sm:$0xe]  ;;  %v1163_v9 = vld [vmem:[%s1331_s19 + $0x18] sm:$0xe] }
  0x58   : > { %v716_v46 = vadd.f32 %v708_v33, %v678_v42  ;;  %v1618_v63 = vadd.f32 %v709_v39, %v679_v49  ;;  %v1620_v35 = vadd.f32 %v710_v40, %v680_v50  ;;  %v1622_v56 = vadd.f32 %v711_v3, %v681_v7  ;;  %v1164_v3 = vld [vmem:[%s1331_s19 + $0x20] sm:$0xe] }
  0x59   : > { %v728_v23 = vunpack.c.l.bf16 %v1591_v21  ;;  %v729_v57 = vunpack.c.l.bf16 %v1594_v30  ;;  %v730_v31 = vunpack.c.l.bf16 %v1597_v25  ;;  %v731_v36 = vunpack.c.l.bf16 %v1600_v55 }
  0x5a   : > { %v732_v15 = vunpack.c.l.bf16 %v1603_v44  ;;  %v733_v5 = vunpack.c.l.bf16 %v1610_v4  ;;  %v734_v18 = vunpack.c.l.bf16 %v1613_v62  ;;  %v735_v32 = vunpack.c.l.bf16 %v1616_v22 }
  0x5b   : > { %v741_v24 = vmul.f32 %v1161_v0, %v691_v10  ;;  %v742_v58 = vmul.f32 %v1161_v0, %v728_v23  ;;  %v743_v19 = vmul.f32 %v1161_v0, %v692_v2  ;;  %v744_v26 = vmul.f32 %v1161_v0, %v729_v57 }
  0x5c   : > { %v745_v27 = vmul.f32 %v1161_v0, %v693_v51  ;;  %v746_v60 = vmul.f32 %v1161_v0, %v730_v31  ;;  %v747_v61 = vmul.f32 %v1161_v0, %v694_v13  ;;  %v748_v28 = vmul.f32 %v1161_v0, %v731_v36 }
  0x5d   : > { %v749_v17 = vmul.f32 %v1161_v0, %v695_v14  ;;  %v750_v37 = vmul.f32 %v1161_v0, %v732_v15  ;;  %v751_v8 = vmul.f32 %v1161_v0, %v696_v29  ;;  %v752_v11 = vmul.f32 %v1161_v0, %v733_v5 }
  0x5e   : > { %v753_v12 = vmul.f32 %v1161_v0, %v697_v52  ;;  %v754_v38 = vmul.f32 %v1161_v0, %v734_v18  ;;  %v755_v41 = vmul.f32 %v1161_v0, %v698_v53  ;;  %v756_v42 = vmul.f32 %v1161_v0, %v735_v32 }
  0x5f   : > { %v773_v43 = vrot.slane %v741_v24, 1  ;;  %v774_v47 = vrot.slane %v742_v58, 1  ;;  %v776_v48 = vrot.slane %v743_v19, 1  ;;  %v777_v49 = vrot.slane %v744_v26, 1  ;;  %v1165_v26 = vld [vmem:[%s1331_s19 + $0x28] sm:$0xe] }
  0x60   : > { %v779_v50 = vrot.slane %v745_v27, 1  ;;  %v780_v10 = vrot.slane %v746_v60, 1  ;;  %v782_v6 = vrot.slane %v747_v61, 1  ;;  %v783_v7 = vrot.slane %v748_v28, 1  ;;  %v1166_v27 = vld [vmem:[%s1331_s19 + $0x30] sm:$0xe] }
  0x61   : > { %v775_v2 = vsel %vm323_vm0, %v773_v43, %v774_v47  ;;  %v778_v51 = vsel %vm323_vm0, %v776_v48, %v777_v49  ;;  %v785_v13 = vrot.slane %v749_v17, 1  ;;  %v786_v14 = vrot.slane %v750_v37, 1  ;;  %v1167_v37 = vld [vmem:[%s1331_s19 + $0x38] sm:$0xe] }
  0x62   : > { %v781_v29 = vsel %vm323_vm0, %v779_v50, %v780_v10  ;;  %v784_v52 = vsel %vm323_vm0, %v782_v6, %v783_v7  ;;  %v788_v53 = vrot.slane %v751_v8, 1  ;;  %v789_v1 = vrot.slane %v752_v11, 1  ;;  %v1168_v8 = vld [vmem:[%s1331_s19 + $0x40] sm:$0xe]  ;;  %v1169_v11 = vld [vmem:[%s1331_s19 + $0x48] sm:$0xe] }
  0x63   : > { %v787_v16 = vsel %vm323_vm0, %v785_v13, %v786_v14  ;;  %v791_v33 = vrot.slane %v753_v12, 1  ;;  %v792_v39 = vrot.slane %v754_v38, 1  ;;  %v794_v40 = vrot.slane %v755_v41, 1  ;;  %v1170_v41 = vld [vmem:[%s1722_s1 + $0x8] ss:$0 sm:$0xff] }
  0x64   : > { %v790_v0 = vsel %vm323_vm0, %v788_v53, %v789_v1  ;;  %v795_v24 = vrot.slane %v756_v42, 1  ;;  %v1660_v58 = vadd.f32 %v775_v2, %v712_v45  ;;  %v1662_v19 = vadd.f32 %v778_v51, %v713_v59 }
  0x65   : > { %v793_v60 = vsel %vm323_vm0, %v791_v33, %v792_v39  ;;  %v807_v61 = vadd.f32 %v781_v29, %v1605_v34  ;;  %v808_v28 = vadd.f32 %v784_v52, %v1607_v20  ;;  %v809_v17 = vadd.f32 %v787_v16, %v716_v46 }
  0x66   : > { %v796_v12 = vsel %vm323_vm0, %v794_v40, %v795_v24  ;;  %v810_v38 = vadd.f32 %v790_v0, %v1618_v63  ;;  %v811_v45 = vadd.f32 %v793_v60, %v1620_v35  ;;  %v821_v59 = vunpack.c.l.bf16 %v1162_v54  ;;  %v1171_v40 = vld [vmem:[%s1723_s2] ss:$0 sm:$0xff] }
  0x67   : > { %v812_v42 = vadd.f32 %v796_v12, %v1622_v56  ;;  %v822_v34 = vunpack.c.l.bf16 %v1163_v9  ;;  %v823_v43 = vunpack.c.l.bf16 %v1164_v3  ;;  %v824_v20 = vunpack.c.l.bf16 %v1165_v26 }
  0x68   : > { %v825_v46 = vunpack.c.l.bf16 %v1166_v27  ;;  %v826_v47 = vunpack.c.l.bf16 %v1167_v37  ;;  %v827_v48 = vunpack.c.l.bf16 %v1168_v8  ;;  %v828_v49 = vunpack.c.l.bf16 %v1169_v11 }
  0x69   : > { %v834_v50 = vmul.f32 %v1170_v41, %v821_v59  ;;  %v835_v63 = vmul.f32 %v1170_v41, %v728_v23  ;;  %v836_v10 = vmul.f32 %v1170_v41, %v822_v34  ;;  %v837_v35 = vmul.f32 %v1170_v41, %v729_v57 }
  0x6a   : > { %v838_v6 = vmul.f32 %v1170_v41, %v823_v43  ;;  %v839_v7 = vmul.f32 %v1170_v41, %v730_v31  ;;  %v840_v56 = vmul.f32 %v1170_v41, %v824_v20  ;;  %v841_v2 = vmul.f32 %v1170_v41, %v731_v36 }
  0x6b   : > { %v842_v51 = vmul.f32 %v1170_v41, %v825_v46  ;;  %v843_v13 = vmul.f32 %v1170_v41, %v732_v15  ;;  %v844_v14 = vmul.f32 %v1170_v41, %v826_v47  ;;  %v845_v21 = vmul.f32 %v1170_v41, %v733_v5 }
  0x6c   : > { %v846_v23 = vmul.f32 %v1170_v41, %v827_v48  ;;  %v847_v30 = vmul.f32 %v1170_v41, %v734_v18  ;;  %v848_v57 = vmul.f32 %v1170_v41, %v828_v49  ;;  %v849_v25 = vmul.f32 %v1170_v41, %v735_v32 }
  0x6d   : > { %v866_v31 = vrot.slane %v834_v50, 2  ;;  %v867_v29 = vrot.slane %v835_v63, 2  ;;  %v869_v55 = vrot.slane %v836_v10, 2  ;;  %v870_v36 = vrot.slane %v837_v35, 2 }
  0x6e   : > { %v872_v52 = vrot.slane %v838_v6, 2  ;;  %v873_v53 = vrot.slane %v839_v7, 2  ;;  %v875_v44 = vrot.slane %v840_v56, 2  ;;  %v876_v15 = vrot.slane %v841_v2, 2 }
  0x6f   : > { %v868_v1 = vsel %vm417_vm1, %v866_v31, %v867_v29  ;;  %v871_v4 = vsel %vm417_vm1, %v869_v55, %v870_v36  ;;  %v878_v5 = vrot.slane %v842_v51, 2  ;;  %v879_v54 = vrot.slane %v843_v13, 2 }
  0x70   : > { %v874_v62 = vsel %vm417_vm1, %v872_v52, %v873_v53  ;;  %v877_v18 = vsel %vm417_vm1, %v875_v44, %v876_v15  ;;  %v881_v22 = vrot.slane %v844_v14, 2  ;;  %v882_v32 = vrot.slane %v845_v21, 2 }
  0x71   : > { %v880_v9 = vsel %vm417_vm1, %v878_v5, %v879_v54  ;;  %v884_v16 = vrot.slane %v846_v23, 2  ;;  %v885_v33 = vrot.slane %v847_v30, 2  ;;  %v887_v39 = vrot.slane %v848_v57, 2 }
  0x72   : > { %v883_v3 = vsel %vm417_vm1, %v881_v22, %v882_v32  ;;  %v888_v0 = vrot.slane %v849_v25, 2  ;;  %v898_v24 = vadd.f32 %v868_v1, %v1660_v58  ;;  %v899_v26 = vadd.f32 %v871_v4, %v1662_v19 }
  0x73   : > { %v886_v27 = vsel %vm417_vm1, %v884_v16, %v885_v33  ;;  %v900_v60 = vadd.f32 %v874_v62, %v807_v61  ;;  %v901_v37 = vadd.f32 %v877_v18, %v808_v28  ;;  %v902_v8 = vadd.f32 %v880_v9, %v809_v17 }
  0x74   : > { %v889_v11 = vsel %vm417_vm1, %v887_v39, %v888_v0  ;;  %v903_v12 = vadd.f32 %v883_v3, %v810_v38  ;;  %v904_v59 = vadd.f32 %v886_v27, %v811_v45  ;;  %v913_v41 = vadd.f32 %v1171_v40, %v898_v24 }
  0x75   : > { %v905_v34 = vadd.f32 %v889_v11, %v812_v42  ;;  %v914_v43 = vadd.f32 %v1171_v40, %v899_v26  ;;  %v915_v20 = vadd.f32 %v1171_v40, %v900_v60  ;;  %v916_v46 = vadd.f32 %v1171_v40, %v901_v37 }
  0x76   : > { %v917_v47 = vadd.f32 %v1171_v40, %v902_v8  ;;  %v918_v48 = vadd.f32 %v1171_v40, %v903_v12  ;;  %v919_v49 = vadd.f32 %v1171_v40, %v904_v59  ;;  %v1172_v58 = vmul.f32 -1.442695, %v913_v41 }
  0x77   : > { %v920_v50 = vadd.f32 %v1171_v40, %v905_v34  ;;  %v1173_v19 = vmul.f32 -1.442695, %v914_v43  ;;  %v1174_v63 = vmul.f32 -1.442695, %v915_v20  ;;  %v1175_v10 = vmul.f32 -1.442695, %v916_v46 }
  0x78   : > { %1231 = vpow2.f32 %v1172_v58  ;;  %v1176_v61 = vmul.f32 -1.442695, %v917_v47  ;;  %v1177_v28 = vmul.f32 -1.442695, %v918_v48  ;;  %v1178_v17 = vmul.f32 -1.442695, %v919_v49 }
  0x79   : > { %1233 = vpow2.f32 %v1173_v19  ;;  %v1179_v38 = vmul.f32 -1.442695, %v920_v50 }
  0x7a   : > { %1235 = vpow2.f32 %v1174_v63 }
  0x7b   : > { %1237 = vpow2.f32 %v1175_v10 }
  0x7c   : > { %1239 = vpow2.f32 %v1176_v61 }
  0x7d   : > { %1241 = vpow2.f32 %v1177_v28 }
  0x7e   : > { %1243 = vpow2.f32 %v1178_v17 }
  0x7f   : > { %1245 = vpow2.f32 %v1179_v38 }
  0x85   : > { %v1232_v45 = vpop.eup %1231 }
  0x86   : > { %v1234_v42 = vpop.eup %1233  ;;  %v945_v35 = vadd.f32 1.0, %v1232_v45 }
  0x87   : > { %v1236_v6 = vpop.eup %1235  ;;  %v946_v7 = vadd.f32 1.0, %v1234_v42 }
  0x88   : > { %v1238_v56 = vpop.eup %1237  ;;  %v947_v2 = vadd.f32 1.0, %v1236_v6  ;;  %1247 = vrcp.f32 %v945_v35 }
  0x89   : > { %v1240_v51 = vpop.eup %1239  ;;  %v948_v13 = vadd.f32 1.0, %v1238_v56  ;;  %1249 = vrcp.f32 %v946_v7 }
  0x8a   : > { %v1242_v14 = vpop.eup %1241  ;;  %v949_v21 = vadd.f32 1.0, %v1240_v51  ;;  %1251 = vrcp.f32 %v947_v2 }
  0x8b   : > { %v1244_v23 = vpop.eup %1243  ;;  %v950_v30 = vadd.f32 1.0, %v1242_v14  ;;  %1253 = vrcp.f32 %v948_v13 }
  0x8c   : > { %v1246_v57 = vpop.eup %1245  ;;  %v951_v25 = vadd.f32 1.0, %v1244_v23  ;;  %1255 = vrcp.f32 %v949_v21 }
  0x8d   : > { %v952_v31 = vadd.f32 1.0, %v1246_v57  ;;  %1257 = vrcp.f32 %v950_v30 }
  0x8e   : > { %1259 = vrcp.f32 %v951_v25 }
  0x8f   : > { %1261 = vrcp.f32 %v952_v31 }
  0x95   : > { %v1248_v29 = vpop.eup %1247 }
  0x96   : > { %v1250_v55 = vpop.eup %1249  ;;  %v969_v36 = vmul.f32 %v1248_v29, %v913_v41 }
  0x97   : > { %v1252_v52 = vpop.eup %1251  ;;  %v970_v53 = vmul.f32 %v1250_v55, %v914_v43 }
  0x98   : > { %v1254_v44 = vpop.eup %1253  ;;  %v971_v15 = vmul.f32 %v1252_v52, %v915_v20 }
  0x99   : > { %v1256_v1 = vpop.eup %1255  ;;  %v972_v4 = vmul.f32 %v1254_v44, %v916_v46  ;;  %v1186_v5 = vpack.c.bf16 %v970_v53, %v969_v36 }
  0x9a   : > { %v1258_v54 = vpop.eup %1257  ;;  %v973_v62 = vmul.f32 %v1256_v1, %v917_v47 }
  0x9b   : > { %v1260_v18 = vpop.eup %1259  ;;  %v974_v22 = vmul.f32 %v1258_v54, %v918_v48  ;;  %1187 = vst [vmem:[%s232_s20] sm:$0xff] %v1186_v5   ;;  %v1191_v32 = vpack.c.bf16 %v972_v4, %v971_v15 }
  0x9c   : > { %v1262_v9 = vpop.eup %1261  ;;  %v975_v16 = vmul.f32 %v1260_v18, %v919_v49 }
  0x9d   : > { %v976_v33 = vmul.f32 %v1262_v9, %v920_v50  ;;  %1203 = vst [vmem:[%s232_s20 + $0x8] sm:$0xff] %v1191_v32   ;;  %v1196_v39 = vpack.c.bf16 %v974_v22, %v973_v62 }
  0x9f   : > { %1204 = vst [vmem:[%s232_s20 + $0x10] sm:$0xff] %v1196_v39   ;;  %v1201_v40 = vpack.c.bf16 %v976_v33, %v975_v16 }
  0xa1   : > { %1205 = vst [vmem:[%s232_s20 + $0x18] sm:$0xff] %v1201_v40  }
  0xa2 PF: > { %s13_s14 = sadd.s32 1, %s1285_s14   ;;  %s1725_s12 = smov %s1281_s13 }
  0xa3   : > { %p10_p5 = scmp.ge.s32.totalorder %s13_s14, 4   ;;  %s1726_s13 = smov %s1728_s15 }
  0xa5   :  { %12 = sbr.rel (!%p10_p5) target bundleno = 2 (0x2), region = 70 }

// kernel: _lambda_.16
= control target key start
LH: loop header
LB: loop body
LE: loop exit
PB: predicated region body
PF: predicated region fallthrough
CT: control target
= control target key end

     0   :  { %s247_s6 = smov 0   ;;  %s268_s0 = inlined_call_operand.vmem [shape: bf16[2,64,128], index: 0, kind: input, shape index: {}]   ;;  %s269_s1 = inlined_call_operand.vmem [shape: f32[2,1,128], index: 1, kind: output, shape index: {}]  }
   0x1 LB: > { %s192_s7 = sadd.s32 4294967295, %s235_s6   ;;  %p196_p0 = scmp.ge.s32.totalorder %s235_s6, 1  ;;  %s235_s6 = sphi %s247_s6, %s11_s6  }
   0x2   : > { %p87_p1 = scmp.lt.s32.totalorder %s235_s6, 3 }
   0x4   : > { %p88_p2 = pnand %p196_p0, %p87_p1 }
   0x5   : > { %p105_p3 = scmp.lt.s32.totalorder (!%p88_p2), %s192_s7, 1 }
   0x6   : > { %91 = sbr.rel (%p88_p2) target bundleno = 46 (0x2e), region = 24 }
   0xb   : > { %s271_s7 = smov (!%p105_p3, %s192_s7), 1 }
   0xc   : > { %s201_s8 = sshll.u32 %s271_s7, 5  ;;  %s112_s14 = scalar_lea.vmem %s269_s1, %s271_s7 }
   0xd   : > { %s109_s11 = scalar_lea.vmem %s268_s0, %s201_s8 }
   0xe   : > { %v203_v0 = vld [vmem:[%s109_s11] sm:$0xff]   ;;  %v218_v1 = vld [vmem:[%s109_s11 + $0x8] sm:$0xff]   ;;  %v219_v5 = vld [vmem:[%s109_s11 + $0x10] sm:$0xff]  }
   0xf   : > { %v204_v2 = vunpack.c.l.bf16 %v203_v0  ;;  %v205_v3 = vunpack.c.h.bf16 %v203_v0  ;;  %v208_v4 = vunpack.c.l.bf16 %v218_v1  ;;  %v209_v6 = vunpack.c.h.bf16 %v218_v1  ;;  %v220_v10 = vld [vmem:[%s109_s11 + $0x18] sm:$0xff]  }
  0x10   : > { %v212_v8 = vunpack.c.l.bf16 %v219_v5  ;;  %v213_v11 = vunpack.c.h.bf16 %v219_v5  ;;  %v216_v13 = vunpack.c.l.bf16 %v220_v10  ;;  %v217_v15 = vunpack.c.h.bf16 %v220_v10 }
  0x11   : > { %v129_v7 = vadd.f32 %v205_v3, %v204_v2 }
  0x13   : > { %v130_v9 = vadd.f32 %v208_v4, %v129_v7 }
  0x15   : > { %v131_v12 = vadd.f32 %v209_v6, %v130_v9 }
  0x17   : > { %v132_v14 = vadd.f32 %v212_v8, %v131_v12 }
  0x19   : > { %v133_v16 = vadd.f32 %v213_v11, %v132_v14 }
  0x1b   : > { %v134_v17 = vadd.f32 %v216_v13, %v133_v16 }
  0x1d   : > { %v135_v18 = vadd.f32 %v217_v15, %v134_v17 }
  0x1f   : > { %v136_v19 = vrot.slane %v135_v18, 4 }
  0x21   : > { %v137_v20 = vadd.f32 %v136_v19, %v135_v18 }
  0x23   : > { %v138_v21 = vrot.slane %v137_v20, 2 }
  0x25   : > { %v139_v22 = vadd.f32 %v138_v21, %v137_v20 }
  0x27   : > { %v140_v23 = vrot.slane %v139_v22, 1 }
  0x29   : > { %v141_v24 = vadd.f32 %v140_v23, %v139_v22 }
  0x2b   : > { %v143_v25 = vmul.f32 0.015625, %v141_v24 }
  0x2d   : > { %144 = vst [vmem:[%s112_s14] sm:$0x1] %v143_v25 }
  0x2e PF: > { %s11_s6 = sadd.s32 1, %s235_s6  }
  0x2f   : > { %p8_p4 = scmp.ge.s32.totalorder %s11_s6, 4  }
  0x31   :  { %10 = sbr.rel (!%p8_p4) target bundleno = 1 (0x1), region = 54 }

// kernel: _lambda_.17
= control target key start
LH: loop header
LB: loop body
LE: loop exit
PB: predicated region body
PF: predicated region fallthrough
CT: control target
= control target key end

     0   :  { %s1119_s18 = smov 0   ;;  %s1121_s19 = smov 0   ;;  %s1196_s0 = inlined_call_operand.vmem [shape: bf16[2,64,128], index: 0, kind: input, shape index: {}]   ;;  %s1197_s1 = inlined_call_operand.vmem [shape: bf16[128,128], index: 1, kind: input, shape index: {}]   ;;  %s1198_s2 = inlined_call_operand.vmem [shape: f32[1,128], index: 2, kind: input, shape index: {}]   ;;  %s1199_s3 = inlined_call_operand.vmem [shape: f32[2,1,128], index: 3, kind: input, shape index: {}]   ;;  %s1200_s4 = inlined_call_operand.vmem [shape: bf16[2,64,128], index: 4, kind: input, shape index: {}]   ;;  %s1201_s5 = inlined_call_operand.vmem [shape: bf16[2,64,128], index: 5, kind: output, shape index: {}]  }
   0x1   :  { %s1123_s20 = smov 0  }
   0x2 LB: > { %s41_s21 = sadd.s32 1, %s1083_s19  ;;  %p882_p0 = scmp.ge.s32.totalorder %s1087_s20, 1  ;;  %s1087_s20 = sphi %s1123_s20, %s15_s20   ;;  %s1083_s19 = sphi %s1121_s19, %s1203_s19   ;;  %s1079_s18 = sphi %s1119_s18, %s1202_s18  }
   0x3   : > { %p43_p1 = scmp.ge.s32.totalorder %s41_s21, 2  ;;  %p288_p2 = scmp.lt.s32.totalorder %s1087_s20, 3 }
   0x5   : > { %s1205_s21 = smov (%p43_p1, %s41_s21), 0  ;;  %p289_p3 = pnand %p882_p0, %p288_p2 }
   0x6   : > { %p360_p4 = scmp.lt.s32.totalorder (!%p289_p3), %s1079_s18, 1 }
   0x7   : > { %292 = sbr.rel (%p289_p3) target bundleno = 251 (0xfb), region = 40 }
   0xc   : > { %v1057_v0 = vld [vmem:[%s1197_s1 + $0x38] sm:$0xff]   ;;  %v1058_v1 = vld [vmem:[%s1197_s1 + $0x30] sm:$0xff]   ;;  %s1207_s18 = smov (!%p360_p4, %s1079_s18), 1  ;;  %v1059_v2 = vld [vmem:[%s1197_s1 + $0x28] sm:$0xff]  }
   0xd   : > { %993 = vmatprep.subr.bf16.mxu0 %v1057_v0  ;;  %1017 = vmatprep.subr.bf16.mxu1 %v1057_v0  ;;  %s1146_s28 = sshll.u32 %s1207_s18, 5  ;;  %s389_s9 = scalar_lea.vmem %s1199_s3, %s1207_s18  ;;  %v1060_v3 = vld [vmem:[%s1197_s1 + $0x20] sm:$0xff]   ;;  %v1061_v14 = vld [vmem:[%s1197_s1 + $0x18] sm:$0xff]   ;;  %v1062_v18 = vld [vmem:[%s1197_s1 + $0x10] sm:$0xff]  }
   0xe   : > { %994 = vmatpush3.bf16.msra.mxu0 %v1057_v0  ;;  %1025 = vmatpush3.bf16.msra.mxu1 %v1057_v0  ;;  %s1152_s6 = scalar_lea.vmem %s1196_s0, %s1146_s28  ;;  %v889_v5 = vld [vmem:[%s389_s9] ss:$0 sm:$0xff]  ;;  %v1063_v21 = vld [vmem:[%s1197_s1 + $0x8] sm:$0xff]   ;;  %s401_s25 = scalar_lea.vmem %s1200_s4, %s1146_s28 }
   0xf   : > { %995 = vmatprep.subr.bf16.mxu0 %v1058_v1  ;;  %1018 = vmatprep.subr.bf16.mxu1 %v1058_v1  ;;  %v921_v4 = vld [vmem:[%s1152_s6] sm:$0xff]   ;;  %v973_v6 = vld [vmem:[%s1152_s6 + $0x10] sm:$0xff]   ;;  %v972_v19 = vld [vmem:[%s1152_s6 + $0x8] sm:$0xff]  }
  0x10   : > { %v922_v7 = vunpack.c.l.bf16 %v921_v4  ;;  %v923_v8 = vunpack.c.h.bf16 %v921_v4  ;;  %v930_v9 = vunpack.c.l.bf16 %v973_v6  ;;  %v931_v10 = vunpack.c.h.bf16 %v973_v6  ;;  %v974_v20 = vld [vmem:[%s1152_s6 + $0x18] sm:$0xff]   ;;  %v1064_v26 = vld [vmem:[%s1197_s1] sm:$0xff]   ;;  %v975_v34 = vld [vmem:[%s401_s25 + $0x8] sm:$0xff]   ;;  %s414_s6 = scalar_lea.vmem %s1201_s5, %s1146_s28 }
  0x11   : > { %v926_v22 = vunpack.c.l.bf16 %v972_v19  ;;  %v927_v23 = vunpack.c.h.bf16 %v972_v19  ;;  %v934_v24 = vunpack.c.l.bf16 %v974_v20  ;;  %v935_v25 = vunpack.c.h.bf16 %v974_v20  ;;  %v898_v33 = vld [vmem:[%s1198_s2] ss:$0 sm:$0xff]  ;;  %v977_v35 = vld [vmem:[%s401_s25 + $0x18] sm:$0xff]   ;;  %v976_v39 = vld [vmem:[%s401_s25 + $0x10] sm:$0xff]  }
  0x12   : > { %996 = vmatpush3.bf16.msra.mxu0 %v1058_v1  ;;  %1026 = vmatpush3.bf16.msra.mxu1 %v1058_v1  ;;  %v452_v11 = vmul.f32 %v922_v7, %v889_v5  ;;  %v453_v12 = vmul.f32 %v923_v8, %v889_v5  ;;  %v456_v13 = vmul.f32 %v930_v9, %v889_v5  ;;  %v937_v38 = vld [vmem:[%s401_s25] sm:$0xff]   ;;  %v942_v41 = vunpack.c.l.bf16 %v975_v34 }
  0x13   : > { %997 = vmatprep.subr.bf16.mxu0 %v1059_v2  ;;  %1019 = vmatprep.subr.bf16.mxu1 %v1059_v2  ;;  %v457_v15 = vmul.f32 %v931_v10, %v889_v5  ;;  %v454_v27 = vmul.f32 %v926_v22, %v889_v5  ;;  %v455_v28 = vmul.f32 %v927_v23, %v889_v5  ;;  %v950_v43 = vunpack.c.l.bf16 %v977_v35 }
  0x14   : > { %v460_v16 = vpack.c.bf16 %v453_v12, %v452_v11  ;;  %v458_v29 = vmul.f32 %v934_v24, %v889_v5  ;;  %v459_v30 = vmul.f32 %v935_v25, %v889_v5  ;;  %v943_v46 = vunpack.c.h.bf16 %v975_v34 }
  0x15   : > { %v462_v17 = vpack.c.bf16 %v457_v15, %v456_v13  ;;  %v461_v31 = vpack.c.bf16 %v455_v28, %v454_v27  ;;  %v951_v47 = vunpack.c.h.bf16 %v977_v35  ;;  %v938_v49 = vunpack.c.l.bf16 %v937_v38 }
  0x16   : > { %998 = vmatpush3.bf16.msra.mxu0 %v1059_v2  ;;  %1027 = vmatpush3.bf16.msra.mxu1 %v1059_v2  ;;  %v463_v32 = vpack.c.bf16 %v459_v30, %v458_v29  ;;  %v946_v51 = vunpack.c.l.bf16 %v976_v39  ;;  %v939_v56 = vunpack.c.h.bf16 %v937_v38  ;;  %v947_v57 = vunpack.c.h.bf16 %v976_v39 }
  0x17   : > { %999 = vmatprep.subr.bf16.mxu0 %v1060_v3  ;;  %1020 = vmatprep.subr.bf16.mxu1 %v1060_v3 }
  0x18   : > { %1009 = vmatprep.mubr.bf16.mxu0 %v460_v16  ;;  %1013 = vmatprep.mubr.bf16.mxu1 %v462_v17 }
  0x1a   : > { %1000 = vmatpush3.bf16.msra.mxu0 %v1060_v3  ;;  %1028 = vmatpush3.bf16.msra.mxu1 %v1060_v3 }
  0x1b   : > { %1001 = vmatprep.subr.bf16.mxu0 %v1061_v14  ;;  %1021 = vmatprep.subr.bf16.mxu1 %v1061_v14 }
  0x1e   : > { %1002 = vmatpush3.bf16.msra.mxu0 %v1061_v14  ;;  %1029 = vmatpush3.bf16.msra.mxu1 %v1061_v14 }
  0x1f   : > { %1003 = vmatprep.subr.bf16.mxu0 %v1062_v18  ;;  %1022 = vmatprep.subr.bf16.mxu1 %v1062_v18 }
  0x22   : > { %1004 = vmatpush3.bf16.msra.mxu0 %v1062_v18  ;;  %1030 = vmatpush3.bf16.msra.mxu1 %v1062_v18 }
  0x23   : > { %1005 = vmatprep.subr.bf16.mxu0 %v1063_v21  ;;  %1023 = vmatprep.subr.bf16.mxu1 %v1063_v21 }
  0x26   : > { %1006 = vmatpush3.bf16.msra.mxu0 %v1063_v21  ;;  %1031 = vmatpush3.bf16.msra.mxu1 %v1063_v21 }
  0x27   : > { %1007 = vmatprep.subr.bf16.mxu0 %v1064_v26  ;;  %1024 = vmatprep.subr.bf16.mxu1 %v1064_v26 }
  0x2a   : > { %1008 = vmatpush3.bf16.msra.mxu0 %v1064_v26  ;;  %1032 = vmatpush3.bf16.msra.mxu1 %v1064_v26 }
  0x2d   : > { %1010 = vmatmul.mubr.bf16.vlgmr.msra.gmra.mxu0 %v461_v31  ;;  %1014 = vmatmul.mubr.bf16.vlgmr.msra.gmra.mxu1 %v463_v32 }
  0xed   : > { %v1011_v36 = vpop.f32.mrf.mxu0  ;;  %v1015_v37 = vpop.f32.mrf.mxu1 }
  0xee   : > { %v637_v40 = vadd.f32 %v1011_v36, %v898_v33  ;;  %v641_v42 = vadd.f32 %v1015_v37, %v898_v33 }
  0xef   : > { %v570_v44 = vpop.f32.mrf.mxu0  ;;  %v586_v45 = vpop.f32.mrf.mxu1 }
  0xf0   : > { %v635_v48 = vadd.f32 %v898_v33, %v570_v44  ;;  %v639_v50 = vadd.f32 %v898_v33, %v586_v45  ;;  %v661_v58 = vadd.f32 %v942_v41, %v637_v40  ;;  %v665_v59 = vadd.f32 %v950_v43, %v641_v42 }
  0xf1   : > { %v1012_v52 = vpop.f32.mrf.mxu0  ;;  %v1016_v53 = vpop.f32.mrf.mxu1 }
  0xf2   : > { %v638_v54 = vadd.f32 %v1012_v52, %v898_v33  ;;  %v642_v55 = vadd.f32 %v1016_v53, %v898_v33  ;;  %v659_v2 = vadd.f32 %v938_v49, %v635_v48  ;;  %v663_v3 = vadd.f32 %v946_v51, %v639_v50 }
  0xf3   : > { %v573_v60 = vpop.f32.mrf.mxu0  ;;  %v589_v61 = vpop.f32.mrf.mxu1 }
  0xf4   : > { %v662_v62 = vadd.f32 %v943_v46, %v638_v54  ;;  %v666_v63 = vadd.f32 %v951_v47, %v642_v55  ;;  %v636_v0 = vadd.f32 %v898_v33, %v573_v60  ;;  %v640_v1 = vadd.f32 %v898_v33, %v589_v61 }
  0xf6   : > { %v960_v4 = vpack.c.bf16 %v662_v62, %v661_v58  ;;  %v970_v5 = vpack.c.bf16 %v666_v63, %v665_v59  ;;  %v660_v6 = vadd.f32 %v939_v56, %v636_v0  ;;  %v664_v7 = vadd.f32 %v947_v57, %v640_v1 }
  0xf8   : > { %978 = vst [vmem:[%s414_s6 + $0x8] sm:$0xff] %v960_v4   ;;  %980 = vst [vmem:[%s414_s6 + $0x18] sm:$0xff] %v970_v5   ;;  %v955_v8 = vpack.c.bf16 %v660_v6, %v659_v2  ;;  %v965_v9 = vpack.c.bf16 %v664_v7, %v663_v3 }
  0xfa   : > { %956 = vst [vmem:[%s414_s6] sm:$0xff] %v955_v8   ;;  %979 = vst [vmem:[%s414_s6 + $0x10] sm:$0xff] %v965_v9  }
  0xfb PF: > { %s15_s20 = sadd.s32 1, %s1087_s20   ;;  %s1202_s18 = smov %s1083_s19 }
  0xfc   : > { %p12_p5 = scmp.ge.s32.totalorder %s15_s20, 4   ;;  %s1203_s19 = smov %s1205_s21 }
  0xfe   :  { %14 = sbr.rel (!%p12_p5) target bundleno = 2 (0x2), region = 90 }

</bundles_post_ra>
